<compile_context>
chip_gen: v7x
topology: tpu7x:2x2x1
jax: 0.10.0
libtpu: 0.0.40
codegen_flags: <defaults>
</compile_context>

<pallas_src>
import functools

import jax
import jax.numpy as jnp
from jax.experimental import pallas as pl
from jax.experimental.pallas import tpu as pltpu

LANE = 128


def _residual_block_kernel(x_ref, w_ref, b_ref, wi_ref, bi_ref, o_ref,
                           buf_a, buf_b, acc_ref, *, H, W, Cp, L, id_is_conv):
    """Fused residual conv block for one batch element.

    x_ref:  (1, H, W, Cp)      channel-padded input
    w_ref:  (L, 9, Cp, Cp)     per-layer 3x3 weights, taps flattened, channel-padded
    b_ref:  (L, 1, Cp)         per-layer biases, channel-padded
    wi_ref: (Cp, Cp)           1x1 shortcut-conv weight (unused if id_is_conv=False)
    bi_ref: (1, Cp)            1x1 shortcut-conv bias
    o_ref:  (1, H, W, Cp)      output
    buf_a, buf_b: VMEM (H+2, W+2, Cp)  ping-pong padded activation buffers
    acc_ref:      VMEM (H*W, Cp)       f32 matmul accumulator
    """
    f32 = jnp.float32

    # Zero both padded activation buffers once per grid step: the 1-pixel border
    # implements padding=1 for free; interiors are overwritten below.
    buf_a[...] = jnp.zeros_like(buf_a)
    buf_b[...] = jnp.zeros_like(buf_b)

    x = x_ref[0].astype(f32)                       # (H, W, Cp)
    buf_a[1:H + 1, 1:W + 1, :] = x                 # interior of padded buffer

    bufs = (buf_a, buf_b)
    y = None
    for l in range(L):                             # static unroll over layers
        src = bufs[l % 2]
        # Init accumulator with the (channel-padded) bias.
        acc_ref[...] = jnp.broadcast_to(b_ref[l], (H * W, Cp))
        # 3x3 conv = 9 shifted matmuls on the MXU, f32 accumulation in VMEM.
        for ky in range(3):
            for kx in range(3):
                patch = src[ky:ky + H, kx:kx + W, :].reshape(H * W, Cp)
                acc_ref[...] += jnp.dot(
                    patch, w_ref[l, ky * 3 + kx],
                    preferred_element_type=f32)
        y = acc_ref[...]                           # (H*W, Cp)
        if l < L - 1:
            # ReLU after every conv except the last; write interior of the other
            # padded buffer (its border stays zero -> padding=1 for next layer).
            y = jnp.maximum(y, 0.0)
            dst = bufs[(l + 1) % 2]
            dst[1:H + 1, 1:W + 1, :] = y.reshape(H, W, Cp)

    # Shortcut path: Identity or 1x1 conv, fused in the same kernel.
    x_flat = x.reshape(H * W, Cp)
    if id_is_conv:
        ident = jnp.dot(x_flat, wi_ref[...],
                        preferred_element_type=f32) + bi_ref[...]
    else:
        ident = x_flat

    out = jnp.maximum(y + ident, 0.0)              # residual add + final ReLU
    o_ref[0] = out.reshape(H, W, Cp).astype(o_ref.dtype)


# ----------------------------------------------------------------------------
# Parameter init / packing (done once, outside the per-call path)
# ----------------------------------------------------------------------------

def init_residual_block_params(dim, key):
    """Deterministic init matching nn.Conv2d shapes (weights kept in HWIO)."""
    conv_params = []
    for i in range(len(dim) - 1):
        cin, cout = dim[i], dim[i + 1]
        key, kw, kb = jax.random.split(key, 3)
        bound = 1.0 / (cin * 9) ** 0.5
        w = jax.random.uniform(kw, (3, 3, cin, cout), jnp.float32, -bound, bound)
        b = jax.random.uniform(kb, (cout,), jnp.float32, -bound, bound)
        conv_params.append((w, b))
    if dim[0] == dim[-1]:
        id_params = None
    else:
        cin, cout = dim[0], dim[-1]
        key, kw, kb = jax.random.split(key, 3)
        bound = 1.0 / float(cin) ** 0.5
        wi = jax.random.uniform(kw, (1, 1, cin, cout), jnp.float32, -bound, bound)
        bi = jax.random.uniform(kb, (cout,), jnp.float32, -bound, bound)
        id_params = (wi, bi)
    return conv_params, id_params, key


def pack_residual_block_params(conv_params, id_params, dim, lane=LANE):
    """Pack per-layer weights into lane-dense, stacked arrays (once, at init)."""
    L = len(dim) - 1
    Cp = ((max(dim) + lane - 1) // lane) * lane
    w_all = jnp.zeros((L, 9, Cp, Cp), jnp.float32)
    b_all = jnp.zeros((L, 1, Cp), jnp.float32)
    for l, (w, b) in enumerate(conv_params):
        cin, cout = w.shape[2], w.shape[3]
        w_all = w_all.at[l, :, :cin, :cout].set(w.reshape(9, cin, cout))
        b_all = b_all.at[l, 0, :cout].set(b)
    if id_params is not None:
        wi, bi = id_params
        wi_p = jnp.zeros((Cp, Cp), jnp.float32).at[:dim[0], :dim[-1]].set(wi[0, 0])
        bi_p = jnp.zeros((1, Cp), jnp.float32).at[0, :dim[-1]].set(bi)
        id_is_conv = True
    else:
        wi_p = jnp.zeros((Cp, Cp), jnp.float32)
        bi_p = jnp.zeros((1, Cp), jnp.float32)
        id_is_conv = False
    return dict(w_all=w_all, b_all=b_all, wi=wi_p, bi=bi_p,
                Cp=Cp, L=L, id_is_conv=id_is_conv, c_out=dim[-1])


# ----------------------------------------------------------------------------
# Forward pass (single pallas_call for the whole residual block)
# ----------------------------------------------------------------------------

def residual_block_forward(x_nchw, packed):
    """Forward of Residual_Block('conv'). Input/output NCHW like PyTorch."""
    N, C0, H, W = x_nchw.shape
    Cp, L, CL = packed["Cp"], packed["L"], packed["c_out"]

    # One-time layout plumbing: NCHW -> NHWC + lane-pad the channel axis.
    x = jnp.transpose(x_nchw, (0, 2, 3, 1))
    x = jnp.pad(x, ((0, 0), (0, 0), (0, 0), (0, Cp - C0)))

    kernel = functools.partial(
        _residual_block_kernel,
        H=H, W=W, Cp=Cp, L=L, id_is_conv=packed["id_is_conv"])

    out = pl.pallas_call(
        kernel,
        out_shape=jax.ShapeDtypeStruct((N, H, W, Cp), jnp.float32),
        grid_spec=pltpu.PrefetchScalarGridSpec(
            num_scalar_prefetch=0,
            grid=(N,),
            in_specs=[
                pl.BlockSpec((1, H, W, Cp), lambda n: (n, 0, 0, 0)),   # x
                pl.BlockSpec((L, 9, Cp, Cp), lambda n: (0, 0, 0, 0)),  # conv weights
                pl.BlockSpec((L, 1, Cp), lambda n: (0, 0, 0)),         # conv biases
                pl.BlockSpec((Cp, Cp), lambda n: (0, 0)),              # 1x1 shortcut W
                pl.BlockSpec((1, Cp), lambda n: (0, 0)),               # 1x1 shortcut b
            ],
            out_specs=pl.BlockSpec((1, H, W, Cp), lambda n: (n, 0, 0, 0)),
            scratch_shapes=[
                pltpu.VMEM((H + 2, W + 2, Cp), jnp.float32),  # ping (padded act)
                pltpu.VMEM((H + 2, W + 2, Cp), jnp.float32),  # pong (padded act)
                pltpu.VMEM((H * W, Cp), jnp.float32),         # matmul accumulator
            ],
        ),
        compiler_params=pltpu.CompilerParams(
            dimension_semantics=("parallel",),
            vmem_limit_bytes=32 * 1024 * 1024,
        ),
    )(x, packed["w_all"], packed["b_all"], packed["wi"], packed["bi"])

    # Strip channel padding, back to NCHW.
    return jnp.transpose(out[..., :CL], (0, 3, 1, 2))


# ----------------------------------------------------------------------------
# Pure-JAX reference (lax.conv) for correctness check
# ----------------------------------------------------------------------------

def _reference_forward(x_nchw, conv_params, id_params):
    y = x_nchw
    L = len(conv_params)
    for l, (w, b) in enumerate(conv_params):
        y = jax.lax.conv_general_dilated(
            y, w, window_strides=(1, 1), padding="SAME",
            dimension_numbers=("NCHW", "HWIO", "NCHW"))
        y = y + b.reshape(1, -1, 1, 1)
        if l < L - 1:
            y = jnp.maximum(y, 0.0)
    if id_params is not None:
        wi, bi = id_params
        ident = jax.lax.conv_general_dilated(
            x_nchw, wi, window_strides=(1, 1), padding="VALID",
            dimension_numbers=("NCHW", "HWIO", "NCHW")) + bi.reshape(1, -1, 1, 1)
    else:
        ident = x_nchw
    return jnp.maximum(y + ident, 0.0)


if __name__ == "__main__":
    # Residual_Block(dim=[4, 8, 16], layer_type='conv'), x = (2, 4, 16, 16)
    dim = [4, 8, 16]
    key = jax.random.PRNGKey(0)
    key, kx = jax.random.split(key)
    x = jax.random.normal(kx, (2, dim[0], 16, 16), dtype=jnp.float32)

    conv_params, id_params, key = init_residual_block_params(dim, key)
    packed = pack_residual_block_params(conv_params, id_params, dim)

    out = jax.block_until_ready(residual_block_forward(x, packed))

    ref = _reference_forward(x, conv_params, id_params)
    assert out.shape == ref.shape == (2, dim[-1], 16, 16)
    assert jnp.allclose(out, ref, atol=1e-4, rtol=1e-4), "mismatch vs reference"

    print("KERNEL_OK")
</pallas_src>

<mosaic_0001>
module attributes {stable_mosaic.version = 11 : i64} {
  func.func @_residual_block_kernel(%arg0: i32, %arg1: memref<1x16x16x128xf32, #tpu.memory_space<vmem>>, %arg2: memref<2x9x128x128xf32, #tpu.memory_space<vmem>>, %arg3: memref<2x1x128xf32, #tpu.memory_space<vmem>>, %arg4: memref<128x128xf32, #tpu.memory_space<vmem>>, %arg5: memref<1x128xf32, #tpu.memory_space<vmem>>, %arg6: memref<1x16x16x128xf32, #tpu.memory_space<vmem>>, %arg7: memref<18x18x128xf32, #tpu.memory_space<vmem>>, %arg8: memref<18x18x128xf32, #tpu.memory_space<vmem>>, %arg9: memref<256x128xf32, #tpu.memory_space<vmem>>) attributes {dimension_semantics = [#tpu.dimension_semantics<parallel>], iteration_bounds = array<i64: 2>, scalar_prefetch = 0 : i64, scratch_operands = 3 : i64, tpu.core_type = #tpu.core_type<tc>, window_params = [{transform_indices = @transform_0, window_bounds = array<i64: 1, 16, 16, 128>}, {pipeline_mode = #tpu.pipeline_mode<synchronous>, transform_indices = @transform_1, window_bounds = array<i64: 2, 9, 128, 128>}, {pipeline_mode = #tpu.pipeline_mode<synchronous>, transform_indices = @transform_2, window_bounds = array<i64: 2, 1, 128>}, {pipeline_mode = #tpu.pipeline_mode<synchronous>, transform_indices = @transform_3, window_bounds = array<i64: 128, 128>}, {pipeline_mode = #tpu.pipeline_mode<synchronous>, transform_indices = @transform_4, window_bounds = array<i64: 1, 128>}, {transform_indices = @transform_5, window_bounds = array<i64: 1, 16, 16, 128>}]} {
    %cst = arith.constant 0.000000e+00 : f32
    %0 = vector.broadcast %cst : f32 to vector<18x18x128xf32>
    %c0 = arith.constant 0 : index
    %c0_0 = arith.constant 0 : index
    %c0_1 = arith.constant 0 : index
    %1 = vector.load %arg7[%c0, %c0_0, %c0_1] : memref<18x18x128xf32, #tpu.memory_space<vmem>>, vector<18x18x128xf32>
    tpu.vector_store %arg7[%c0, %c0_0, %c0_1], %0 {strides = array<i32>} : memref<18x18x128xf32, #tpu.memory_space<vmem>>, vector<18x18x128xf32>,
    %cst_2 = arith.constant 0.000000e+00 : f32
    %2 = vector.broadcast %cst_2 : f32 to vector<18x18x128xf32>
    %c0_3 = arith.constant 0 : index
    %c0_4 = arith.constant 0 : index
    %c0_5 = arith.constant 0 : index
    %3 = vector.load %arg8[%c0_3, %c0_4, %c0_5] : memref<18x18x128xf32, #tpu.memory_space<vmem>>, vector<18x18x128xf32>
    tpu.vector_store %arg8[%c0_3, %c0_4, %c0_5], %2 {strides = array<i32>} : memref<18x18x128xf32, #tpu.memory_space<vmem>>, vector<18x18x128xf32>,
    %c0_6 = arith.constant 0 : index
    %c0_7 = arith.constant 0 : index
    %c0_8 = arith.constant 0 : index
    %c0_9 = arith.constant 0 : index
    %4 = vector.load %arg1[%c0_6, %c0_7, %c0_8, %c0_9] : memref<1x16x16x128xf32, #tpu.memory_space<vmem>>, vector<1x16x16x128xf32>
    %5 = vector.shape_cast %4 : vector<1x16x16x128xf32> to vector<16x16x128xf32>
    %c1 = arith.constant 1 : index
    %c1_10 = arith.constant 1 : index
    %c0_11 = arith.constant 0 : index
    %6 = vector.load %arg7[%c1, %c1_10, %c0_11] : memref<18x18x128xf32, #tpu.memory_space<vmem>>, vector<16x16x128xf32>
    tpu.vector_store %arg7[%c1, %c1_10, %c0_11], %5 {strides = array<i32>} : memref<18x18x128xf32, #tpu.memory_space<vmem>>, vector<16x16x128xf32>,
    %c0_12 = arith.constant 0 : index
    %c0_13 = arith.constant 0 : index
    %c0_14 = arith.constant 0 : index
    %7 = vector.load %arg3[%c0_12, %c0_13, %c0_14] : memref<2x1x128xf32, #tpu.memory_space<vmem>>, vector<1x1x128xf32>
    %8 = vector.shape_cast %7 : vector<1x1x128xf32> to vector<1x128xf32>
    %9 = vector.shape_cast %8 : vector<1x128xf32> to vector<1x128xf32>
    %10 = vector.broadcast %9 : vector<1x128xf32> to vector<256x128xf32>
    %c0_15 = arith.constant 0 : index
    %c0_16 = arith.constant 0 : index
    %11 = vector.load %arg9[%c0_15, %c0_16] : memref<256x128xf32, #tpu.memory_space<vmem>>, vector<256x128xf32>
    tpu.vector_store %arg9[%c0_15, %c0_16], %10 {strides = array<i32>} : memref<256x128xf32, #tpu.memory_space<vmem>>, vector<256x128xf32>,
    %c0_17 = arith.constant 0 : index
    %c0_18 = arith.constant 0 : index
    %c0_19 = arith.constant 0 : index
    %12 = vector.load %arg7[%c0_17, %c0_18, %c0_19] : memref<18x18x128xf32, #tpu.memory_space<vmem>>, vector<16x16x128xf32>
    %13 = vector.shape_cast %12 : vector<16x16x128xf32> to vector<256x128xf32>
    %c0_20 = arith.constant 0 : index
    %c0_21 = arith.constant 0 : index
    %14 = vector.load %arg9[%c0_20, %c0_21] : memref<256x128xf32, #tpu.memory_space<vmem>>, vector<256x128xf32>
    %c0_22 = arith.constant 0 : index
    %c0_23 = arith.constant 0 : index
    %c0_24 = arith.constant 0 : index
    %c0_25 = arith.constant 0 : index
    %15 = vector.load %arg2[%c0_22, %c0_23, %c0_24, %c0_25] : memref<2x9x128x128xf32, #tpu.memory_space<vmem>>, vector<1x1x128x128xf32>
    %16 = vector.shape_cast %15 : vector<1x1x128x128xf32> to vector<128x128xf32>
    %cst_26 = arith.constant dense<0.000000e+00> : vector<256x128xf32>
    %17 = tpu.matmul %13, %16, %cst_26 {dimension_numbers = #tpu.dot_dimension_numbers<[1], [0], [0], [1], [0, 0, 1, 1], [], []>} : vector<256x128xf32>, vector<128x128xf32>, vector<256x128xf32> -> vector<256x128xf32>
    %18 = arith.addf %14, %17 : vector<256x128xf32>
    %c0_27 = arith.constant 0 : index
    %c0_28 = arith.constant 0 : index
    %19 = vector.load %arg9[%c0_27, %c0_28] : memref<256x128xf32, #tpu.memory_space<vmem>>, vector<256x128xf32>
    tpu.vector_store %arg9[%c0_27, %c0_28], %18 {strides = array<i32>} : memref<256x128xf32, #tpu.memory_space<vmem>>, vector<256x128xf32>,
    %c0_29 = arith.constant 0 : index
    %c1_30 = arith.constant 1 : index
    %c0_31 = arith.constant 0 : index
    %20 = vector.load %arg7[%c0_29, %c1_30, %c0_31] : memref<18x18x128xf32, #tpu.memory_space<vmem>>, vector<16x16x128xf32>
    %21 = vector.shape_cast %20 : vector<16x16x128xf32> to vector<256x128xf32>
    %c0_32 = arith.constant 0 : index
    %c0_33 = arith.constant 0 : index
    %22 = vector.load %arg9[%c0_32, %c0_33] : memref<256x128xf32, #tpu.memory_space<vmem>>, vector<256x128xf32>
    %c0_34 = arith.constant 0 : index
    %c1_35 = arith.constant 1 : index
    %c0_36 = arith.constant 0 : index
    %c0_37 = arith.constant 0 : index
    %23 = vector.load %arg2[%c0_34, %c1_35, %c0_36, %c0_37] : memref<2x9x128x128xf32, #tpu.memory_space<vmem>>, vector<1x1x128x128xf32>
    %24 = vector.shape_cast %23 : vector<1x1x128x128xf32> to vector<128x128xf32>
    %cst_38 = arith.constant dense<0.000000e+00> : vector<256x128xf32>
    %25 = tpu.matmul %21, %24, %cst_38 {dimension_numbers = #tpu.dot_dimension_numbers<[1], [0], [0], [1], [0, 0, 1, 1], [], []>} : vector<256x128xf32>, vector<128x128xf32>, vector<256x128xf32> -> vector<256x128xf32>
    %26 = arith.addf %22, %25 : vector<256x128xf32>
    %c0_39 = arith.constant 0 : index
    %c0_40 = arith.constant 0 : index
    %27 = vector.load %arg9[%c0_39, %c0_40] : memref<256x128xf32, #tpu.memory_space<vmem>>, vector<256x128xf32>
    tpu.vector_store %arg9[%c0_39, %c0_40], %26 {strides = array<i32>} : memref<256x128xf32, #tpu.memory_space<vmem>>, vector<256x128xf32>,
    %c0_41 = arith.constant 0 : index
    %c2 = arith.constant 2 : index
    %c0_42 = arith.constant 0 : index
    %28 = vector.load %arg7[%c0_41, %c2, %c0_42] : memref<18x18x128xf32, #tpu.memory_space<vmem>>, vector<16x16x128xf32>
    %29 = vector.shape_cast %28 : vector<16x16x128xf32> to vector<256x128xf32>
    %c0_43 = arith.constant 0 : index
    %c0_44 = arith.constant 0 : index
    %30 = vector.load %arg9[%c0_43, %c0_44] : memref<256x128xf32, #tpu.memory_space<vmem>>, vector<256x128xf32>
    %c0_45 = arith.constant 0 : index
    %c2_46 = arith.constant 2 : index
    %c0_47 = arith.constant 0 : index
    %c0_48 = arith.constant 0 : index
    %31 = vector.load %arg2[%c0_45, %c2_46, %c0_47, %c0_48] : memref<2x9x128x128xf32, #tpu.memory_space<vmem>>, vector<1x1x128x128xf32>
    %32 = vector.shape_cast %31 : vector<1x1x128x128xf32> to vector<128x128xf32>
    %cst_49 = arith.constant dense<0.000000e+00> : vector<256x128xf32>
    %33 = tpu.matmul %29, %32, %cst_49 {dimension_numbers = #tpu.dot_dimension_numbers<[1], [0], [0], [1], [0, 0, 1, 1], [], []>} : vector<256x128xf32>, vector<128x128xf32>, vector<256x128xf32> -> vector<256x128xf32>
    %34 = arith.addf %30, %33 : vector<256x128xf32>
    %c0_50 = arith.constant 0 : index
    %c0_51 = arith.constant 0 : index
    %35 = vector.load %arg9[%c0_50, %c0_51] : memref<256x128xf32, #tpu.memory_space<vmem>>, vector<256x128xf32>
    tpu.vector_store %arg9[%c0_50, %c0_51], %34 {strides = array<i32>} : memref<256x128xf32, #tpu.memory_space<vmem>>, vector<256x128xf32>,
    %c1_52 = arith.constant 1 : index
    %c0_53 = arith.constant 0 : index
    %c0_54 = arith.constant 0 : index
    %36 = vector.load %arg7[%c1_52, %c0_53, %c0_54] : memref<18x18x128xf32, #tpu.memory_space<vmem>>, vector<16x16x128xf32>
    %37 = vector.shape_cast %36 : vector<16x16x128xf32> to vector<256x128xf32>
    %c0_55 = arith.constant 0 : index
    %c0_56 = arith.constant 0 : index
    %38 = vector.load %arg9[%c0_55, %c0_56] : memref<256x128xf32, #tpu.memory_space<vmem>>, vector<256x128xf32>
    %c0_57 = arith.constant 0 : index
    %c3 = arith.constant 3 : index
    %c0_58 = arith.constant 0 : index
    %c0_59 = arith.constant 0 : index
    %39 = vector.load %arg2[%c0_57, %c3, %c0_58, %c0_59] : memref<2x9x128x128xf32, #tpu.memory_space<vmem>>, vector<1x1x128x128xf32>
    %40 = vector.shape_cast %39 : vector<1x1x128x128xf32> to vector<128x128xf32>
    %cst_60 = arith.constant dense<0.000000e+00> : vector<256x128xf32>
    %41 = tpu.matmul %37, %40, %cst_60 {dimension_numbers = #tpu.dot_dimension_numbers<[1], [0], [0], [1], [0, 0, 1, 1], [], []>} : vector<256x128xf32>, vector<128x128xf32>, vector<256x128xf32> -> vector<256x128xf32>
    %42 = arith.addf %38, %41 : vector<256x128xf32>
    %c0_61 = arith.constant 0 : index
    %c0_62 = arith.constant 0 : index
    %43 = vector.load %arg9[%c0_61, %c0_62] : memref<256x128xf32, #tpu.memory_space<vmem>>, vector<256x128xf32>
    tpu.vector_store %arg9[%c0_61, %c0_62], %42 {strides = array<i32>} : memref<256x128xf32, #tpu.memory_space<vmem>>, vector<256x128xf32>,
    %c1_63 = arith.constant 1 : index
    %c1_64 = arith.constant 1 : index
    %c0_65 = arith.constant 0 : index
    %44 = vector.load %arg7[%c1_63, %c1_64, %c0_65] : memref<18x18x128xf32, #tpu.memory_space<vmem>>, vector<16x16x128xf32>
    %45 = vector.shape_cast %44 : vector<16x16x128xf32> to vector<256x128xf32>
    %c0_66 = arith.constant 0 : index
    %c0_67 = arith.constant 0 : index
    %46 = vector.load %arg9[%c0_66, %c0_67] : memref<256x128xf32, #tpu.memory_space<vmem>>, vector<256x128xf32>
    %c0_68 = arith.constant 0 : index
    %c4 = arith.constant 4 : index
    %c0_69 = arith.constant 0 : index
    %c0_70 = arith.constant 0 : index
    %47 = vector.load %arg2[%c0_68, %c4, %c0_69, %c0_70] : memref<2x9x128x128xf32, #tpu.memory_space<vmem>>, vector<1x1x128x128xf32>
    %48 = vector.shape_cast %47 : vector<1x1x128x128xf32> to vector<128x128xf32>
    %cst_71 = arith.constant dense<0.000000e+00> : vector<256x128xf32>
    %49 = tpu.matmul %45, %48, %cst_71 {dimension_numbers = #tpu.dot_dimension_numbers<[1], [0], [0], [1], [0, 0, 1, 1], [], []>} : vector<256x128xf32>, vector<128x128xf32>, vector<256x128xf32> -> vector<256x128xf32>
    %50 = arith.addf %46, %49 : vector<256x128xf32>
    %c0_72 = arith.constant 0 : index
    %c0_73 = arith.constant 0 : index
    %51 = vector.load %arg9[%c0_72, %c0_73] : memref<256x128xf32, #tpu.memory_space<vmem>>, vector<256x128xf32>
    tpu.vector_store %arg9[%c0_72, %c0_73], %50 {strides = array<i32>} : memref<256x128xf32, #tpu.memory_space<vmem>>, vector<256x128xf32>,
    %c1_74 = arith.constant 1 : index
    %c2_75 = arith.constant 2 : index
    %c0_76 = arith.constant 0 : index
    %52 = vector.load %arg7[%c1_74, %c2_75, %c0_76] : memref<18x18x128xf32, #tpu.memory_space<vmem>>, vector<16x16x128xf32>
    %53 = vector.shape_cast %52 : vector<16x16x128xf32> to vector<256x128xf32>
    %c0_77 = arith.constant 0 : index
    %c0_78 = arith.constant 0 : index
    %54 = vector.load %arg9[%c0_77, %c0_78] : memref<256x128xf32, #tpu.memory_space<vmem>>, vector<256x128xf32>
    %c0_79 = arith.constant 0 : index
    %c5 = arith.constant 5 : index
    %c0_80 = arith.constant 0 : index
    %c0_81 = arith.constant 0 : index
    %55 = vector.load %arg2[%c0_79, %c5, %c0_80, %c0_81] : memref<2x9x128x128xf32, #tpu.memory_space<vmem>>, vector<1x1x128x128xf32>
    %56 = vector.shape_cast %55 : vector<1x1x128x128xf32> to vector<128x128xf32>
    %cst_82 = arith.constant dense<0.000000e+00> : vector<256x128xf32>
    %57 = tpu.matmul %53, %56, %cst_82 {dimension_numbers = #tpu.dot_dimension_numbers<[1], [0], [0], [1], [0, 0, 1, 1], [], []>} : vector<256x128xf32>, vector<128x128xf32>, vector<256x128xf32> -> vector<256x128xf32>
    %58 = arith.addf %54, %57 : vector<256x128xf32>
    %c0_83 = arith.constant 0 : index
    %c0_84 = arith.constant 0 : index
    %59 = vector.load %arg9[%c0_83, %c0_84] : memref<256x128xf32, #tpu.memory_space<vmem>>, vector<256x128xf32>
    tpu.vector_store %arg9[%c0_83, %c0_84], %58 {strides = array<i32>} : memref<256x128xf32, #tpu.memory_space<vmem>>, vector<256x128xf32>,
    %c2_85 = arith.constant 2 : index
    %c0_86 = arith.constant 0 : index
    %c0_87 = arith.constant 0 : index
    %60 = vector.load %arg7[%c2_85, %c0_86, %c0_87] : memref<18x18x128xf32, #tpu.memory_space<vmem>>, vector<16x16x128xf32>
    %61 = vector.shape_cast %60 : vector<16x16x128xf32> to vector<256x128xf32>
    %c0_88 = arith.constant 0 : index
    %c0_89 = arith.constant 0 : index
    %62 = vector.load %arg9[%c0_88, %c0_89] : memref<256x128xf32, #tpu.memory_space<vmem>>, vector<256x128xf32>
    %c0_90 = arith.constant 0 : index
    %c6 = arith.constant 6 : index
    %c0_91 = arith.constant 0 : index
    %c0_92 = arith.constant 0 : index
    %63 = vector.load %arg2[%c0_90, %c6, %c0_91, %c0_92] : memref<2x9x128x128xf32, #tpu.memory_space<vmem>>, vector<1x1x128x128xf32>
    %64 = vector.shape_cast %63 : vector<1x1x128x128xf32> to vector<128x128xf32>
    %cst_93 = arith.constant dense<0.000000e+00> : vector<256x128xf32>
    %65 = tpu.matmul %61, %64, %cst_93 {dimension_numbers = #tpu.dot_dimension_numbers<[1], [0], [0], [1], [0, 0, 1, 1], [], []>} : vector<256x128xf32>, vector<128x128xf32>, vector<256x128xf32> -> vector<256x128xf32>
    %66 = arith.addf %62, %65 : vector<256x128xf32>
    %c0_94 = arith.constant 0 : index
    %c0_95 = arith.constant 0 : index
    %67 = vector.load %arg9[%c0_94, %c0_95] : memref<256x128xf32, #tpu.memory_space<vmem>>, vector<256x128xf32>
    tpu.vector_store %arg9[%c0_94, %c0_95], %66 {strides = array<i32>} : memref<256x128xf32, #tpu.memory_space<vmem>>, vector<256x128xf32>,
    %c2_96 = arith.constant 2 : index
    %c1_97 = arith.constant 1 : index
    %c0_98 = arith.constant 0 : index
    %68 = vector.load %arg7[%c2_96, %c1_97, %c0_98] : memref<18x18x128xf32, #tpu.memory_space<vmem>>, vector<16x16x128xf32>
    %69 = vector.shape_cast %68 : vector<16x16x128xf32> to vector<256x128xf32>
    %c0_99 = arith.constant 0 : index
    %c0_100 = arith.constant 0 : index
    %70 = vector.load %arg9[%c0_99, %c0_100] : memref<256x128xf32, #tpu.memory_space<vmem>>, vector<256x128xf32>
    %c0_101 = arith.constant 0 : index
    %c7 = arith.constant 7 : index
    %c0_102 = arith.constant 0 : index
    %c0_103 = arith.constant 0 : index
    %71 = vector.load %arg2[%c0_101, %c7, %c0_102, %c0_103] : memref<2x9x128x128xf32, #tpu.memory_space<vmem>>, vector<1x1x128x128xf32>
    %72 = vector.shape_cast %71 : vector<1x1x128x128xf32> to vector<128x128xf32>
    %cst_104 = arith.constant dense<0.000000e+00> : vector<256x128xf32>
    %73 = tpu.matmul %69, %72, %cst_104 {dimension_numbers = #tpu.dot_dimension_numbers<[1], [0], [0], [1], [0, 0, 1, 1], [], []>} : vector<256x128xf32>, vector<128x128xf32>, vector<256x128xf32> -> vector<256x128xf32>
    %74 = arith.addf %70, %73 : vector<256x128xf32>
    %c0_105 = arith.constant 0 : index
    %c0_106 = arith.constant 0 : index
    %75 = vector.load %arg9[%c0_105, %c0_106] : memref<256x128xf32, #tpu.memory_space<vmem>>, vector<256x128xf32>
    tpu.vector_store %arg9[%c0_105, %c0_106], %74 {strides = array<i32>} : memref<256x128xf32, #tpu.memory_space<vmem>>, vector<256x128xf32>,
    %c2_107 = arith.constant 2 : index
    %c2_108 = arith.constant 2 : index
    %c0_109 = arith.constant 0 : index
    %76 = vector.load %arg7[%c2_107, %c2_108, %c0_109] : memref<18x18x128xf32, #tpu.memory_space<vmem>>, vector<16x16x128xf32>
    %77 = vector.shape_cast %76 : vector<16x16x128xf32> to vector<256x128xf32>
    %c0_110 = arith.constant 0 : index
    %c0_111 = arith.constant 0 : index
    %78 = vector.load %arg9[%c0_110, %c0_111] : memref<256x128xf32, #tpu.memory_space<vmem>>, vector<256x128xf32>
    %c0_112 = arith.constant 0 : index
    %c8 = arith.constant 8 : index
    %c0_113 = arith.constant 0 : index
    %c0_114 = arith.constant 0 : index
    %79 = vector.load %arg2[%c0_112, %c8, %c0_113, %c0_114] : memref<2x9x128x128xf32, #tpu.memory_space<vmem>>, vector<1x1x128x128xf32>
    %80 = vector.shape_cast %79 : vector<1x1x128x128xf32> to vector<128x128xf32>
    %cst_115 = arith.constant dense<0.000000e+00> : vector<256x128xf32>
    %81 = tpu.matmul %77, %80, %cst_115 {dimension_numbers = #tpu.dot_dimension_numbers<[1], [0], [0], [1], [0, 0, 1, 1], [], []>} : vector<256x128xf32>, vector<128x128xf32>, vector<256x128xf32> -> vector<256x128xf32>
    %82 = arith.addf %78, %81 : vector<256x128xf32>
    %c0_116 = arith.constant 0 : index
    %c0_117 = arith.constant 0 : index
    %83 = vector.load %arg9[%c0_116, %c0_117] : memref<256x128xf32, #tpu.memory_space<vmem>>, vector<256x128xf32>
    tpu.vector_store %arg9[%c0_116, %c0_117], %82 {strides = array<i32>} : memref<256x128xf32, #tpu.memory_space<vmem>>, vector<256x128xf32>,
    %c0_118 = arith.constant 0 : index
    %c0_119 = arith.constant 0 : index
    %84 = vector.load %arg9[%c0_118, %c0_119] : memref<256x128xf32, #tpu.memory_space<vmem>>, vector<256x128xf32>
    %cst_120 = arith.constant 0.000000e+00 : f32
    %85 = vector.broadcast %cst_120 : f32 to vector<256x128xf32>
    %86 = arith.maximumf %84, %85 : vector<256x128xf32>
    %87 = vector.shape_cast %86 : vector<256x128xf32> to vector<16x16x128xf32>
    %c1_121 = arith.constant 1 : index
    %c1_122 = arith.constant 1 : index
    %c0_123 = arith.constant 0 : index
    %88 = vector.load %arg8[%c1_121, %c1_122, %c0_123] : memref<18x18x128xf32, #tpu.memory_space<vmem>>, vector<16x16x128xf32>
    tpu.vector_store %arg8[%c1_121, %c1_122, %c0_123], %87 {strides = array<i32>} : memref<18x18x128xf32, #tpu.memory_space<vmem>>, vector<16x16x128xf32>,
    %c1_124 = arith.constant 1 : index
    %c0_125 = arith.constant 0 : index
    %c0_126 = arith.constant 0 : index
    %89 = vector.load %arg3[%c1_124, %c0_125, %c0_126] : memref<2x1x128xf32, #tpu.memory_space<vmem>>, vector<1x1x128xf32>
    %90 = vector.shape_cast %89 : vector<1x1x128xf32> to vector<1x128xf32>
    %91 = vector.shape_cast %90 : vector<1x128xf32> to vector<1x128xf32>
    %92 = vector.broadcast %91 : vector<1x128xf32> to vector<256x128xf32>
    %c0_127 = arith.constant 0 : index
    %c0_128 = arith.constant 0 : index
    %93 = vector.load %arg9[%c0_127, %c0_128] : memref<256x128xf32, #tpu.memory_space<vmem>>, vector<256x128xf32>
    tpu.vector_store %arg9[%c0_127, %c0_128], %92 {strides = array<i32>} : memref<256x128xf32, #tpu.memory_space<vmem>>, vector<256x128xf32>,
    %c0_129 = arith.constant 0 : index
    %c0_130 = arith.constant 0 : index
    %c0_131 = arith.constant 0 : index
    %94 = vector.load %arg8[%c0_129, %c0_130, %c0_131] : memref<18x18x128xf32, #tpu.memory_space<vmem>>, vector<16x16x128xf32>
    %95 = vector.shape_cast %94 : vector<16x16x128xf32> to vector<256x128xf32>
    %c0_132 = arith.constant 0 : index
    %c0_133 = arith.constant 0 : index
    %96 = vector.load %arg9[%c0_132, %c0_133] : memref<256x128xf32, #tpu.memory_space<vmem>>, vector<256x128xf32>
    %c1_134 = arith.constant 1 : index
    %c0_135 = arith.constant 0 : index
    %c0_136 = arith.constant 0 : index
    %c0_137 = arith.constant 0 : index
    %97 = vector.load %arg2[%c1_134, %c0_135, %c0_136, %c0_137] : memref<2x9x128x128xf32, #tpu.memory_space<vmem>>, vector<1x1x128x128xf32>
    %98 = vector.shape_cast %97 : vector<1x1x128x128xf32> to vector<128x128xf32>
    %cst_138 = arith.constant dense<0.000000e+00> : vector<256x128xf32>
    %99 = tpu.matmul %95, %98, %cst_138 {dimension_numbers = #tpu.dot_dimension_numbers<[1], [0], [0], [1], [0, 0, 1, 1], [], []>} : vector<256x128xf32>, vector<128x128xf32>, vector<256x128xf32> -> vector<256x128xf32>
    %100 = arith.addf %96, %99 : vector<256x128xf32>
    %c0_139 = arith.constant 0 : index
    %c0_140 = arith.constant 0 : index
    %101 = vector.load %arg9[%c0_139, %c0_140] : memref<256x128xf32, #tpu.memory_space<vmem>>, vector<256x128xf32>
    tpu.vector_store %arg9[%c0_139, %c0_140], %100 {strides = array<i32>} : memref<256x128xf32, #tpu.memory_space<vmem>>, vector<256x128xf32>,
    %c0_141 = arith.constant 0 : index
    %c1_142 = arith.constant 1 : index
    %c0_143 = arith.constant 0 : index
    %102 = vector.load %arg8[%c0_141, %c1_142, %c0_143] : memref<18x18x128xf32, #tpu.memory_space<vmem>>, vector<16x16x128xf32>
    %103 = vector.shape_cast %102 : vector<16x16x128xf32> to vector<256x128xf32>
    %c0_144 = arith.constant 0 : index
    %c0_145 = arith.constant 0 : index
    %104 = vector.load %arg9[%c0_144, %c0_145] : memref<256x128xf32, #tpu.memory_space<vmem>>, vector<256x128xf32>
    %c1_146 = arith.constant 1 : index
    %c1_147 = arith.constant 1 : index
    %c0_148 = arith.constant 0 : index
    %c0_149 = arith.constant 0 : index
    %105 = vector.load %arg2[%c1_146, %c1_147, %c0_148, %c0_149] : memref<2x9x128x128xf32, #tpu.memory_space<vmem>>, vector<1x1x128x128xf32>
    %106 = vector.shape_cast %105 : vector<1x1x128x128xf32> to vector<128x128xf32>
    %cst_150 = arith.constant dense<0.000000e+00> : vector<256x128xf32>
    %107 = tpu.matmul %103, %106, %cst_150 {dimension_numbers = #tpu.dot_dimension_numbers<[1], [0], [0], [1], [0, 0, 1, 1], [], []>} : vector<256x128xf32>, vector<128x128xf32>, vector<256x128xf32> -> vector<256x128xf32>
    %108 = arith.addf %104, %107 : vector<256x128xf32>
    %c0_151 = arith.constant 0 : index
    %c0_152 = arith.constant 0 : index
    %109 = vector.load %arg9[%c0_151, %c0_152] : memref<256x128xf32, #tpu.memory_space<vmem>>, vector<256x128xf32>
    tpu.vector_store %arg9[%c0_151, %c0_152], %108 {strides = array<i32>} : memref<256x128xf32, #tpu.memory_space<vmem>>, vector<256x128xf32>,
    %c0_153 = arith.constant 0 : index
    %c2_154 = arith.constant 2 : index
    %c0_155 = arith.constant 0 : index
    %110 = vector.load %arg8[%c0_153, %c2_154, %c0_155] : memref<18x18x128xf32, #tpu.memory_space<vmem>>, vector<16x16x128xf32>
    %111 = vector.shape_cast %110 : vector<16x16x128xf32> to vector<256x128xf32>
    %c0_156 = arith.constant 0 : index
    %c0_157 = arith.constant 0 : index
    %112 = vector.load %arg9[%c0_156, %c0_157] : memref<256x128xf32, #tpu.memory_space<vmem>>, vector<256x128xf32>
    %c1_158 = arith.constant 1 : index
    %c2_159 = arith.constant 2 : index
    %c0_160 = arith.constant 0 : index
    %c0_161 = arith.constant 0 : index
    %113 = vector.load %arg2[%c1_158, %c2_159, %c0_160, %c0_161] : memref<2x9x128x128xf32, #tpu.memory_space<vmem>>, vector<1x1x128x128xf32>
    %114 = vector.shape_cast %113 : vector<1x1x128x128xf32> to vector<128x128xf32>
    %cst_162 = arith.constant dense<0.000000e+00> : vector<256x128xf32>
    %115 = tpu.matmul %111, %114, %cst_162 {dimension_numbers = #tpu.dot_dimension_numbers<[1], [0], [0], [1], [0, 0, 1, 1], [], []>} : vector<256x128xf32>, vector<128x128xf32>, vector<256x128xf32> -> vector<256x128xf32>
    %116 = arith.addf %112, %115 : vector<256x128xf32>
    %c0_163 = arith.constant 0 : index
    %c0_164 = arith.constant 0 : index
    %117 = vector.load %arg9[%c0_163, %c0_164] : memref<256x128xf32, #tpu.memory_space<vmem>>, vector<256x128xf32>
    tpu.vector_store %arg9[%c0_163, %c0_164], %116 {strides = array<i32>} : memref<256x128xf32, #tpu.memory_space<vmem>>, vector<256x128xf32>,
    %c1_165 = arith.constant 1 : index
    %c0_166 = arith.constant 0 : index
    %c0_167 = arith.constant 0 : index
    %118 = vector.load %arg8[%c1_165, %c0_166, %c0_167] : memref<18x18x128xf32, #tpu.memory_space<vmem>>, vector<16x16x128xf32>
    %119 = vector.shape_cast %118 : vector<16x16x128xf32> to vector<256x128xf32>
    %c0_168 = arith.constant 0 : index
    %c0_169 = arith.constant 0 : index
    %120 = vector.load %arg9[%c0_168, %c0_169] : memref<256x128xf32, #tpu.memory_space<vmem>>, vector<256x128xf32>
    %c1_170 = arith.constant 1 : index
    %c3_171 = arith.constant 3 : index
    %c0_172 = arith.constant 0 : index
    %c0_173 = arith.constant 0 : index
    %121 = vector.load %arg2[%c1_170, %c3_171, %c0_172, %c0_173] : memref<2x9x128x128xf32, #tpu.memory_space<vmem>>, vector<1x1x128x128xf32>
    %122 = vector.shape_cast %121 : vector<1x1x128x128xf32> to vector<128x128xf32>
    %cst_174 = arith.constant dense<0.000000e+00> : vector<256x128xf32>
    %123 = tpu.matmul %119, %122, %cst_174 {dimension_numbers = #tpu.dot_dimension_numbers<[1], [0], [0], [1], [0, 0, 1, 1], [], []>} : vector<256x128xf32>, vector<128x128xf32>, vector<256x128xf32> -> vector<256x128xf32>
    %124 = arith.addf %120, %123 : vector<256x128xf32>
    %c0_175 = arith.constant 0 : index
    %c0_176 = arith.constant 0 : index
    %125 = vector.load %arg9[%c0_175, %c0_176] : memref<256x128xf32, #tpu.memory_space<vmem>>, vector<256x128xf32>
    tpu.vector_store %arg9[%c0_175, %c0_176], %124 {strides = array<i32>} : memref<256x128xf32, #tpu.memory_space<vmem>>, vector<256x128xf32>,
    %c1_177 = arith.constant 1 : index
    %c1_178 = arith.constant 1 : index
    %c0_179 = arith.constant 0 : index
    %126 = vector.load %arg8[%c1_177, %c1_178, %c0_179] : memref<18x18x128xf32, #tpu.memory_space<vmem>>, vector<16x16x128xf32>
    %127 = vector.shape_cast %126 : vector<16x16x128xf32> to vector<256x128xf32>
    %c0_180 = arith.constant 0 : index
    %c0_181 = arith.constant 0 : index
    %128 = vector.load %arg9[%c0_180, %c0_181] : memref<256x128xf32, #tpu.memory_space<vmem>>, vector<256x128xf32>
    %c1_182 = arith.constant 1 : index
    %c4_183 = arith.constant 4 : index
    %c0_184 = arith.constant 0 : index
    %c0_185 = arith.constant 0 : index
    %129 = vector.load %arg2[%c1_182, %c4_183, %c0_184, %c0_185] : memref<2x9x128x128xf32, #tpu.memory_space<vmem>>, vector<1x1x128x128xf32>
    %130 = vector.shape_cast %129 : vector<1x1x128x128xf32> to vector<128x128xf32>
    %cst_186 = arith.constant dense<0.000000e+00> : vector<256x128xf32>
    %131 = tpu.matmul %127, %130, %cst_186 {dimension_numbers = #tpu.dot_dimension_numbers<[1], [0], [0], [1], [0, 0, 1, 1], [], []>} : vector<256x128xf32>, vector<128x128xf32>, vector<256x128xf32> -> vector<256x128xf32>
    %132 = arith.addf %128, %131 : vector<256x128xf32>
    %c0_187 = arith.constant 0 : index
    %c0_188 = arith.constant 0 : index
    %133 = vector.load %arg9[%c0_187, %c0_188] : memref<256x128xf32, #tpu.memory_space<vmem>>, vector<256x128xf32>
    tpu.vector_store %arg9[%c0_187, %c0_188], %132 {strides = array<i32>} : memref<256x128xf32, #tpu.memory_space<vmem>>, vector<256x128xf32>,
    %c1_189 = arith.constant 1 : index
    %c2_190 = arith.constant 2 : index
    %c0_191 = arith.constant 0 : index
    %134 = vector.load %arg8[%c1_189, %c2_190, %c0_191] : memref<18x18x128xf32, #tpu.memory_space<vmem>>, vector<16x16x128xf32>
    %135 = vector.shape_cast %134 : vector<16x16x128xf32> to vector<256x128xf32>
    %c0_192 = arith.constant 0 : index
    %c0_193 = arith.constant 0 : index
    %136 = vector.load %arg9[%c0_192, %c0_193] : memref<256x128xf32, #tpu.memory_space<vmem>>, vector<256x128xf32>
    %c1_194 = arith.constant 1 : index
    %c5_195 = arith.constant 5 : index
    %c0_196 = arith.constant 0 : index
    %c0_197 = arith.constant 0 : index
    %137 = vector.load %arg2[%c1_194, %c5_195, %c0_196, %c0_197] : memref<2x9x128x128xf32, #tpu.memory_space<vmem>>, vector<1x1x128x128xf32>
    %138 = vector.shape_cast %137 : vector<1x1x128x128xf32> to vector<128x128xf32>
    %cst_198 = arith.constant dense<0.000000e+00> : vector<256x128xf32>
    %139 = tpu.matmul %135, %138, %cst_198 {dimension_numbers = #tpu.dot_dimension_numbers<[1], [0], [0], [1], [0, 0, 1, 1], [], []>} : vector<256x128xf32>, vector<128x128xf32>, vector<256x128xf32> -> vector<256x128xf32>
    %140 = arith.addf %136, %139 : vector<256x128xf32>
    %c0_199 = arith.constant 0 : index
    %c0_200 = arith.constant 0 : index
    %141 = vector.load %arg9[%c0_199, %c0_200] : memref<256x128xf32, #tpu.memory_space<vmem>>, vector<256x128xf32>
    tpu.vector_store %arg9[%c0_199, %c0_200], %140 {strides = array<i32>} : memref<256x128xf32, #tpu.memory_space<vmem>>, vector<256x128xf32>,
    %c2_201 = arith.constant 2 : index
    %c0_202 = arith.constant 0 : index
    %c0_203 = arith.constant 0 : index
    %142 = vector.load %arg8[%c2_201, %c0_202, %c0_203] : memref<18x18x128xf32, #tpu.memory_space<vmem>>, vector<16x16x128xf32>
    %143 = vector.shape_cast %142 : vector<16x16x128xf32> to vector<256x128xf32>
    %c0_204 = arith.constant 0 : index
    %c0_205 = arith.constant 0 : index
    %144 = vector.load %arg9[%c0_204, %c0_205] : memref<256x128xf32, #tpu.memory_space<vmem>>, vector<256x128xf32>
    %c1_206 = arith.constant 1 : index
    %c6_207 = arith.constant 6 : index
    %c0_208 = arith.constant 0 : index
    %c0_209 = arith.constant 0 : index
    %145 = vector.load %arg2[%c1_206, %c6_207, %c0_208, %c0_209] : memref<2x9x128x128xf32, #tpu.memory_space<vmem>>, vector<1x1x128x128xf32>
    %146 = vector.shape_cast %145 : vector<1x1x128x128xf32> to vector<128x128xf32>
    %cst_210 = arith.constant dense<0.000000e+00> : vector<256x128xf32>
    %147 = tpu.matmul %143, %146, %cst_210 {dimension_numbers = #tpu.dot_dimension_numbers<[1], [0], [0], [1], [0, 0, 1, 1], [], []>} : vector<256x128xf32>, vector<128x128xf32>, vector<256x128xf32> -> vector<256x128xf32>
    %148 = arith.addf %144, %147 : vector<256x128xf32>
    %c0_211 = arith.constant 0 : index
    %c0_212 = arith.constant 0 : index
    %149 = vector.load %arg9[%c0_211, %c0_212] : memref<256x128xf32, #tpu.memory_space<vmem>>, vector<256x128xf32>
    tpu.vector_store %arg9[%c0_211, %c0_212], %148 {strides = array<i32>} : memref<256x128xf32, #tpu.memory_space<vmem>>, vector<256x128xf32>,
    %c2_213 = arith.constant 2 : index
    %c1_214 = arith.constant 1 : index
    %c0_215 = arith.constant 0 : index
    %150 = vector.load %arg8[%c2_213, %c1_214, %c0_215] : memref<18x18x128xf32, #tpu.memory_space<vmem>>, vector<16x16x128xf32>
    %151 = vector.shape_cast %150 : vector<16x16x128xf32> to vector<256x128xf32>
    %c0_216 = arith.constant 0 : index
    %c0_217 = arith.constant 0 : index
    %152 = vector.load %arg9[%c0_216, %c0_217] : memref<256x128xf32, #tpu.memory_space<vmem>>, vector<256x128xf32>
    %c1_218 = arith.constant 1 : index
    %c7_219 = arith.constant 7 : index
    %c0_220 = arith.constant 0 : index
    %c0_221 = arith.constant 0 : index
    %153 = vector.load %arg2[%c1_218, %c7_219, %c0_220, %c0_221] : memref<2x9x128x128xf32, #tpu.memory_space<vmem>>, vector<1x1x128x128xf32>
    %154 = vector.shape_cast %153 : vector<1x1x128x128xf32> to vector<128x128xf32>
    %cst_222 = arith.constant dense<0.000000e+00> : vector<256x128xf32>
    %155 = tpu.matmul %151, %154, %cst_222 {dimension_numbers = #tpu.dot_dimension_numbers<[1], [0], [0], [1], [0, 0, 1, 1], [], []>} : vector<256x128xf32>, vector<128x128xf32>, vector<256x128xf32> -> vector<256x128xf32>
    %156 = arith.addf %152, %155 : vector<256x128xf32>
    %c0_223 = arith.constant 0 : index
    %c0_224 = arith.constant 0 : index
    %157 = vector.load %arg9[%c0_223, %c0_224] : memref<256x128xf32, #tpu.memory_space<vmem>>, vector<256x128xf32>
    tpu.vector_store %arg9[%c0_223, %c0_224], %156 {strides = array<i32>} : memref<256x128xf32, #tpu.memory_space<vmem>>, vector<256x128xf32>,
    %c2_225 = arith.constant 2 : index
    %c2_226 = arith.constant 2 : index
    %c0_227 = arith.constant 0 : index
    %158 = vector.load %arg8[%c2_225, %c2_226, %c0_227] : memref<18x18x128xf32, #tpu.memory_space<vmem>>, vector<16x16x128xf32>
    %159 = vector.shape_cast %158 : vector<16x16x128xf32> to vector<256x128xf32>
    %c0_228 = arith.constant 0 : index
    %c0_229 = arith.constant 0 : index
    %160 = vector.load %arg9[%c0_228, %c0_229] : memref<256x128xf32, #tpu.memory_space<vmem>>, vector<256x128xf32>
    %c1_230 = arith.constant 1 : index
    %c8_231 = arith.constant 8 : index
    %c0_232 = arith.constant 0 : index
    %c0_233 = arith.constant 0 : index
    %161 = vector.load %arg2[%c1_230, %c8_231, %c0_232, %c0_233] : memref<2x9x128x128xf32, #tpu.memory_space<vmem>>, vector<1x1x128x128xf32>
    %162 = vector.shape_cast %161 : vector<1x1x128x128xf32> to vector<128x128xf32>
    %cst_234 = arith.constant dense<0.000000e+00> : vector<256x128xf32>
    %163 = tpu.matmul %159, %162, %cst_234 {dimension_numbers = #tpu.dot_dimension_numbers<[1], [0], [0], [1], [0, 0, 1, 1], [], []>} : vector<256x128xf32>, vector<128x128xf32>, vector<256x128xf32> -> vector<256x128xf32>
    %164 = arith.addf %160, %163 : vector<256x128xf32>
    %c0_235 = arith.constant 0 : index
    %c0_236 = arith.constant 0 : index
    %165 = vector.load %arg9[%c0_235, %c0_236] : memref<256x128xf32, #tpu.memory_space<vmem>>, vector<256x128xf32>
    tpu.vector_store %arg9[%c0_235, %c0_236], %164 {strides = array<i32>} : memref<256x128xf32, #tpu.memory_space<vmem>>, vector<256x128xf32>,
    %c0_237 = arith.constant 0 : index
    %c0_238 = arith.constant 0 : index
    %166 = vector.load %arg9[%c0_237, %c0_238] : memref<256x128xf32, #tpu.memory_space<vmem>>, vector<256x128xf32>
    %167 = vector.shape_cast %5 : vector<16x16x128xf32> to vector<256x128xf32>
    %c0_239 = arith.constant 0 : index
    %c0_240 = arith.constant 0 : index
    %168 = vector.load %arg4[%c0_239, %c0_240] : memref<128x128xf32, #tpu.memory_space<vmem>>, vector<128x128xf32>
    %cst_241 = arith.constant dense<0.000000e+00> : vector<256x128xf32>
    %169 = tpu.matmul %167, %168, %cst_241 {dimension_numbers = #tpu.dot_dimension_numbers<[1], [0], [0], [1], [0, 0, 1, 1], [], []>} : vector<256x128xf32>, vector<128x128xf32>, vector<256x128xf32> -> vector<256x128xf32>
    %c0_242 = arith.constant 0 : index
    %c0_243 = arith.constant 0 : index
    %170 = vector.load %arg5[%c0_242, %c0_243] : memref<1x128xf32, #tpu.memory_space<vmem>>, vector<1x128xf32>
    %171 = vector.broadcast %170 : vector<1x128xf32> to vector<256x128xf32>
    %172 = arith.addf %169, %171 : vector<256x128xf32>
    %173 = arith.addf %166, %172 : vector<256x128xf32>
    %cst_244 = arith.constant 0.000000e+00 : f32
    %174 = vector.broadcast %cst_244 : f32 to vector<256x128xf32>
    %175 = arith.maximumf %173, %174 : vector<256x128xf32>
    %176 = vector.shape_cast %175 : vector<256x128xf32> to vector<16x16x128xf32>
    %c0_245 = arith.constant 0 : index
    %c0_246 = arith.constant 0 : index
    %c0_247 = arith.constant 0 : index
    %c0_248 = arith.constant 0 : index
    %177 = vector.load %arg6[%c0_245, %c0_246, %c0_247, %c0_248] : memref<1x16x16x128xf32, #tpu.memory_space<vmem>>, vector<1x16x16x128xf32>
    %178 = vector.shape_cast %177 : vector<1x16x16x128xf32> to vector<16x16x128xf32>
    %179 = vector.shape_cast %176 : vector<16x16x128xf32> to vector<1x16x16x128xf32>
    tpu.vector_store %arg6[%c0_245, %c0_246, %c0_247, %c0_248], %179 {strides = array<i32>} : memref<1x16x16x128xf32, #tpu.memory_space<vmem>>, vector<1x16x16x128xf32>,
    return
  }
  func.func @transform_0(%arg0: i32) -> (i32, i32, i32, i32) {
    %c0_i32 = arith.constant 0 : i32
    %c0_i32_0 = arith.constant 0 : i32
    %c0_i32_1 = arith.constant 0 : i32
    %c0_i32_2 = arith.constant 0 : i32
    return %arg0, %c0_i32, %c0_i32_0, %c0_i32_1 : i32, i32, i32, i32
  }
  func.func @transform_1(%arg0: i32) -> (i32, i32, i32, i32) {
    %c0_i32 = arith.constant 0 : i32
    %c0_i32_0 = arith.constant 0 : i32
    %c0_i32_1 = arith.constant 0 : i32
    %c0_i32_2 = arith.constant 0 : i32
    %c0_i32_3 = arith.constant 0 : i32
    return %c0_i32, %c0_i32_0, %c0_i32_1, %c0_i32_2 : i32, i32, i32, i32
  }
  func.func @transform_2(%arg0: i32) -> (i32, i32, i32) {
    %c0_i32 = arith.constant 0 : i32
    %c0_i32_0 = arith.constant 0 : i32
    %c0_i32_1 = arith.constant 0 : i32
    %c0_i32_2 = arith.constant 0 : i32
    return %c0_i32, %c0_i32_0, %c0_i32_1 : i32, i32, i32
  }
  func.func @transform_3(%arg0: i32) -> (i32, i32) {
    %c0_i32 = arith.constant 0 : i32
    %c0_i32_0 = arith.constant 0 : i32
    %c0_i32_1 = arith.constant 0 : i32
    return %c0_i32, %c0_i32_0 : i32, i32
  }
  func.func @transform_4(%arg0: i32) -> (i32, i32) {
    %c0_i32 = arith.constant 0 : i32
    %c0_i32_0 = arith.constant 0 : i32
    %c0_i32_1 = arith.constant 0 : i32
    return %c0_i32, %c0_i32_0 : i32, i32
  }
  func.func @transform_5(%arg0: i32) -> (i32, i32, i32, i32) {
    %c0_i32 = arith.constant 0 : i32
    %c0_i32_0 = arith.constant 0 : i32
    %c0_i32_1 = arith.constant 0 : i32
    %c0_i32_2 = arith.constant 0 : i32
    return %arg0, %c0_i32, %c0_i32_0, %c0_i32_1 : i32, i32, i32, i32
  }
}

</mosaic_0001>

<bundles_post_ra>
// kernel: tpu_custom_call.1
= control target key start
LH: loop header
LB: loop body
LE: loop exit
PB: predicated region body
PF: predicated region fallthrough
CT: control target
= control target key end

     0   :  { %10 = vsyncpa [#allocation6], 0  ;;  %s13547_s0 = inlined_call_operand.hbm [shape: f32[2,16,16,128], index: 0, kind: input, shape index: {}]   ;;  %s13548_s1 = inlined_call_operand.hbm [shape: f32[2,9,128,128], index: 1, kind: input, shape index: {}]   ;;  %s13549_s2 = inlined_call_operand.hbm [shape: f32[2,1,128], index: 2, kind: input, shape index: {}]   ;;  %s13550_s3 = inlined_call_operand.hbm [shape: f32[128,128], index: 3, kind: input, shape index: {}]   ;;  %s13551_s4 = inlined_call_operand.hbm [shape: f32[1,128], index: 4, kind: input, shape index: {}]   ;;  %s13552_s5 = inlined_call_operand.hbm [shape: f32[2,16,16,128], index: 5, kind: output, shape index: {}]  }
   0x1   :  { %12 = vsyncpa [#allocation6 + $0x1], 0 }
   0x2   :  { %13 = vsyncpa [#allocation9], 0 }
   0x3   :  { %14 = vsyncpa [#allocation12], 0 }
   0x4   :  { %15 = vsyncpa [#allocation7], 0 }
   0x5   :  { %17 = vsyncpa [#allocation7 + $0x1], 0  ;;  %s11924_s18 = smov 0   ;;  %s11926_s19 = smov 0  }
   0x6   :  { %s11928_s20 = smov 0   ;;  %s11930_s21 = smov 0  }
   0x7 LB: > { %s11945_s22 = sadd.s32 4294967295, %s11879_s21   ;;  %s7810_s23 = sadd.s32 4294967294, %s11879_s21   ;;  %s11879_s21 = sphi %s11930_s21, %s13823_s21   ;;  %s11875_s20 = sphi %s11928_s20, %s13822_s20   ;;  %s11871_s19 = sphi %s11926_s19, %s13821_s19   ;;  %s11867_s18 = sphi %s11924_s18, %s13820_s18  }
   0x8   : > { %p43_p0 = scmp.ne.s32.totalorder %s11871_s19, %s11867_s18  ;;  %p13553_p1 = scmp.eq.s32.totalorder %s11945_s22, 0 }
   0x9   : > { %p157_p3 = scmp.eq.s32.totalorder %s7810_s23, 1  ;;  %p7811_p5 = scmp.ge.s32.totalorder %s11879_s21, 1 }
   0xa   : > { %p11954_p4 = por %p13553_p1, %p43_p0  ;;  %p164_p7 = scmp.lt.s32.totalorder %s11879_s21, 3 }
   0xb   : > { %p11959_p6 = por %p157_p3, %p43_p0  ;;  %s11881_s27 = smov [#allocation8]  }
   0xc   : > { %s13637_s24 = scalar_select %p11954_p4, 1, 0 }
   0xd   : > { %s13638_s25 = scalar_select %p11959_p6, 1, 0 }
   0xe   : > { %p11964_p8 = pnand %p7811_p5, %p164_p7  ;;  %s176_s28 = sshll.u32 %s11881_s27, 4  ;;  %s11968_s28 = int_to_ptr.vmem [resolvable:$true] %s176_s28 }
   0xf   : > { %s11882_s30 = smov [#allocation11]   ;;  %s11883_s7 = smov [#allocation10]  }
  0x10   : > { %s13639_s26 = scalar_select %p11964_p8, 1, 0 }
  0x11   : > { %p11553_p9 = pneg %p11964_p8  ;;  %s202_s6 = sshll.u32 %s11882_s30, 4  ;;  %s11979_s6 = int_to_ptr.vmem [resolvable:$true] %s202_s6 }
  0x12   : > { %s11981_s8 = sshll.u32 %s11883_s7, 4  ;;  %s11663_s11 = scalar_lea.hbm %s13548_s1, 36864  ;;  %s190_s8 = int_to_ptr.vmem [resolvable:$true] %s11981_s8 }
  0x13   : > { %p11975_p11 = pnand %p11553_p9, %p13553_p1  ;;  %p11664_p12 = scmp.ne.s32.totalorder %s13548_s1, %s11663_s11 }
  0x14   : > { %p11670_p5 = scmp.lt.u32.totalorder %s11663_s11, %s13548_s1 }
  0x15   : > { %p11991_p13 = pneg %p11975_p11 }
  0x17   : > { %p11666_p0 = pnand %p11991_p13, %p11664_p12 }
  0x19   : > { %p11667_p3 = pneg %p11666_p0 }
  0x1b   : > { %p11672_p7 = pnand %p11670_p5, %p11667_p3 }
  0x1d   : > { %11675 = shalt.err (!%p11672_p7)
}
  0x1e   : > { %s11676_s17 = scalar_lea.vmem %s11968_s28, 36864  ;;  %p11684_p2 = scmp.lt.s32.totalorder %s11968_s28, %s11968_s28 }
  0x1f   : > { %p11677_p9 = scmp.ne.s32.totalorder %s11968_s28, %s11676_s17  ;;  %p11685_p6 = scmp.lt.s32.totalorder %s11676_s17, %s11676_s17 }
  0x21   : > { %p11679_p10 = pnand %p11677_p9, %p11991_p13  ;;  %p11686_p12 = por %p11685_p6, %p11684_p2 }
  0x23   : > { %p11680_p1 = pneg %p11679_p10 }
  0x25   : > { %p11687_p0 = pnand %p11686_p12, %p11680_p1 }
  0x27   : > { %11690 = shalt.err (!%p11687_p0)
}
  0x28   : > { %s13556_s23 = smov 128   ;;  %s11885_s27 = smov 8  }
  0x29   : > { %11556 = dma.hbm_to_vmem [thread:$0]  (!%p11975_p11), %s13548_s1, 36864, %s11968_s28, [#allocation9], %s13556_s23, %s13556_s23, %s11885_s27  }
  0x2a   : > { %s11691_s11 = scalar_lea.hbm %s13550_s3, 2048 }
  0x2b   : > { %p11692_p1 = scmp.ne.s32.totalorder %s13550_s3, %s11691_s11  ;;  %p11698_p10 = scmp.lt.u32.totalorder %s11691_s11, %s13550_s3 }
  0x2d   : > { %p11694_p2 = pnand %p11692_p1, %p11991_p13 }
  0x2f   : > { %p11695_p6 = pneg %p11694_p2 }
  0x31   : > { %p11700_p3 = pnand %p11698_p10, %p11695_p6 }
  0x33   : > { %11703 = shalt.err (!%p11700_p3)
}
  0x34   : > { %s11704_s28 = scalar_lea.vmem %s11979_s6, 2048  ;;  %p11712_p12 = scmp.lt.s32.totalorder %s11979_s6, %s11979_s6 }
  0x35   : > { %p11705_p5 = scmp.ne.s32.totalorder %s11979_s6, %s11704_s28  ;;  %p11713_p0 = scmp.lt.s32.totalorder %s11704_s28, %s11704_s28 }
  0x37   : > { %p11707_p7 = pnand %p11705_p5, %p11991_p13  ;;  %p11714_p1 = por %p11713_p0, %p11712_p12 }
  0x39   : > { %p11708_p9 = pneg %p11707_p7 }
  0x3b   : > { %p11715_p2 = pnand %p11714_p1, %p11708_p9 }
  0x3d   : > { %11718 = shalt.err (!%p11715_p2)
}
  0x3e   : > { %11562 = dma.hbm_to_vmem [thread:$0]  (!%p11975_p11), %s13550_s3, 2048, %s11979_s6, [#allocation12], %s13556_s23, %s13556_s23, %s11885_s27  }
  0x3f   : > { %s11719_s10 = scalar_lea.hbm %s13549_s2, 32 }
  0x40   : > { %p11720_p6 = scmp.ne.s32.totalorder %s13549_s2, %s11719_s10  ;;  %p11726_p5 = scmp.lt.u32.totalorder %s11719_s10, %s13549_s2 }
  0x42   : > { %p11722_p10 = pnand %p11720_p6, %p11991_p13 }
  0x44   : > { %p11723_p3 = pneg %p11722_p10 }
  0x46   : > { %p11728_p7 = pnand %p11726_p5, %p11723_p3 }
  0x48   : > { %11731 = shalt.err (!%p11728_p7)
}
  0x49   : > { %s11732_s16 = scalar_lea.vmem %s190_s8, 32  ;;  %p11740_p1 = scmp.lt.s32.totalorder %s190_s8, %s190_s8 }
  0x4a   : > { %p11733_p9 = scmp.ne.s32.totalorder %s190_s8, %s11732_s16  ;;  %p11741_p2 = scmp.lt.s32.totalorder %s11732_s16, %s11732_s16 }
  0x4c   : > { %p11735_p12 = pnand %p11733_p9, %p11991_p13  ;;  %p11742_p4 = por %p11741_p2, %p11740_p1 }
  0x4e   : > { %p11736_p0 = pneg %p11735_p12 }
  0x50   : > { %p11743_p8 = pnand %p11742_p4, %p11736_p0 }
  0x52   : > { %11746 = shalt.err (!%p11743_p8)
}
  0x53   : > { %s11886_s6 = smov 16   ;;  %s11887_s28 = smov 1  }
  0x54   : > { %11559 = dma.hbm_to_vmem [thread:$0]  (!%p11975_p11), %s13549_s2, 32, %s190_s8, [#allocation9], %s11886_s6, %s11886_s6, %s11887_s28  }
  0x55   : > { %s11888_s7 = smov [#allocation13]   ;;  %s11747_s12 = scalar_lea.hbm %s13551_s4, 16 }
  0x56   : > { %s216_s9 = sshll.u32 %s11888_s7, 4  ;;  %p11748_p4 = scmp.ne.s32.totalorder %s13551_s4, %s11747_s12  ;;  %s217_s9 = int_to_ptr.vmem [resolvable:$true] %s216_s9 }
  0x57   : > { %p11754_p10 = scmp.lt.u32.totalorder %s11747_s12, %s13551_s4 }
  0x58   : > { %p11750_p8 = pnand %p11748_p4, %p11991_p13 }
  0x5a   : > { %p11751_p6 = pneg %p11750_p8 }
  0x5c   : > { %p11756_p3 = pnand %p11754_p10, %p11751_p6 }
  0x5e   : > { %11759 = shalt.err (!%p11756_p3)
}
  0x5f   : > { %s11760_s8 = scalar_lea.vmem %s217_s9, 16  ;;  %s11767_s6 = scalar_lea.vmem %s217_s9, 32 }
  0x60   : > { %p11761_p5 = scmp.ne.s32.totalorder %s217_s9, %s11760_s8  ;;  %p11768_p12 = scmp.lt.s32.totalorder %s217_s9, %s217_s9 }
  0x61   : > { %p11769_p0 = scmp.lt.s32.totalorder %s11767_s6, %s11760_s8 }
  0x62   : > { %p11763_p7 = pnand %p11761_p5, %p11991_p13 }
  0x63   : > { %p11770_p1 = por %p11769_p0, %p11768_p12 }
  0x64   : > { %p11764_p9 = pneg %p11763_p7 }
  0x66   : > { %p11771_p2 = pnand %p11770_p1, %p11764_p9 }
  0x68   : > { %11774 = shalt.err (!%p11771_p2)
}
  0x69   : > { %11565 = dma.hbm_to_vmem [thread:$0]  (!%p11975_p11), %s13551_s4, 16, %s217_s9, [#allocation12]  }
  0x6a   : > { %s12079_s14 = sadd.s32 1, %s11879_s21   ;;  %s30_s23 = sadd.s32 1, %s11875_s20 }
  0x6b   : > { %s27_s29 = ssub.s32 %s11879_s21, %s12079_s14  ;;  %p37_p13 = scmp.ne.s32.totalorder %s11875_s20, %s11871_s19 }
  0x6c   : > { %p28_p4 = scmp.eq.s32.totalorder %s27_s29, 0  ;;  %p38_p8 = scmp.eq.s32.totalorder %s11879_s21, 0 }
  0x6d   : > { %p13642_p6 = scmp.eq.s32.totalorder %s11945_s22, 1  ;;  %p11578_p3 = scmp.lt.s32.totalorder %s11879_s21, 2 }
  0x6e   : > { %s12095_s7 = scalar_select %p28_p4, %s11875_s20, %s30_s23  }
  0x6f   : > { %p12089_p10 = por %p13642_p6, %p37_p13  ;;  %p39_p5 = por %p38_p8, %p37_p13 }
  0x70   : > { %s227_s10 = sand.u32 1, %s11875_s20   ;;  %s7835_s9 = sshll.u32 %s11879_s21, 12 }
  0x71   : > { %s7817_s11 = sshll.u32 %s227_s10, 8  ;;  %s12102_s15 = scalar_lea.hbm %s13547_s0, %s7835_s9 }
  0x72   : > { %s231_s16 = scalar_lea.vmem [#allocation5], %s7817_s11  ;;  %p12106_p11 = pnand %p11578_p3, %p39_p5 }
  0x73   : > { %s238_s8 = sshll.u32 %s231_s16, 4  ;;  %s12110_s28 = scalar_lea.sflag [#allocation6], %s227_s10  ;;  %s12104_s8 = int_to_ptr.vmem [resolvable:$true] %s238_s8 }
  0x74   : > { %s11775_s17 = scalar_lea.hbm %s12102_s15, 4096  ;;  %p11777_p9 = pneg %p12106_p11 }
  0x75   : > { %p11776_p7 = scmp.ne.s32.totalorder %s12102_s15, %s11775_s17  ;;  %s11780_s11 = scalar_lea.hbm %s13547_s0, 8192 }
  0x76   : > { %p11781_p1 = scmp.lt.u32.totalorder %s12102_s15, %s13547_s0  ;;  %p11782_p2 = scmp.lt.u32.totalorder %s11780_s11, %s11775_s17 }
  0x77   : > { %p11778_p12 = pnand %p11777_p9, %p11776_p7  ;;  %p11784_p4 = scmp.lt.u32.totalorder %s11775_s17, %s12102_s15 }
  0x78   : > { %p11783_p13 = por %p11782_p2, %p11781_p1 }
  0x79   : > { %p11779_p0 = pneg %p11778_p12 }
  0x7a   : > { %p11785_p8 = por %p11784_p4, %p11783_p13 }
  0x7c   : > { %p11786_p6 = pnand %p11785_p8, %p11779_p0 }
  0x7e   : > { %11789 = shalt.err (!%p11786_p6)
}
  0x7f   : > { %s11790_s10 = scalar_lea.vmem %s12104_s8, 4096  ;;  %s11889_s13 = smov [#allocation5]  }
  0x80   : > { %p11791_p3 = scmp.ne.s32.totalorder %s12104_s8, %s11790_s10  ;;  %s11795_s16 = sshll.u32 %s11889_s13, 4  ;;  %s11796_s16 = int_to_ptr.vmem [resolvable:$false] %s11795_s16 }
  0x81   : > { %s11797_s23 = scalar_lea.vmem %s11796_s16, 8192  ;;  %p11798_p12 = scmp.lt.s32.totalorder %s12104_s8, %s11796_s16 }
  0x82   : > { %p11793_p5 = pnand %p11791_p3, %p11777_p9  ;;  %p11799_p1 = scmp.lt.s32.totalorder %s11797_s23, %s11790_s10 }
  0x84   : > { %p11794_p7 = pneg %p11793_p5  ;;  %p11800_p2 = por %p11799_p1, %p11798_p12 }
  0x86   : > { %p11801_p13 = pnand %p11800_p2, %p11794_p7 }
  0x88   : > { %11804 = shalt.err (!%p11801_p13)
}
  0x89   : > { %s13645_s17 = smov 128   ;;  %p13646_p9 = scmp.ne.s32.totalorder %s13639_s26, 0 }
  0x8a   : > { %11569 = dma.hbm_to_vmem [thread:$0]  (!%p12106_p11), %s12102_s15, 4096, %s12104_s8, %s12110_s28, %s13645_s17, %s13645_s17, %s11885_s27  }
  0x8b   : > { %250 = sbr.rel (%p13646_p9) target bundleno = 1820 (0x71c), region = 40 }
  0x92   : > { %s12144_s29 = sand.u32 1, %s11871_s19   ;;  %p13647_p0 = scmp.ne.s32.totalorder %s13637_s24, 0 }
  0x93   : > { %s7821_s11 = sshll.u32 %s12144_s29, 8  ;;  %s253_s9 = scalar_lea.sflag [#allocation6], %s12144_s29 }
  0x94   : > { %s12150_s6 = scalar_lea.vmem [#allocation5], %s7821_s11 }
  0x95   : > { %11850 = dma.done.wait (%p13647_p0), %s253_s9, 4096  }
  0x96   : > { %11852 = vsyncadd (%p13647_p0), %s253_s9, 4294963200  ;;  %p13648_p11 = scmp.eq.s32.totalorder %s11945_s22, 0 }
  0x98   : > { %11854 = dma.done.wait (%p13648_p11), [#allocation9], 36896   ;;  %p13649_p4 = pmov %p13648_p11 }
  0x9a   : > { %11856 = vsyncadd (%p13649_p4), [#allocation9], 4294930400  ;;  %p13650_p8 = pmov %p13649_p4 }
  0x9b   : > { %p13651_p6 = pmov %p13649_p4 }
  0x9c   : > { %11858 = dma.done.wait (%p13650_p8), [#allocation12], 2064  }
  0x9d   : > { %11860 = vsyncadd (%p13651_p6), [#allocation12], 4294965232  ;;  %v11890_v0 = vmov 0.0   ;;  %v575_v1 = vld [vmem:[#allocation8] sm:$0xff]  ;;  %v576_v2 = vld [vmem:[#allocation8 + $0x8] sm:$0xff]  ;;  %s13412_s24 = scalar_lea.vmem [#allocation14], %s7821_s11 }
  0x9e   : > { %299 = vst [vmem:[#allocation2] sm:$0xff] %v11890_v0  ;;  %8781 = vmatprep.mubr.f32.mxu0 %v11890_v0  ;;  %300 = vst [vmem:[#allocation2 + $0x8] sm:$0xff] %v11890_v0  ;;  %v577_v3 = vld [vmem:[#allocation8 + $0x10] sm:$0xff]  ;;  %v10269_v4 = vpack.c.bf16 %v576_v2, %v575_v1  ;;  %v578_v5 = vld [vmem:[#allocation8 + $0x18] sm:$0xff]  ;;  %s7836_s26 = sshll.u32 %s11945_s22, 12  ;;  %s7699_s27 = sshll.u32 %s13412_s24, 4  ;;  %s13501_s27 = int_to_ptr.vmem [resolvable:$true] %s7699_s27 }
  0x9f   : > { %301 = vst [vmem:[#allocation2 + $0x10] sm:$0x3] %v11890_v0  ;;  %302 = vst [vmem:[#allocation2 + $0x18] sm:$0xff] %v11890_v0  ;;  %v10273_v6 = vpack.c.bf16 %v578_v5, %v577_v3  ;;  %v579_v7 = vld [vmem:[#allocation8 + $0x20] sm:$0xff]  ;;  %v580_v8 = vld [vmem:[#allocation8 + $0x28] sm:$0xff]  ;;  %s13499_s28 = scalar_lea.hbm %s13552_s5, %s7836_s26  ;;  %s7686_s22 = scalar_lea.sflag [#allocation7], %s12144_s29 }
  0xa0   : > { %303 = vst [vmem:[#allocation2 + $0x20] sm:$0xff] %v11890_v0  ;;  %304 = vst [vmem:[#allocation2 + $0x28] sm:$0x3] %v11890_v0  ;;  %10270 = vmatprep.subr.bf16.mxu0 %v10269_v4  ;;  %v10277_v9 = vpack.c.bf16 %v580_v8, %v579_v7  ;;  %v581_v10 = vld [vmem:[#allocation8 + $0x30] sm:$0xff]  ;;  %v582_v11 = vld [vmem:[#allocation8 + $0x38] sm:$0xff]  ;;  %s11805_s12 = scalar_lea.vmem %s13501_s27, 4096 }
  0xa1   : > { %305 = vst [vmem:[#allocation2 + $0x30] sm:$0xff] %v11890_v0  ;;  %306 = vst [vmem:[#allocation2 + $0x38] sm:$0xff] %v11890_v0  ;;  %10272 = vmatpush3.bf16.msra.mxu0 %v10269_v4  ;;  %v12274_v12 = vld [vmem:[%s12150_s6] sm:$0xff]  ;;  %v12277_v13 = vld [vmem:[%s12150_s6 + $0x8] sm:$0xff]  ;;  %v10281_v19 = vpack.c.bf16 %v582_v11, %v581_v10  ;;  %p11806_p3 = scmp.ne.s32.totalorder %s13501_s27, %s11805_s12  ;;  %s11891_s10 = smov [#allocation14]  }
  0xa2   : > { %307 = vst [vmem:[#allocation2 + $0x40] sm:$0x3] %v11890_v0  ;;  %308 = vst [vmem:[#allocation2 + $0x48] sm:$0xff] %v11890_v0  ;;  %10274 = vmatprep.subr.bf16.mxu0 %v10273_v6  ;;  %v12280_v14 = vld [vmem:[%s12150_s6 + $0x10] sm:$0xff]  ;;  %v12286_v15 = vld [vmem:[%s12150_s6 + $0x18] sm:$0xff]  ;;  %s11809_s13 = sshll.u32 %s11891_s10, 4  ;;  %s11810_s13 = int_to_ptr.vmem [resolvable:$false] %s11809_s13 }
  0xa3   : > { %309 = vst [vmem:[#allocation2 + $0x50] sm:$0xff] %v11890_v0  ;;  %310 = vst [vmem:[#allocation2 + $0x58] sm:$0x3] %v11890_v0  ;;  %v12290_v16 = vld [vmem:[%s12150_s6 + $0x20] sm:$0xff]  ;;  %v12293_v17 = vld [vmem:[%s12150_s6 + $0x28] sm:$0xff]  ;;  %p11807_p5 = pnand %p11806_p3, %p12089_p10  ;;  %s11811_s16 = scalar_lea.vmem %s11810_s13, 8192 }
  0xa4   : > { %311 = vst [vmem:[#allocation2 + $0x60] sm:$0xff] %v11890_v0  ;;  %312 = vst [vmem:[#allocation2 + $0x68] sm:$0xff] %v11890_v0  ;;  %v12296_v18 = vld [vmem:[%s12150_s6 + $0x30] sm:$0xff]  ;;  %v583_v20 = vld [vmem:[#allocation8 + $0x40] sm:$0xff]  ;;  %p11812_p12 = scmp.lt.s32.totalorder %s13501_s27, %s11810_s13  ;;  %p11813_p1 = scmp.lt.s32.totalorder %s11811_s16, %s11805_s12 }
  0xa5   : > { %313 = vst [vmem:[#allocation2 + $0x70] sm:$0x3] %v11890_v0  ;;  %314 = vst [vmem:[#allocation2 + $0x78] sm:$0xff] %v11890_v0  ;;  %10276 = vmatpush3.bf16.msra.mxu0 %v10273_v6  ;;  %v584_v21 = vld [vmem:[#allocation8 + $0x48] sm:$0xff]  ;;  %v12302_v22 = vld [vmem:[%s12150_s6 + $0x38] sm:$0xff]  ;;  %p11808_p7 = pneg %p11807_p5 }
  0xa6   : > { %315 = vst [vmem:[#allocation2 + $0x80] sm:$0xff] %v11890_v0  ;;  %316 = vst [vmem:[#allocation2 + $0x88] sm:$0x3] %v11890_v0  ;;  %10278 = vmatprep.subr.bf16.mxu0 %v10277_v9  ;;  %v12306_v23 = vld [vmem:[%s12150_s6 + $0x40] sm:$0xff]  ;;  %v12309_v24 = vld [vmem:[%s12150_s6 + $0x48] sm:$0xff]  ;;  %v10285_v30 = vpack.c.bf16 %v584_v21, %v583_v20  ;;  %p11814_p2 = por %p11813_p1, %p11812_p12 }
  0xa7   : > { %317 = vst [vmem:[#allocation2 + $0x90] sm:$0xff] %v11890_v0  ;;  %318 = vst [vmem:[#allocation2 + $0x98] sm:$0xff] %v11890_v0  ;;  %v12312_v25 = vld [vmem:[%s12150_s6 + $0x50] sm:$0xff]  ;;  %v12318_v26 = vld [vmem:[%s12150_s6 + $0x58] sm:$0xff] }
  0xa8   : > { %319 = vst [vmem:[#allocation2 + $0xa0] sm:$0x3] %v11890_v0  ;;  %320 = vst [vmem:[#allocation2 + $0xa8] sm:$0xff] %v11890_v0  ;;  %v12322_v27 = vld [vmem:[%s12150_s6 + $0x60] sm:$0xff]  ;;  %v12325_v28 = vld [vmem:[%s12150_s6 + $0x68] sm:$0xff]  ;;  %p11815_p13 = pnand %p11814_p2, %p11808_p7 }
  0xa9   : > { %321 = vst [vmem:[#allocation2 + $0xb0] sm:$0xff] %v11890_v0  ;;  %322 = vst [vmem:[#allocation2 + $0xb8] sm:$0x3] %v11890_v0  ;;  %10280 = vmatpush3.bf16.msra.mxu0 %v10277_v9  ;;  %v12328_v29 = vld [vmem:[%s12150_s6 + $0x70] sm:$0xff]  ;;  %v12334_v31 = vld [vmem:[%s12150_s6 + $0x78] sm:$0xff] }
  0xaa   : > { %323 = vst [vmem:[#allocation2 + $0xc0] sm:$0xff] %v11890_v0  ;;  %324 = vst [vmem:[#allocation2 + $0xc8] sm:$0xff] %v11890_v0  ;;  %10282 = vmatprep.subr.bf16.mxu0 %v10281_v19  ;;  %v585_v32 = vld [vmem:[#allocation8 + $0x50] sm:$0xff]  ;;  %v586_v33 = vld [vmem:[#allocation8 + $0x58] sm:$0xff] }
  0xab   : > { %325 = vst [vmem:[#allocation2 + $0xd0] sm:$0x3] %v11890_v0  ;;  %326 = vst [vmem:[#allocation2 + $0xd8] sm:$0xff] %v11890_v0  ;;  %v12338_v34 = vld [vmem:[%s12150_s6 + $0x80] sm:$0xff]  ;;  %v12341_v35 = vld [vmem:[%s12150_s6 + $0x88] sm:$0xff]  ;;  %v10289_v36 = vpack.c.bf16 %v586_v33, %v585_v32 }
  0xac   : > { %327 = vst [vmem:[#allocation2 + $0xe0] sm:$0xff] %v11890_v0  ;;  %328 = vst [vmem:[#allocation2 + $0xe8] sm:$0x3] %v11890_v0  ;;  %v12346_v37 = vld [vmem:[%s12150_s6 + $0x90] sm:$0xff]  ;;  %v12349_v38 = vld [vmem:[%s12150_s6 + $0x98] sm:$0xff] }
  0xad   : > { %329 = vst [vmem:[#allocation2 + $0xf0] sm:$0xff] %v11890_v0  ;;  %330 = vst [vmem:[#allocation2 + $0xf8] sm:$0xff] %v11890_v0  ;;  %10284 = vmatpush3.bf16.msra.mxu0 %v10281_v19  ;;  %v587_v39 = vld [vmem:[#allocation8 + $0x60] sm:$0xff]  ;;  %v588_v40 = vld [vmem:[#allocation8 + $0x68] sm:$0xff] }
  0xae   : > { %331 = vst [vmem:[#allocation2 + $0x100] sm:$0x3] %v11890_v0  ;;  %332 = vst [vmem:[#allocation2 + $0x108] sm:$0xff] %v11890_v0  ;;  %10286 = vmatprep.subr.bf16.mxu0 %v10285_v30  ;;  %v10293_v41 = vpack.c.bf16 %v588_v40, %v587_v39  ;;  %v589_v42 = vld [vmem:[#allocation8 + $0x70] sm:$0xff]  ;;  %v12354_v43 = vld [vmem:[%s12150_s6 + $0xa0] sm:$0xff] }
  0xaf   : > { %333 = vst [vmem:[#allocation2 + $0x110] sm:$0xff] %v11890_v0  ;;  %334 = vst [vmem:[#allocation2 + $0x118] sm:$0x3] %v11890_v0  ;;  %v12357_v44 = vld [vmem:[%s12150_s6 + $0xa8] sm:$0xff]  ;;  %v590_v45 = vld [vmem:[#allocation8 + $0x78] sm:$0xff] }
  0xb0   : > { %335 = vst [vmem:[#allocation2 + $0x120] sm:$0xff] %v11890_v0  ;;  %336 = vst [vmem:[#allocation2 + $0x128] sm:$0xff] %v11890_v0  ;;  %v12362_v46 = vld [vmem:[%s12150_s6 + $0xb0] sm:$0xff]  ;;  %v12365_v47 = vld [vmem:[%s12150_s6 + $0xb8] sm:$0xff]  ;;  %v10297_v51 = vpack.c.bf16 %v590_v45, %v589_v42 }
  0xb1   : > { %337 = vst [vmem:[#allocation2 + $0x130] sm:$0x3] %v11890_v0  ;;  %338 = vst [vmem:[#allocation2 + $0x138] sm:$0xff] %v11890_v0  ;;  %10288 = vmatpush3.bf16.msra.mxu0 %v10285_v30  ;;  %v12370_v48 = vld [vmem:[%s12150_s6 + $0xc0] sm:$0xff]  ;;  %v12373_v49 = vld [vmem:[%s12150_s6 + $0xc8] sm:$0xff] }
  0xb2   : > { %339 = vst [vmem:[#allocation2 + $0x140] sm:$0xff] %v11890_v0  ;;  %340 = vst [vmem:[#allocation2 + $0x148] sm:$0x3] %v11890_v0  ;;  %10290 = vmatprep.subr.bf16.mxu0 %v10289_v36  ;;  %v12376_v50 = vld [vmem:[%s12150_s6 + $0xd0] sm:$0xff]  ;;  %v12382_v52 = vld [vmem:[%s12150_s6 + $0xd8] sm:$0xff] }
  0xb3   : > { %341 = vst [vmem:[#allocation2 + $0x150] sm:$0xff] %v11890_v0  ;;  %342 = vst [vmem:[#allocation2 + $0x158] sm:$0xff] %v11890_v0  ;;  %v945_v53 = vld [vmem:[#allocation8 + $0x80] sm:$0xff]  ;;  %v946_v54 = vld [vmem:[#allocation8 + $0x88] sm:$0xff] }
  0xb4   : > { %343 = vst [vmem:[#allocation2 + $0x160] sm:$0x3] %v11890_v0  ;;  %344 = vst [vmem:[#allocation2 + $0x168] sm:$0xff] %v11890_v0  ;;  %v12386_v55 = vld [vmem:[%s12150_s6 + $0xe0] sm:$0xff]  ;;  %v12390_v56 = vld [vmem:[%s12150_s6 + $0xe8] sm:$0xff]  ;;  %v10301_v57 = vpack.c.bf16 %v946_v54, %v945_v53 }
  0xb5   : > { %345 = vst [vmem:[#allocation2 + $0x170] sm:$0xff] %v11890_v0  ;;  %346 = vst [vmem:[#allocation2 + $0x178] sm:$0x3] %v11890_v0  ;;  %10292 = vmatpush3.bf16.msra.mxu0 %v10289_v36  ;;  %v947_v58 = vld [vmem:[#allocation8 + $0x90] sm:$0xff]  ;;  %v948_v59 = vld [vmem:[#allocation8 + $0x98] sm:$0xff] }
  0xb6   : > { %347 = vst [vmem:[#allocation2 + $0x180] sm:$0xff] %v11890_v0  ;;  %348 = vst [vmem:[#allocation2 + $0x188] sm:$0xff] %v11890_v0  ;;  %10294 = vmatprep.subr.bf16.mxu0 %v10293_v41  ;;  %v10305_v61 = vpack.c.bf16 %v948_v59, %v947_v58  ;;  %v949_v62 = vld [vmem:[#allocation8 + $0xa0] sm:$0xff]  ;;  %v950_v63 = vld [vmem:[#allocation8 + $0xa8] sm:$0xff] }
  0xb7   : > { %349 = vst [vmem:[#allocation2 + $0x190] sm:$0x3] %v11890_v0  ;;  %350 = vst [vmem:[#allocation2 + $0x198] sm:$0xff] %v11890_v0  ;;  %v10309_v3 = vpack.c.bf16 %v950_v63, %v949_v62  ;;  %v951_v4 = vld [vmem:[#allocation8 + $0xb0] sm:$0xff]  ;;  %v952_v5 = vld [vmem:[#allocation8 + $0xb8] sm:$0xff] }
  0xb8   : > { %351 = vst [vmem:[#allocation2 + $0x1a0] sm:$0xff] %v11890_v0  ;;  %352 = vst [vmem:[#allocation2 + $0x1a8] sm:$0x3] %v11890_v0  ;;  %v953_v8 = vld [vmem:[#allocation8 + $0xc0] sm:$0xff]  ;;  %v954_v9 = vld [vmem:[#allocation8 + $0xc8] sm:$0xff] }
  0xb9   : > { %353 = vst [vmem:[#allocation3] sm:$0xff] %v11890_v0  ;;  %354 = vst [vmem:[#allocation3 + $0x8] sm:$0xff] %v11890_v0  ;;  %10296 = vmatpush3.bf16.msra.mxu0 %v10293_v41  ;;  %v10317_v19 = vpack.c.bf16 %v954_v9, %v953_v8  ;;  %v955_v20 = vld [vmem:[#allocation8 + $0xd0] sm:$0xff]  ;;  %v956_v21 = vld [vmem:[#allocation8 + $0xd8] sm:$0xff] }
  0xba   : > { %355 = vst [vmem:[#allocation3 + $0x10] sm:$0x3] %v11890_v0  ;;  %356 = vst [vmem:[#allocation3 + $0x18] sm:$0xff] %v11890_v0  ;;  %10298 = vmatprep.subr.bf16.mxu0 %v10297_v51  ;;  %v10321_v33 = vpack.c.bf16 %v956_v21, %v955_v20  ;;  %v957_v36 = vld [vmem:[#allocation8 + $0xe0] sm:$0xff]  ;;  %v958_v39 = vld [vmem:[#allocation8 + $0xe8] sm:$0xff] }
  0xbb   : > { %357 = vst [vmem:[#allocation3 + $0x20] sm:$0xff] %v11890_v0  ;;  %358 = vst [vmem:[#allocation3 + $0x28] sm:$0x3] %v11890_v0  ;;  %v10325_v42 = vpack.c.bf16 %v958_v39, %v957_v36  ;;  %v959_v45 = vld [vmem:[#allocation8 + $0xf0] sm:$0xff]  ;;  %v1315_v58 = vld [vmem:[#allocation8 + $0x100] sm:$0xff] }
  0xbc   : > { %359 = vst [vmem:[#allocation3 + $0x30] sm:$0xff] %v11890_v0  ;;  %360 = vst [vmem:[#allocation3 + $0x38] sm:$0xff] %v11890_v0  ;;  %v1316_v59 = vld [vmem:[#allocation8 + $0x108] sm:$0xff] }
  0xbd   : > { %361 = vst [vmem:[#allocation3 + $0x40] sm:$0x3] %v11890_v0  ;;  %362 = vst [vmem:[#allocation3 + $0x48] sm:$0xff] %v11890_v0  ;;  %10300 = vmatpush3.bf16.msra.mxu0 %v10297_v51  ;;  %v960_v51 = vld [vmem:[#allocation8 + $0xf8] sm:$0xff]  ;;  %v10333_v63 = vpack.c.bf16 %v1316_v59, %v1315_v58  ;;  %v1317_v58 = vld [vmem:[#allocation8 + $0x110] sm:$0xff] }
  0xbe   : > { %363 = vst [vmem:[#allocation3 + $0x50] sm:$0xff] %v11890_v0  ;;  %364 = vst [vmem:[#allocation3 + $0x58] sm:$0x3] %v11890_v0  ;;  %10302 = vmatprep.subr.bf16.mxu0 %v10301_v57  ;;  %v1318_v59 = vld [vmem:[#allocation8 + $0x118] sm:$0xff] }
  0xbf   : > { %365 = vst [vmem:[#allocation3 + $0x60] sm:$0xff] %v11890_v0  ;;  %366 = vst [vmem:[#allocation3 + $0x68] sm:$0xff] %v11890_v0 }
  0xc0   : > { %367 = vst [vmem:[#allocation3 + $0x70] sm:$0x3] %v11890_v0  ;;  %368 = vst [vmem:[#allocation3 + $0x78] sm:$0xff] %v11890_v0  ;;  %8782 = vmatmul.mubr.f32.vlgmr.msra.gmra.mrb[0].mxu0 %v11890_v0 }
  0xc1   : > { %369 = vst [vmem:[#allocation3 + $0x80] sm:$0xff] %v11890_v0  ;;  %370 = vst [vmem:[#allocation3 + $0x88] sm:$0x3] %v11890_v0  ;;  %10304 = vmatpush3.bf16.msra.mxu0 %v10301_v57  ;;  %v10329_v57 = vpack.c.bf16 %v960_v51, %v959_v45 }
  0xc2   : > { %371 = vst [vmem:[#allocation3 + $0x90] sm:$0xff] %v11890_v0  ;;  %372 = vst [vmem:[#allocation3 + $0x98] sm:$0xff] %v11890_v0  ;;  %10306 = vmatprep.subr.bf16.mxu0 %v10305_v61 }
  0xc3   : > { %373 = vst [vmem:[#allocation3 + $0xa0] sm:$0x3] %v11890_v0  ;;  %374 = vst [vmem:[#allocation3 + $0xa8] sm:$0xff] %v11890_v0 }
  0xc4   : > { %375 = vst [vmem:[#allocation3 + $0xb0] sm:$0xff] %v11890_v0  ;;  %376 = vst [vmem:[#allocation3 + $0xb8] sm:$0x3] %v11890_v0 }
  0xc5   : > { %377 = vst [vmem:[#allocation3 + $0xc0] sm:$0xff] %v11890_v0  ;;  %378 = vst [vmem:[#allocation3 + $0xc8] sm:$0xff] %v11890_v0  ;;  %10308 = vmatpush3.bf16.msra.mxu0 %v10305_v61 }
  0xc6   : > { %379 = vst [vmem:[#allocation3 + $0xd0] sm:$0x3] %v11890_v0  ;;  %380 = vst [vmem:[#allocation3 + $0xd8] sm:$0xff] %v11890_v0  ;;  %10310 = vmatprep.subr.bf16.mxu0 %v10309_v3 }
  0xc7   : > { %381 = vst [vmem:[#allocation3 + $0xe0] sm:$0xff] %v11890_v0  ;;  %382 = vst [vmem:[#allocation3 + $0xe8] sm:$0x3] %v11890_v0 }
  0xc8   : > { %383 = vst [vmem:[#allocation3 + $0xf0] sm:$0xff] %v11890_v0  ;;  %384 = vst [vmem:[#allocation3 + $0xf8] sm:$0xff] %v11890_v0 }
  0xc9   : > { %385 = vst [vmem:[#allocation3 + $0x100] sm:$0x3] %v11890_v0  ;;  %386 = vst [vmem:[#allocation3 + $0x108] sm:$0xff] %v11890_v0  ;;  %10312 = vmatpush3.bf16.msra.mxu0 %v10309_v3 }
  0xca   : > { %387 = vst [vmem:[#allocation3 + $0x110] sm:$0xff] %v11890_v0  ;;  %388 = vst [vmem:[#allocation3 + $0x118] sm:$0x3] %v11890_v0 }
  0xcb   : > { %389 = vst [vmem:[#allocation3 + $0x120] sm:$0xff] %v11890_v0  ;;  %390 = vst [vmem:[#allocation3 + $0x128] sm:$0xff] %v11890_v0 }
  0xcc   : > { %391 = vst [vmem:[#allocation3 + $0x130] sm:$0x3] %v11890_v0  ;;  %392 = vst [vmem:[#allocation3 + $0x138] sm:$0xff] %v11890_v0 }
  0xcd   : > { %393 = vst [vmem:[#allocation3 + $0x140] sm:$0xff] %v11890_v0  ;;  %394 = vst [vmem:[#allocation3 + $0x148] sm:$0x3] %v11890_v0 }
  0xce   : > { %395 = vst [vmem:[#allocation3 + $0x150] sm:$0xff] %v11890_v0  ;;  %396 = vst [vmem:[#allocation3 + $0x158] sm:$0xff] %v11890_v0 }
  0xcf   : > { %397 = vst [vmem:[#allocation3 + $0x160] sm:$0x3] %v11890_v0  ;;  %398 = vst [vmem:[#allocation3 + $0x168] sm:$0xff] %v11890_v0 }
  0xd0   : > { %399 = vst [vmem:[#allocation3 + $0x170] sm:$0xff] %v11890_v0  ;;  %400 = vst [vmem:[#allocation3 + $0x178] sm:$0x3] %v11890_v0 }
  0xd1   : > { %401 = vst [vmem:[#allocation3 + $0x180] sm:$0xff] %v11890_v0  ;;  %402 = vst [vmem:[#allocation3 + $0x188] sm:$0xff] %v11890_v0 }
  0xd2   : > { %403 = vst [vmem:[#allocation3 + $0x190] sm:$0x3] %v11890_v0  ;;  %404 = vst [vmem:[#allocation3 + $0x198] sm:$0xff] %v11890_v0 }
  0xd3   : > { %405 = vst [vmem:[#allocation3 + $0x1a0] sm:$0xff] %v11890_v0  ;;  %406 = vst [vmem:[#allocation3 + $0x1a8] sm:$0x3] %v11890_v0  ;;  %v10313_v0 = vpack.c.bf16 %v952_v5, %v951_v4 }
  0xd4   : > { %440 = vst [vmem:[#allocation2 + $0x19] sm:$0xff] %v12274_v12  ;;  %441 = vst [vmem:[#allocation2 + $0x21] sm:$0xff] %v12277_v13 }
  0xd5   : > { %442 = vst [vmem:[#allocation2 + $0x31] sm:$0xff] %v12280_v14  ;;  %443 = vst [vmem:[#allocation2 + $0x39] sm:$0xff] %v12286_v15  ;;  %10314 = vmatprep.subr.bf16.mxu0 %v10313_v0 }
  0xd6   : > { %444 = vst [vmem:[#allocation2 + $0x49] sm:$0xff] %v12290_v16  ;;  %445 = vst [vmem:[#allocation2 + $0x51] sm:$0xff] %v12293_v17  ;;  %10316 = vmatpush3.bf16.msra.mxu0 %v10313_v0 }
  0xd7   : > { %446 = vst [vmem:[#allocation2 + $0x61] sm:$0xff] %v12296_v18  ;;  %447 = vst [vmem:[#allocation2 + $0x69] sm:$0xff] %v12302_v22  ;;  %10318 = vmatprep.subr.bf16.mxu0 %v10317_v19 }
  0xd8   : > { %448 = vst [vmem:[#allocation2 + $0x79] sm:$0xff] %v12306_v23  ;;  %449 = vst [vmem:[#allocation2 + $0x81] sm:$0xff] %v12309_v24 }
  0xd9   : > { %450 = vst [vmem:[#allocation2 + $0x91] sm:$0xff] %v12312_v25  ;;  %451 = vst [vmem:[#allocation2 + $0x99] sm:$0xff] %v12318_v26 }
  0xda   : > { %452 = vst [vmem:[#allocation2 + $0xa9] sm:$0xff] %v12322_v27  ;;  %453 = vst [vmem:[#allocation2 + $0xb1] sm:$0xff] %v12325_v28  ;;  %10320 = vmatpush3.bf16.msra.mxu0 %v10317_v19 }
  0xdb   : > { %454 = vst [vmem:[#allocation2 + $0xc1] sm:$0xff] %v12328_v29  ;;  %455 = vst [vmem:[#allocation2 + $0xc9] sm:$0xff] %v12334_v31  ;;  %v12393_v60 = vld [vmem:[#allocation2 + $0x18] sm:$0xff]  ;;  %v12397_v1 = vld [vmem:[#allocation2 + $0x20] sm:$0xff]  ;;  %10322 = vmatprep.subr.bf16.mxu0 %v10321_v33 }
  0xdc   : > { %456 = vst [vmem:[#allocation2 + $0xd9] sm:$0xff] %v12338_v34  ;;  %457 = vst [vmem:[#allocation2 + $0xe1] sm:$0xff] %v12341_v35  ;;  %8784 = vmatprep.mubr.f32.mxu0 %v12393_v60  ;;  %v12399_v2 = vld [vmem:[#allocation2 + $0x30] sm:$0xff]  ;;  %v12403_v6 = vld [vmem:[#allocation2 + $0x38] sm:$0xff] }
  0xdd   : > { %458 = vst [vmem:[#allocation2 + $0xf1] sm:$0xff] %v12346_v37  ;;  %459 = vst [vmem:[#allocation2 + $0xf9] sm:$0xff] %v12349_v38  ;;  %8785 = vmatmul.mubr.f32.gmra.mrb[2].mxu0 %v12397_v1  ;;  %v12405_v7 = vld [vmem:[#allocation2 + $0x48] sm:$0xff]  ;;  %v12409_v10 = vld [vmem:[#allocation2 + $0x50] sm:$0xff] }
  0xde   : > { %460 = vst [vmem:[#allocation2 + $0x109] sm:$0xff] %v12354_v43  ;;  %461 = vst [vmem:[#allocation2 + $0x111] sm:$0xff] %v12357_v44  ;;  %8787 = vmatprep.mubr.f32.mxu0 %v12399_v2  ;;  %v12411_v11 = vld [vmem:[#allocation2 + $0x60] sm:$0xff]  ;;  %v12415_v30 = vld [vmem:[#allocation2 + $0x68] sm:$0xff]  ;;  %10324 = vmatpush3.bf16.msra.mxu0 %v10321_v33 }
  0xdf   : > { %462 = vst [vmem:[#allocation2 + $0x121] sm:$0xff] %v12362_v46  ;;  %463 = vst [vmem:[#allocation2 + $0x129] sm:$0xff] %v12365_v47  ;;  %v12417_v32 = vld [vmem:[#allocation2 + $0x78] sm:$0xff]  ;;  %v12421_v40 = vld [vmem:[#allocation2 + $0x80] sm:$0xff]  ;;  %10326 = vmatprep.subr.bf16.mxu0 %v10325_v42 }
  0xe0   : > { %464 = vst [vmem:[#allocation2 + $0x139] sm:$0xff] %v12370_v48  ;;  %465 = vst [vmem:[#allocation2 + $0x141] sm:$0xff] %v12373_v49  ;;  %v12423_v41 = vld [vmem:[#allocation2 + $0x90] sm:$0xff]  ;;  %v12427_v53 = vld [vmem:[#allocation2 + $0x98] sm:$0xff] }
  0xe1   : > { %466 = vst [vmem:[#allocation2 + $0x151] sm:$0xff] %v12376_v50  ;;  %467 = vst [vmem:[#allocation2 + $0x159] sm:$0xff] %v12382_v52  ;;  %8788 = vmatmul.mubr.f32.gmra.mrb[4].mxu0 %v12403_v6  ;;  %v12429_v54 = vld [vmem:[#allocation2 + $0xa8] sm:$0xff]  ;;  %v12433_v61 = vld [vmem:[#allocation2 + $0xb0] sm:$0xff] }
  0xe2   : > { %13652 = vst [vmem:[#allocation19_spill] sm:$0xff] %v12386_v55  ;;  %468 = vst [vmem:[#allocation2 + $0x169] sm:$0xff] %v12386_v55  ;;  %8790 = vmatprep.mubr.f32.mxu0 %v12405_v7  ;;  %10328 = vmatpush3.bf16.msra.mxu0 %v10325_v42  ;;  %v12435_v62 = vld [vmem:[#allocation2 + $0xc0] sm:$0xff]  ;;  %v12439_v3 = vld [vmem:[#allocation2 + $0xc8] sm:$0xff] }
  0xe3   : > { %469 = vst [vmem:[#allocation2 + $0x171] sm:$0xff] %v12390_v56  ;;  %10330 = vmatprep.subr.bf16.mxu0 %v10329_v57  ;;  %v12441_v4 = vld [vmem:[#allocation2 + $0xd8] sm:$0xff]  ;;  %v12445_v5 = vld [vmem:[#allocation2 + $0xe0] sm:$0xff] }
  0xe4   : > { %v12447_v0 = vld [vmem:[#allocation2 + $0xf0] sm:$0xff]  ;;  %v12451_v8 = vld [vmem:[#allocation2 + $0xf8] sm:$0xff] }
  0xe5   : > { %8791 = vmatmul.mubr.f32.gmra.mrb[6].mxu0 %v12409_v10  ;;  %v12453_v9 = vld [vmem:[#allocation2 + $0x108] sm:$0xff]  ;;  %v12457_v19 = vld [vmem:[#allocation2 + $0x110] sm:$0xff] }
  0xe6   : > { %8793 = vmatprep.mubr.f32.mxu0 %v12411_v11  ;;  %10332 = vmatpush3.bf16.msra.mxu0 %v10329_v57  ;;  %13653 = vst [vmem:[#allocation20_spill] sm:$0xff] %v12457_v19  ;;  %v12459_v20 = vld [vmem:[#allocation2 + $0x120] sm:$0xff]  ;;  %v12463_v21 = vld [vmem:[#allocation2 + $0x128] sm:$0xff] }
  0xe7   : > { %10334 = vmatprep.subr.bf16.mxu0 %v10333_v63  ;;  %13654 = vst [vmem:[#allocation21_spill] sm:$0xff] %v12459_v20  ;;  %13655 = vst [vmem:[#allocation22_spill] sm:$0xff] %v12463_v21  ;;  %v12465_v33 = vld [vmem:[#allocation2 + $0x138] sm:$0xff]  ;;  %v12469_v36 = vld [vmem:[#allocation2 + $0x140] sm:$0xff] }
  0xe8   : > { %13656 = vst [vmem:[#allocation23_spill] sm:$0xff] %v12465_v33  ;;  %13657 = vst [vmem:[#allocation24_spill] sm:$0xff] %v12469_v36  ;;  %v12471_v39 = vld [vmem:[#allocation2 + $0x150] sm:$0xff]  ;;  %v12475_v42 = vld [vmem:[#allocation2 + $0x158] sm:$0xff] }
  0xe9   : > { %8794 = vmatmul.mubr.f32.gmra.mrb[8].mxu0 %v12415_v30  ;;  %13658 = vst [vmem:[#allocation25_spill] sm:$0xff] %v12471_v39  ;;  %13659 = vst [vmem:[#allocation26_spill] sm:$0xff] %v12475_v42  ;;  %v12477_v45 = vld [vmem:[#allocation2 + $0x168] sm:$0xff] }
  0xea   : > { %8796 = vmatprep.mubr.f32.mxu0 %v12417_v32  ;;  %13660 = vst [vmem:[#allocation27_spill] sm:$0xff] %v12477_v45  ;;  %v12481_v51 = vld [vmem:[#allocation2 + $0x170] sm:$0xff]  ;;  %v880_v57 = vld [vmem:[#allocation2 + $0x1] sm:$0xff] }
  0xeb   : > { %13661 = vst [vmem:[#allocation28_spill] sm:$0xff] %v12481_v51 }
  0xed   : > { %8797 = vmatmul.mubr.f32.gmra.mrb[10].mxu0 %v12421_v40 }
  0xee   : > { %8799 = vmatprep.mubr.f32.mxu0 %v12423_v41 }
  0xf1   : > { %8800 = vmatmul.mubr.f32.gmra.mrb[12].mxu0 %v12427_v53 }
  0xf2   : > { %8802 = vmatprep.mubr.f32.mxu0 %v12429_v54 }
  0xf5   : > { %8803 = vmatmul.mubr.f32.gmra.mrb[14].mxu0 %v12433_v61 }
  0xf6   : > { %8805 = vmatprep.mubr.f32.mxu0 %v12435_v62 }
  0xf9   : > { %8806 = vmatmul.mubr.f32.gmra.mrb[16].mxu0 %v12439_v3 }
  0xfa   : > { %8808 = vmatprep.mubr.f32.mxu0 %v12441_v4 }
  0xfd   : > { %8809 = vmatmul.mubr.f32.gmra.mrb[18].mxu0 %v12445_v5 }
  0xfe   : > { %8811 = vmatprep.mubr.f32.mxu0 %v12447_v0 }
 0x101   : > { %8812 = vmatmul.mubr.f32.gmra.mrb[20].mxu0 %v12451_v8 }
 0x102   : > { %8814 = vmatprep.mubr.f32.mxu0 %v12453_v9 }
 0x105   : > { %8815 = vmatmul.mubr.f32.gmra.mrb[22].mxu0 %v12457_v19  ;;  %v1324_v19 = vld [vmem:[#allocation8 + $0x148] sm:$0xff] }
 0x106   : > { %8817 = vmatprep.mubr.f32.mxu0 %v12459_v20  ;;  %v1321_v20 = vld [vmem:[#allocation8 + $0x130] sm:$0xff] }
 0x109   : > { %8818 = vmatmul.mubr.f32.gmra.mrb[24].mxu0 %v12463_v21  ;;  %v1319_v21 = vld [vmem:[#allocation8 + $0x120] sm:$0xff] }
 0x10a   : > { %8820 = vmatprep.mubr.f32.mxu0 %v12465_v33  ;;  %v881_v33 = vld [vmem:[#allocation2 + $0x9] sm:$0xff] }
 0x10d   : > { %8821 = vmatmul.mubr.f32.gmra.mrb[26].mxu0 %v12469_v36  ;;  %v10337_v36 = vpack.c.bf16 %v1318_v59, %v1317_v58  ;;  %v1685_v58 = vld [vmem:[#allocation8 + $0x180] sm:$0xff]  ;;  %v1686_v59 = vld [vmem:[#allocation8 + $0x188] sm:$0xff] }
 0x10e   : > { %8823 = vmatprep.mubr.f32.mxu0 %v12471_v39  ;;  %v1320_v39 = vld [vmem:[#allocation8 + $0x128] sm:$0xff] }
 0x111   : > { %8824 = vmatmul.mubr.f32.gmra.mrb[28].mxu0 %v12475_v42  ;;  %v10341_v42 = vpack.c.bf16 %v1320_v39, %v1319_v21  ;;  %v1326_v21 = vld [vmem:[#allocation8 + $0x158] sm:$0xff]  ;;  %v1327_v39 = vld [vmem:[#allocation8 + $0x160] sm:$0xff] }
 0x112   : > { %8826 = vmatprep.mubr.f32.mxu0 %v12477_v45  ;;  %v1322_v45 = vld [vmem:[#allocation8 + $0x138] sm:$0xff] }
 0x115   : > { %8827 = vmatmul.mubr.f32.gmra.mrb[30].mxu0 %v12481_v51  ;;  %v10345_v51 = vpack.c.bf16 %v1322_v45, %v1321_v20  ;;  %v1328_v20 = vld [vmem:[#allocation8 + $0x168] sm:$0xff]  ;;  %v1329_v45 = vld [vmem:[#allocation8 + $0x170] sm:$0xff] }
 0x116   : > { %8861 = vmatprep.mubr.f32.mxu0 %v880_v57  ;;  %v1323_v57 = vld [vmem:[#allocation8 + $0x140] sm:$0xff] }
 0x119   : > { %8862 = vmatmul.mubr.f32.vlgmr.msra.gmra.mrb[0].mxu0 %v881_v33  ;;  %v1325_v33 = vld [vmem:[#allocation8 + $0x150] sm:$0xff] }
 0x11a   : > { %10336 = vmatpush3.bf16.msra.mxu0 %v10333_v63  ;;  %8864 = vmatprep.mubr.f32.mxu0 %v12274_v12  ;;  %v10349_v63 = vpack.c.bf16 %v1324_v19, %v1323_v57  ;;  %v1330_v19 = vld [vmem:[#allocation8 + $0x178] sm:$0xff]  ;;  %v10365_v57 = vpack.c.bf16 %v1686_v59, %v1685_v58  ;;  %v12525_v58 = vld [vmem:[#allocation2 + $0x22] sm:$0xff] }
 0x11b   : > { %10338 = vmatprep.subr.bf16.mxu0 %v10337_v36  ;;  %13665 = vst [vmem:[#allocation32_spill] sm:$0xff] %v12525_v58  ;;  %v12527_v59 = vld [vmem:[#allocation2 + $0x32] sm:$0xff] }
 0x11c   : > { %13666 = vst [vmem:[#allocation33_spill] sm:$0xff] %v12527_v59 }
 0x11d   : > { %8865 = vmatmul.mubr.f32.gmra.mrb[2].mxu0 %v12277_v13 }
 0x11e   : > { %8867 = vmatprep.mubr.f32.mxu0 %v12280_v14  ;;  %10340 = vmatpush3.bf16.msra.mxu0 %v10337_v36  ;;  %v10353_v36 = vpack.c.bf16 %v1326_v21, %v1325_v33  ;;  %v12514_v33 = vld [vmem:[%s12150_s6 + $0xf8] sm:$0xff]  ;;  %v1250_v21 = vld [vmem:[#allocation2 + $0x2] sm:$0xff] }
 0x11f   : > { %10342 = vmatprep.subr.bf16.mxu0 %v10341_v42  ;;  %13663 = vst [vmem:[#allocation30_spill] sm:$0xff] %v12514_v33  ;;  %471 = vst [vmem:[#allocation2 + $0x189] sm:$0xff] %v12514_v33 }
 0x121   : > { %8868 = vmatmul.mubr.f32.gmra.mrb[4].mxu0 %v12286_v15 }
 0x122   : > { %8870 = vmatprep.mubr.f32.mxu0 %v12290_v16  ;;  %10344 = vmatpush3.bf16.msra.mxu0 %v10341_v42  ;;  %v10357_v42 = vpack.c.bf16 %v1328_v20, %v1327_v39  ;;  %v1688_v39 = vld [vmem:[#allocation8 + $0x198] sm:$0xff]  ;;  %v1251_v20 = vld [vmem:[#allocation2 + $0xa] sm:$0xff] }
 0x123   : > { %10346 = vmatprep.subr.bf16.mxu0 %v10345_v51 }
 0x125   : > { %8871 = vmatmul.mubr.f32.gmra.mrb[6].mxu0 %v12293_v17 }
 0x126   : > { %8873 = vmatprep.mubr.f32.mxu0 %v12296_v18  ;;  %10348 = vmatpush3.bf16.msra.mxu0 %v10345_v51  ;;  %v10361_v51 = vpack.c.bf16 %v1330_v19, %v1329_v45  ;;  %v1689_v19 = vld [vmem:[#allocation8 + $0x1a0] sm:$0xff] }
 0x127   : > { %10350 = vmatprep.subr.bf16.mxu0 %v10349_v63 }
 0x129   : > { %8874 = vmatmul.mubr.f32.gmra.mrb[8].mxu0 %v12302_v22 }
 0x12a   : > { %8876 = vmatprep.mubr.f32.mxu0 %v12306_v23  ;;  %10352 = vmatpush3.bf16.msra.mxu0 %v10349_v63  ;;  %v12510_v63 = vld [vmem:[%s12150_s6 + $0xf0] sm:$0xff] }
 0x12b   : > { %10354 = vmatprep.subr.bf16.mxu0 %v10353_v36  ;;  %13662 = vst [vmem:[#allocation29_spill] sm:$0xff] %v12510_v63  ;;  %470 = vst [vmem:[#allocation2 + $0x181] sm:$0xff] %v12510_v63  ;;  %v1691_v63 = vld [vmem:[#allocation8 + $0x1b0] sm:$0xff] }
 0x12d   : > { %8877 = vmatmul.mubr.f32.gmra.mrb[10].mxu0 %v12309_v24 }
 0x12e   : > { %8879 = vmatprep.mubr.f32.mxu0 %v12312_v25  ;;  %10356 = vmatpush3.bf16.msra.mxu0 %v10353_v36  ;;  %v1687_v36 = vld [vmem:[#allocation8 + $0x190] sm:$0xff] }
 0x12f   : > { %10358 = vmatprep.subr.bf16.mxu0 %v10357_v42  ;;  %v10369_v45 = vpack.c.bf16 %v1688_v39, %v1687_v36  ;;  %v12533_v36 = vld [vmem:[#allocation2 + $0x4a] sm:$0xff]  ;;  %v1693_v39 = vld [vmem:[#allocation8 + $0x1c0] sm:$0xff] }
 0x130   : > { %13668 = vst [vmem:[#allocation35_spill] sm:$0xff] %v12533_v36 }
 0x131   : > { %8880 = vmatmul.mubr.f32.gmra.mrb[12].mxu0 %v12318_v26 }
 0x132   : > { %8882 = vmatprep.mubr.f32.mxu0 %v12322_v27  ;;  %10360 = vmatpush3.bf16.msra.mxu0 %v10357_v42  ;;  %v12522_v42 = vld [vmem:[#allocation2 + $0x1a] sm:$0xff] }
 0x133   : > { %10362 = vmatprep.subr.bf16.mxu0 %v10361_v51  ;;  %13664 = vst [vmem:[#allocation31_spill] sm:$0xff] %v12522_v42 }
 0x135   : > { %8883 = vmatmul.mubr.f32.gmra.mrb[14].mxu0 %v12325_v28 }
 0x136   : > { %8885 = vmatprep.mubr.f32.mxu0 %v12328_v29  ;;  %10364 = vmatpush3.bf16.msra.mxu0 %v10361_v51  ;;  %v1690_v51 = vld [vmem:[#allocation8 + $0x1a8] sm:$0xff] }
 0x137   : > { %10366 = vmatprep.subr.bf16.mxu0 %v10365_v57  ;;  %v10373_v33 = vpack.c.bf16 %v1690_v51, %v1689_v19  ;;  %v12537_v19 = vld [vmem:[#allocation2 + $0x52] sm:$0xff]  ;;  %v12539_v51 = vld [vmem:[#allocation2 + $0x62] sm:$0xff] }
 0x138   : > { %13669 = vst [vmem:[#allocation36_spill] sm:$0xff] %v12537_v19  ;;  %13670 = vst [vmem:[#allocation37_spill] sm:$0xff] %v12539_v51 }
 0x139   : > { %8886 = vmatmul.mubr.f32.gmra.mrb[16].mxu0 %v12334_v31 }
 0x13a   : > { %8888 = vmatprep.mubr.f32.mxu0 %v12338_v34 }
 0x13d   : > { %8889 = vmatmul.mubr.f32.gmra.mrb[18].mxu0 %v12341_v35 }
 0x13e   : > { %8891 = vmatprep.mubr.f32.mxu0 %v12346_v37 }
 0x141   : > { %8892 = vmatmul.mubr.f32.gmra.mrb[20].mxu0 %v12349_v38 }
 0x142   : > { %8894 = vmatprep.mubr.f32.mxu0 %v12354_v43 }
 0x145   : > { %8895 = vmatmul.mubr.f32.gmra.mrb[22].mxu0 %v12357_v44 }
 0x146   : > { %8897 = vmatprep.mubr.f32.mxu0 %v12362_v46 }
 0x149   : > { %8898 = vmatmul.mubr.f32.gmra.mrb[24].mxu0 %v12365_v47 }
 0x14a   : > { %8900 = vmatprep.mubr.f32.mxu0 %v12370_v48 }
 0x14d   : > { %8901 = vmatmul.mubr.f32.gmra.mrb[26].mxu0 %v12373_v49 }
 0x14e   : > { %8903 = vmatprep.mubr.f32.mxu0 %v12376_v50 }
 0x151   : > { %8904 = vmatmul.mubr.f32.gmra.mrb[28].mxu0 %v12382_v52 }
 0x152   : > { %8906 = vmatprep.mubr.f32.mxu0 %v12386_v55  ;;  %v1692_v55 = vld [vmem:[#allocation8 + $0x1b8] sm:$0xff] }
 0x155   : > { %8907 = vmatmul.mubr.f32.gmra.mrb[30].mxu0 %v12390_v56 }
 0x156   : > { %8941 = vmatprep.mubr.f32.mxu0 %v1250_v21  ;;  %v12531_v21 = vld [vmem:[#allocation2 + $0x3a] sm:$0xff] }
 0x157   : > { %13667 = vst [vmem:[#allocation34_spill] sm:$0xff] %v12531_v21 }
 0x159   : > { %8942 = vmatmul.mubr.f32.vlgmr.msra.gmra.mrb[0].mxu0 %v1251_v20  ;;  %v1694_v20 = vld [vmem:[#allocation8 + $0x1c8] sm:$0xff] }
 0x15a   : > { %10368 = vmatpush3.bf16.msra.mxu0 %v10365_v57  ;;  %8944 = vmatprep.mubr.f32.mxu0 %v12522_v42  ;;  %v10377_v57 = vpack.c.bf16 %v1692_v55, %v1691_v63  ;;  %v1696_v42 = vld [vmem:[#allocation8 + $0x1d8] sm:$0xff]  ;;  %v12543_v55 = vld [vmem:[#allocation2 + $0x6a] sm:$0xff] }
 0x15b   : > { %10370 = vmatprep.subr.bf16.mxu0 %v10369_v45  ;;  %13671 = vst [vmem:[#allocation38_spill] sm:$0xff] %v12543_v55  ;;  %v12545_v63 = vld [vmem:[#allocation2 + $0x7a] sm:$0xff] }
 0x15c   : > { %13672 = vst [vmem:[#allocation39_spill] sm:$0xff] %v12545_v63 }
 0x15d   : > { %8945 = vmatmul.mubr.f32.gmra.mrb[2].mxu0 %v12525_v58  ;;  %v1695_v58 = vld [vmem:[#allocation8 + $0x1d0] sm:$0xff] }
 0x15e   : > { %8947 = vmatprep.mubr.f32.mxu0 %v12527_v59  ;;  %10372 = vmatpush3.bf16.msra.mxu0 %v10369_v45  ;;  %v10381_v59 = vpack.c.bf16 %v1694_v20, %v1693_v39  ;;  %v10385_v45 = vpack.c.bf16 %v1696_v42, %v1695_v58  ;;  %v12551_v39 = vld [vmem:[#allocation2 + $0x92] sm:$0xff]  ;;  %v12555_v42 = vld [vmem:[#allocation2 + $0x9a] sm:$0xff]  ;;  %v12557_v58 = vld [vmem:[#allocation2 + $0xaa] sm:$0xff] }
 0x15f   : > { %10374 = vmatprep.subr.bf16.mxu0 %v10373_v33 }
 0x161   : > { %8948 = vmatmul.mubr.f32.gmra.mrb[4].mxu0 %v12531_v21  ;;  %v1698_v21 = vld [vmem:[#allocation8 + $0x1e8] sm:$0xff] }
 0x162   : > { %8950 = vmatprep.mubr.f32.mxu0 %v12533_v36  ;;  %10376 = vmatpush3.bf16.msra.mxu0 %v10373_v33  ;;  %v1697_v36 = vld [vmem:[#allocation8 + $0x1e0] sm:$0xff] }
 0x163   : > { %10378 = vmatprep.subr.bf16.mxu0 %v10377_v57  ;;  %v12549_v33 = vld [vmem:[#allocation2 + $0x82] sm:$0xff]  ;;  %v10389_v20 = vpack.c.bf16 %v1698_v21, %v1697_v36 }
 0x164   : > { %v12563_v21 = vld [vmem:[#allocation2 + $0xc2] sm:$0xff] }
 0x165   : > { %8951 = vmatmul.mubr.f32.gmra.mrb[6].mxu0 %v12537_v19  ;;  %v1700_v19 = vld [vmem:[#allocation8 + $0x1f8] sm:$0xff]  ;;  %13674 = vst [vmem:[#allocation41_spill] sm:$0xff] %v12563_v21 }
 0x166   : > { %8953 = vmatprep.mubr.f32.mxu0 %v12539_v51  ;;  %10380 = vmatpush3.bf16.msra.mxu0 %v10377_v57  ;;  %v1699_v51 = vld [vmem:[#allocation8 + $0x1f0] sm:$0xff] }
 0x167   : > { %10382 = vmatprep.subr.bf16.mxu0 %v10381_v59  ;;  %v10393_v57 = vpack.c.bf16 %v1700_v19, %v1699_v51  ;;  %v12569_v19 = vld [vmem:[#allocation2 + $0xda] sm:$0xff]  ;;  %v12573_v51 = vld [vmem:[#allocation2 + $0xe2] sm:$0xff] }
 0x168   : > { %13676 = vst [vmem:[#allocation43_spill] sm:$0xff] %v12569_v19  ;;  %13677 = vst [vmem:[#allocation44_spill] sm:$0xff] %v12573_v51 }
 0x169   : > { %8954 = vmatmul.mubr.f32.gmra.mrb[8].mxu0 %v12543_v55  ;;  %v2056_v55 = vld [vmem:[#allocation8 + $0x208] sm:$0xff] }
 0x16a   : > { %8956 = vmatprep.mubr.f32.mxu0 %v12545_v63  ;;  %10384 = vmatpush3.bf16.msra.mxu0 %v10381_v59  ;;  %v2055_v63 = vld [vmem:[#allocation8 + $0x200] sm:$0xff]  ;;  %v12561_v59 = vld [vmem:[#allocation2 + $0xb2] sm:$0xff] }
 0x16b   : > { %10386 = vmatprep.subr.bf16.mxu0 %v10385_v45  ;;  %13673 = vst [vmem:[#allocation40_spill] sm:$0xff] %v12561_v59  ;;  %v10397_v36 = vpack.c.bf16 %v2056_v55, %v2055_v63  ;;  %v12579_v55 = vld [vmem:[#allocation2 + $0xfa] sm:$0xff]  ;;  %v12581_v63 = vld [vmem:[#allocation2 + $0x10a] sm:$0xff] }
 0x16c   : > { %13679 = vst [vmem:[#allocation46_spill] sm:$0xff] %v12579_v55  ;;  %13680 = vst [vmem:[#allocation47_spill] sm:$0xff] %v12581_v63 }
 0x16d   : > { %8957 = vmatmul.mubr.f32.gmra.mrb[10].mxu0 %v12549_v33 }
 0x16e   : > { %8959 = vmatprep.mubr.f32.mxu0 %v12551_v39  ;;  %10388 = vmatpush3.bf16.msra.mxu0 %v10385_v45  ;;  %v12567_v45 = vld [vmem:[#allocation2 + $0xca] sm:$0xff] }
 0x16f   : > { %10390 = vmatprep.subr.bf16.mxu0 %v10389_v20  ;;  %13675 = vst [vmem:[#allocation42_spill] sm:$0xff] %v12567_v45 }
 0x171   : > { %8960 = vmatmul.mubr.f32.gmra.mrb[12].mxu0 %v12555_v42 }
 0x172   : > { %8962 = vmatprep.mubr.f32.mxu0 %v12557_v58  ;;  %10392 = vmatpush3.bf16.msra.mxu0 %v10389_v20  ;;  %v12575_v20 = vld [vmem:[#allocation2 + $0xf2] sm:$0xff] }
 0x173   : > { %10394 = vmatprep.subr.bf16.mxu0 %v10393_v57  ;;  %13678 = vst [vmem:[#allocation45_spill] sm:$0xff] %v12575_v20 }
 0x175   : > { %8963 = vmatmul.mubr.f32.gmra.mrb[14].mxu0 %v12561_v59  ;;  %v2060_v59 = vld [vmem:[#allocation8 + $0x228] sm:$0xff] }
 0x176   : > { %8965 = vmatprep.mubr.f32.mxu0 %v12563_v21  ;;  %10396 = vmatpush3.bf16.msra.mxu0 %v10393_v57  ;;  %v12585_v57 = vld [vmem:[#allocation2 + $0x112] sm:$0xff] }
 0x177   : > { %10398 = vmatprep.subr.bf16.mxu0 %v10397_v36  ;;  %13681 = vst [vmem:[#allocation48_spill] sm:$0xff] %v12585_v57 }
 0x179   : > { %8966 = vmatmul.mubr.f32.gmra.mrb[16].mxu0 %v12567_v45  ;;  %v12587_v45 = vld [vmem:[#allocation2 + $0x122] sm:$0xff] }
 0x17a   : > { %8968 = vmatprep.mubr.f32.mxu0 %v12569_v19  ;;  %13682 = vst [vmem:[#allocation49_spill] sm:$0xff] %v12587_v45  ;;  %v12591_v19 = vld [vmem:[#allocation2 + $0x12a] sm:$0xff] }
 0x17b   : > { %13683 = vst [vmem:[#allocation50_spill] sm:$0xff] %v12591_v19 }
 0x17d   : > { %8969 = vmatmul.mubr.f32.gmra.mrb[18].mxu0 %v12573_v51  ;;  %v12593_v51 = vld [vmem:[#allocation2 + $0x13a] sm:$0xff] }
 0x17e   : > { %8971 = vmatprep.mubr.f32.mxu0 %v12575_v20  ;;  %13684 = vst [vmem:[#allocation51_spill] sm:$0xff] %v12593_v51  ;;  %v12597_v20 = vld [vmem:[#allocation2 + $0x142] sm:$0xff] }
 0x17f   : > { %13685 = vst [vmem:[#allocation52_spill] sm:$0xff] %v12597_v20 }
 0x181   : > { %8972 = vmatmul.mubr.f32.gmra.mrb[20].mxu0 %v12579_v55  ;;  %v12599_v55 = vld [vmem:[#allocation2 + $0x152] sm:$0xff] }
 0x182   : > { %8974 = vmatprep.mubr.f32.mxu0 %v12581_v63  ;;  %13686 = vst [vmem:[#allocation53_spill] sm:$0xff] %v12599_v55  ;;  %v12603_v63 = vld [vmem:[#allocation2 + $0x15a] sm:$0xff] }
 0x183   : > { %13687 = vst [vmem:[#allocation54_spill] sm:$0xff] %v12603_v63 }
 0x185   : > { %8975 = vmatmul.mubr.f32.gmra.mrb[22].mxu0 %v12585_v57  ;;  %v12605_v57 = vld [vmem:[#allocation2 + $0x16a] sm:$0xff] }
 0x186   : > { %8977 = vmatprep.mubr.f32.mxu0 %v12587_v45  ;;  %13688 = vst [vmem:[#allocation55_spill] sm:$0xff] %v12605_v57  ;;  %v12609_v45 = vld [vmem:[#allocation2 + $0x172] sm:$0xff] }
 0x187   : > { %13689 = vst [vmem:[#allocation56_spill] sm:$0xff] %v12609_v45 }
 0x189   : > { %8978 = vmatmul.mubr.f32.gmra.mrb[24].mxu0 %v12591_v19  ;;  %v2057_v19 = vld [vmem:[#allocation8 + $0x210] sm:$0xff] }
 0x18a   : > { %8980 = vmatprep.mubr.f32.mxu0 %v12593_v51  ;;  %v2058_v51 = vld [vmem:[#allocation8 + $0x218] sm:$0xff] }
 0x18b   : > { %v10401_v21 = vpack.c.bf16 %v2058_v51, %v2057_v19  ;;  %v2064_v19 = vld [vmem:[#allocation8 + $0x248] sm:$0xff]  ;;  %v2427_v51 = vld [vmem:[#allocation8 + $0x290] sm:$0xff] }
 0x18d   : > { %8981 = vmatmul.mubr.f32.gmra.mrb[26].mxu0 %v12597_v20  ;;  %v2059_v20 = vld [vmem:[#allocation8 + $0x220] sm:$0xff] }
 0x18e   : > { %8983 = vmatprep.mubr.f32.mxu0 %v12599_v55  ;;  %v2061_v55 = vld [vmem:[#allocation8 + $0x230] sm:$0xff] }
 0x191   : > { %8984 = vmatmul.mubr.f32.gmra.mrb[28].mxu0 %v12603_v63  ;;  %v10405_v63 = vpack.c.bf16 %v2060_v59, %v2059_v20  ;;  %v2066_v59 = vld [vmem:[#allocation8 + $0x258] sm:$0xff] }
 0x192   : > { %8986 = vmatprep.mubr.f32.mxu0 %v12605_v57  ;;  %v2062_v57 = vld [vmem:[#allocation8 + $0x238] sm:$0xff] }
 0x193   : > { %v2428_v20 = vld [vmem:[#allocation8 + $0x298] sm:$0xff] }
 0x195   : > { %8987 = vmatmul.mubr.f32.gmra.mrb[30].mxu0 %v12609_v45  ;;  %v10409_v45 = vpack.c.bf16 %v2062_v57, %v2061_v55  ;;  %v10433_v55 = vpack.c.bf16 %v2428_v20, %v2427_v51  ;;  %v2430_v57 = vld [vmem:[#allocation8 + $0x2a8] sm:$0xff] }
 0x196   : > { %9021 = vmatprep.mubr.f32.mxu0 %v12393_v60  ;;  %v2063_v60 = vld [vmem:[#allocation8 + $0x240] sm:$0xff]  ;;  %v3167_v51 = vld [vmem:[#allocation8 + $0x388] sm:$0xff] }
 0x197   : > { %v13711_v20 = vld [vmem:[#allocation40_spill] sm:$0xff] }
 0x199   : > { %9022 = vmatmul.mubr.f32.vlgmr.msra.gmra.mrb[0].mxu0 %v12397_v1  ;;  %v10413_v1 = vpack.c.bf16 %v2064_v19, %v2063_v60  ;;  %v2431_v19 = vld [vmem:[#allocation8 + $0x2b0] sm:$0xff] }
 0x19a   : > { %10400 = vmatpush3.bf16.msra.mxu0 %v10397_v36  ;;  %9024 = vmatprep.mubr.f32.mxu0 %v12399_v2  ;;  %v2065_v2 = vld [vmem:[#allocation8 + $0x250] sm:$0xff]  ;;  %v2070_v36 = vld [vmem:[#allocation8 + $0x278] sm:$0xff] }
 0x19b   : > { %10402 = vmatprep.subr.bf16.mxu0 %v10401_v21 }
 0x19d   : > { %9025 = vmatmul.mubr.f32.gmra.mrb[2].mxu0 %v12403_v6  ;;  %v10417_v6 = vpack.c.bf16 %v2066_v59, %v2065_v2  ;;  %v2434_v59 = vld [vmem:[#allocation8 + $0x2c8] sm:$0xff] }
 0x19e   : > { %9027 = vmatprep.mubr.f32.mxu0 %v12405_v7  ;;  %10404 = vmatpush3.bf16.msra.mxu0 %v10401_v21  ;;  %v2067_v7 = vld [vmem:[#allocation8 + $0x260] sm:$0xff]  ;;  %v2068_v21 = vld [vmem:[#allocation8 + $0x268] sm:$0xff] }
 0x19f   : > { %10406 = vmatprep.subr.bf16.mxu0 %v10405_v63 }
 0x1a1   : > { %9028 = vmatmul.mubr.f32.gmra.mrb[4].mxu0 %v12409_v10  ;;  %v10421_v10 = vpack.c.bf16 %v2068_v21, %v2067_v7  ;;  %v2438_v7 = vld [vmem:[#allocation8 + $0x2e8] sm:$0xff]  ;;  %v2440_v21 = vld [vmem:[#allocation8 + $0x2f8] sm:$0xff] }
 0x1a2   : > { %9030 = vmatprep.mubr.f32.mxu0 %v12411_v11  ;;  %10408 = vmatpush3.bf16.msra.mxu0 %v10405_v63  ;;  %v2069_v11 = vld [vmem:[#allocation8 + $0x270] sm:$0xff]  ;;  %v2429_v63 = vld [vmem:[#allocation8 + $0x2a0] sm:$0xff] }
 0x1a3   : > { %10410 = vmatprep.subr.bf16.mxu0 %v10409_v45  ;;  %v10437_v60 = vpack.c.bf16 %v2430_v57, %v2429_v63  ;;  %v13714_v63 = vld [vmem:[#allocation43_spill] sm:$0xff]  ;;  %v13717_v57 = vld [vmem:[#allocation46_spill] sm:$0xff] }
 0x1a5   : > { %9031 = vmatmul.mubr.f32.gmra.mrb[6].mxu0 %v12415_v30  ;;  %v10425_v30 = vpack.c.bf16 %v2070_v36, %v2069_v11  ;;  %v13707_v11 = vld [vmem:[#allocation36_spill] sm:$0xff]  ;;  %v13708_v36 = vld [vmem:[#allocation37_spill] sm:$0xff] }
 0x1a6   : > { %9033 = vmatprep.mubr.f32.mxu0 %v12417_v32  ;;  %10412 = vmatpush3.bf16.msra.mxu0 %v10409_v45  ;;  %v2425_v32 = vld [vmem:[#allocation8 + $0x280] sm:$0xff]  ;;  %v2426_v45 = vld [vmem:[#allocation8 + $0x288] sm:$0xff] }
 0x1a7   : > { %10414 = vmatprep.subr.bf16.mxu0 %v10413_v1 }
 0x1a9   : > { %9034 = vmatmul.mubr.f32.gmra.mrb[8].mxu0 %v12421_v40  ;;  %v10429_v40 = vpack.c.bf16 %v2426_v45, %v2425_v32  ;;  %v2806_v32 = vld [vmem:[#allocation8 + $0x350] sm:$0xff]  ;;  %v2807_v45 = vld [vmem:[#allocation8 + $0x358] sm:$0xff] }
 0x1aa   : > { %9036 = vmatprep.mubr.f32.mxu0 %v12423_v41  ;;  %10416 = vmatpush3.bf16.msra.mxu0 %v10413_v1  ;;  %v13690_v41 = vld [vmem:[#allocation20_spill] sm:$0xff]  ;;  %v2432_v1 = vld [vmem:[#allocation8 + $0x2b8] sm:$0xff] }
 0x1ab   : > { %10418 = vmatprep.subr.bf16.mxu0 %v10417_v6  ;;  %v10441_v2 = vpack.c.bf16 %v2432_v1, %v2431_v19  ;;  %v13719_v19 = vld [vmem:[#allocation48_spill] sm:$0xff]  ;;  %v13720_v1 = vld [vmem:[#allocation49_spill] sm:$0xff] }
 0x1ad   : > { %9037 = vmatmul.mubr.f32.gmra.mrb[10].mxu0 %v12427_v53  ;;  %v13691_v53 = vld [vmem:[#allocation21_spill] sm:$0xff] }
 0x1ae   : > { %9039 = vmatprep.mubr.f32.mxu0 %v12429_v54  ;;  %10420 = vmatpush3.bf16.msra.mxu0 %v10417_v6  ;;  %v13692_v54 = vld [vmem:[#allocation22_spill] sm:$0xff] }
 0x1af   : > { %10422 = vmatprep.subr.bf16.mxu0 %v10421_v10  ;;  %v2436_v6 = vld [vmem:[#allocation8 + $0x2d8] sm:$0xff] }
 0x1b1   : > { %9040 = vmatmul.mubr.f32.gmra.mrb[12].mxu0 %v12433_v61  ;;  %v13693_v61 = vld [vmem:[#allocation23_spill] sm:$0xff] }
 0x1b2   : > { %9042 = vmatprep.mubr.f32.mxu0 %v12435_v62  ;;  %10424 = vmatpush3.bf16.msra.mxu0 %v10421_v10  ;;  %v13694_v62 = vld [vmem:[#allocation24_spill] sm:$0xff] }
 0x1b3   : > { %10426 = vmatprep.subr.bf16.mxu0 %v10425_v30  ;;  %v2797_v10 = vld [vmem:[#allocation8 + $0x308] sm:$0xff] }
 0x1b5   : > { %9043 = vmatmul.mubr.f32.gmra.mrb[14].mxu0 %v12439_v3  ;;  %v13695_v3 = vld [vmem:[#allocation25_spill] sm:$0xff] }
 0x1b6   : > { %9045 = vmatprep.mubr.f32.mxu0 %v12441_v4  ;;  %10428 = vmatpush3.bf16.msra.mxu0 %v10425_v30  ;;  %v13696_v4 = vld [vmem:[#allocation26_spill] sm:$0xff] }
 0x1b7   : > { %10430 = vmatprep.subr.bf16.mxu0 %v10429_v40 }
 0x1b9   : > { %9046 = vmatmul.mubr.f32.gmra.mrb[16].mxu0 %v12445_v5  ;;  %v13697_v5 = vld [vmem:[#allocation27_spill] sm:$0xff] }
 0x1ba   : > { %9048 = vmatprep.mubr.f32.mxu0 %v12447_v0  ;;  %v12641_v0 = vld [vmem:[#allocation2 + $0x180] sm:$0xff] }
 0x1bd   : > { %9049 = vmatmul.mubr.f32.gmra.mrb[18].mxu0 %v12451_v8  ;;  %v13698_v8 = vld [vmem:[#allocation28_spill] sm:$0xff] }
 0x1be   : > { %9051 = vmatprep.mubr.f32.mxu0 %v12453_v9  ;;  %v12645_v9 = vld [vmem:[#allocation2 + $0x188] sm:$0xff] }
 0x1c1   : > { %9052 = vmatmul.mubr.f32.gmra.mrb[20].mxu0 %v13690_v41  ;;  %v13710_v41 = vld [vmem:[#allocation39_spill] sm:$0xff] }
 0x1c2   : > { %9054 = vmatprep.mubr.f32.mxu0 %v13691_v53  ;;  %v10481_v53 = vpack.c.bf16 %v2807_v45, %v2806_v32  ;;  %v2743_v32 = vld [vmem:[#allocation2 + $0xc0] sm:$0xff] }
 0x1c5   : > { %9055 = vmatmul.mubr.f32.gmra.mrb[22].mxu0 %v13692_v54  ;;  %v2808_v54 = vld [vmem:[#allocation8 + $0x360] sm:$0xff] }
 0x1c6   : > { %9057 = vmatprep.mubr.f32.mxu0 %v13693_v61  ;;  %v2809_v61 = vld [vmem:[#allocation8 + $0x368] sm:$0xff] }
 0x1c9   : > { %9058 = vmatmul.mubr.f32.gmra.mrb[24].mxu0 %v13694_v62  ;;  %v10485_v62 = vpack.c.bf16 %v2809_v61, %v2808_v54  ;;  %v2745_v54 = vld [vmem:[#allocation2 + $0xd8] sm:$0xff] }
 0x1ca   : > { %9060 = vmatprep.mubr.f32.mxu0 %v13695_v3  ;;  %v2810_v3 = vld [vmem:[#allocation8 + $0x370] sm:$0xff] }
 0x1cd   : > { %9061 = vmatmul.mubr.f32.gmra.mrb[26].mxu0 %v13696_v4  ;;  %v2811_v4 = vld [vmem:[#allocation8 + $0x378] sm:$0xff] }
 0x1ce   : > { %9063 = vmatprep.mubr.f32.mxu0 %v13697_v5  ;;  %v10489_v5 = vpack.c.bf16 %v2811_v4, %v2810_v3  ;;  %v3537_v3 = vld [vmem:[#allocation8 + $0x408] sm:$0xff]  ;;  %v2746_v4 = vld [vmem:[#allocation2 + $0xe0] sm:$0xff] }
 0x1d1   : > { %9064 = vmatmul.mubr.f32.gmra.mrb[28].mxu0 %v13698_v8  ;;  %v3166_v8 = vld [vmem:[#allocation8 + $0x380] sm:$0xff] }
 0x1d2   : > { %9066 = vmatprep.mubr.f32.mxu0 %v12641_v0 }
 0x1d5   : > { %9067 = vmatmul.mubr.f32.gmra.mrb[30].mxu0 %v12645_v9 }
 0x1d6   : > { %9101 = vmatprep.mubr.f32.mxu0 %v12274_v12  ;;  %v2433_v12 = vld [vmem:[#allocation8 + $0x2c0] sm:$0xff] }
 0x1d9   : > { %9102 = vmatmul.mubr.f32.vlgmr.msra.gmra.mrb[0].mxu0 %v12277_v13  ;;  %v10445_v13 = vpack.c.bf16 %v2434_v59, %v2433_v12  ;;  %v13722_v12 = vld [vmem:[#allocation51_spill] sm:$0xff]  ;;  %v13723_v59 = vld [vmem:[#allocation52_spill] sm:$0xff] }
 0x1da   : > { %10432 = vmatpush3.bf16.msra.mxu0 %v10429_v40  ;;  %9104 = vmatprep.mubr.f32.mxu0 %v12280_v14  ;;  %v2435_v14 = vld [vmem:[#allocation8 + $0x2d0] sm:$0xff]  ;;  %v13709_v40 = vld [vmem:[#allocation38_spill] sm:$0xff] }
 0x1db   : > { %10434 = vmatprep.subr.bf16.mxu0 %v10433_v55 }
 0x1dd   : > { %9105 = vmatmul.mubr.f32.gmra.mrb[2].mxu0 %v12286_v15  ;;  %v10449_v15 = vpack.c.bf16 %v2436_v6, %v2435_v14  ;;  %v13725_v14 = vld [vmem:[#allocation54_spill] sm:$0xff]  ;;  %v13726_v6 = vld [vmem:[#allocation55_spill] sm:$0xff] }
 0x1de   : > { %9107 = vmatprep.mubr.f32.mxu0 %v12290_v16  ;;  %10436 = vmatpush3.bf16.msra.mxu0 %v10433_v55  ;;  %v2437_v16 = vld [vmem:[#allocation8 + $0x2e0] sm:$0xff]  ;;  %v13712_v55 = vld [vmem:[#allocation41_spill] sm:$0xff] }
 0x1df   : > { %10438 = vmatprep.subr.bf16.mxu0 %v10437_v60 }
 0x1e1   : > { %9108 = vmatmul.mubr.f32.gmra.mrb[4].mxu0 %v12293_v17  ;;  %v10453_v17 = vpack.c.bf16 %v2438_v7, %v2437_v16  ;;  %v13727_v16 = vld [vmem:[#allocation56_spill] sm:$0xff] }
 0x1e2   : > { %9110 = vmatprep.mubr.f32.mxu0 %v12296_v18  ;;  %10440 = vmatpush3.bf16.msra.mxu0 %v10437_v60  ;;  %v2439_v18 = vld [vmem:[#allocation8 + $0x2f0] sm:$0xff]  ;;  %v13718_v60 = vld [vmem:[#allocation47_spill] sm:$0xff] }
 0x1e3   : > { %10442 = vmatprep.subr.bf16.mxu0 %v10441_v2  ;;  %v12713_v7 = vld [vmem:[#allocation2 + $0x18a] sm:$0xff] }
 0x1e5   : > { %9111 = vmatmul.mubr.f32.gmra.mrb[6].mxu0 %v12302_v22  ;;  %v10457_v22 = vpack.c.bf16 %v2440_v21, %v2439_v18  ;;  %v3168_v18 = vld [vmem:[#allocation8 + $0x390] sm:$0xff]  ;;  %v3169_v21 = vld [vmem:[#allocation8 + $0x398] sm:$0xff] }
 0x1e6   : > { %9113 = vmatprep.mubr.f32.mxu0 %v12306_v23  ;;  %10444 = vmatpush3.bf16.msra.mxu0 %v10441_v2  ;;  %v2796_v23 = vld [vmem:[#allocation8 + $0x300] sm:$0xff] }
 0x1e7   : > { %10446 = vmatprep.subr.bf16.mxu0 %v10445_v13  ;;  %v13721_v2 = vld [vmem:[#allocation50_spill] sm:$0xff] }
 0x1e9   : > { %9114 = vmatmul.mubr.f32.gmra.mrb[8].mxu0 %v12309_v24  ;;  %v10461_v24 = vpack.c.bf16 %v2797_v10, %v2796_v23  ;;  %v2733_v23 = vld [vmem:[#allocation2 + $0x48] sm:$0xff]  ;;  %v10497_v10 = vpack.c.bf16 %v3169_v21, %v3168_v18  ;;  %v4046_v18 = vld [vmem:[#allocation8 + $0x498] sm:$0xff] }
 0x1ea   : > { %9116 = vmatprep.mubr.f32.mxu0 %v12312_v25  ;;  %10448 = vmatpush3.bf16.msra.mxu0 %v10445_v13  ;;  %v13699_v25 = vld [vmem:[#allocation19_spill] sm:$0xff]  ;;  %v13724_v13 = vld [vmem:[#allocation53_spill] sm:$0xff] }
 0x1eb   : > { %10450 = vmatprep.subr.bf16.mxu0 %v10449_v15 }
 0x1ed   : > { %9117 = vmatmul.mubr.f32.gmra.mrb[10].mxu0 %v12318_v26  ;;  %v13700_v26 = vld [vmem:[#allocation29_spill] sm:$0xff] }
 0x1ee   : > { %9119 = vmatprep.mubr.f32.mxu0 %v12322_v27  ;;  %10452 = vmatpush3.bf16.msra.mxu0 %v10449_v15  ;;  %v2798_v27 = vld [vmem:[#allocation8 + $0x310] sm:$0xff]  ;;  %v12709_v15 = vld [vmem:[#allocation2 + $0x182] sm:$0xff] }
 0x1ef   : > { %10454 = vmatprep.subr.bf16.mxu0 %v10453_v17 }
 0x1f1   : > { %9120 = vmatmul.mubr.f32.gmra.mrb[12].mxu0 %v12325_v28  ;;  %v2799_v28 = vld [vmem:[#allocation8 + $0x318] sm:$0xff] }
 0x1f2   : > { %9122 = vmatprep.mubr.f32.mxu0 %v12328_v29  ;;  %10456 = vmatpush3.bf16.msra.mxu0 %v10453_v17  ;;  %v13701_v29 = vld [vmem:[#allocation30_spill] sm:$0xff]  ;;  %v2731_v17 = vld [vmem:[#allocation2 + $0x30] sm:$0xff] }
 0x1f3   : > { %10458 = vmatprep.subr.bf16.mxu0 %v10457_v22 }
 0x1f5   : > { %9123 = vmatmul.mubr.f32.gmra.mrb[14].mxu0 %v12334_v31  ;;  %v13702_v31 = vld [vmem:[#allocation31_spill] sm:$0xff] }
 0x1f6   : > { %9125 = vmatprep.mubr.f32.mxu0 %v12338_v34  ;;  %10460 = vmatpush3.bf16.msra.mxu0 %v10457_v22  ;;  %v10465_v34 = vpack.c.bf16 %v2799_v28, %v2798_v27  ;;  %v2732_v22 = vld [vmem:[#allocation2 + $0x38] sm:$0xff]  ;;  %v2735_v27 = vld [vmem:[#allocation2 + $0x60] sm:$0xff] }
 0x1f7   : > { %10462 = vmatprep.subr.bf16.mxu0 %v10461_v24 }
 0x1f9   : > { %9126 = vmatmul.mubr.f32.gmra.mrb[16].mxu0 %v12341_v35  ;;  %v2800_v35 = vld [vmem:[#allocation8 + $0x320] sm:$0xff] }
 0x1fa   : > { %9128 = vmatprep.mubr.f32.mxu0 %v12346_v37  ;;  %v2801_v37 = vld [vmem:[#allocation8 + $0x328] sm:$0xff] }
 0x1fd   : > { %9129 = vmatmul.mubr.f32.gmra.mrb[18].mxu0 %v12349_v38  ;;  %v13703_v38 = vld [vmem:[#allocation32_spill] sm:$0xff] }
 0x1fe   : > { %9131 = vmatprep.mubr.f32.mxu0 %v12354_v43  ;;  %v13704_v43 = vld [vmem:[#allocation33_spill] sm:$0xff] }
 0x201   : > { %9132 = vmatmul.mubr.f32.gmra.mrb[20].mxu0 %v12357_v44  ;;  %v10469_v44 = vpack.c.bf16 %v2801_v37, %v2800_v35  ;;  %v2737_v35 = vld [vmem:[#allocation2 + $0x78] sm:$0xff] }
 0x202   : > { %9134 = vmatprep.mubr.f32.mxu0 %v12362_v46  ;;  %v2802_v46 = vld [vmem:[#allocation8 + $0x330] sm:$0xff] }
 0x205   : > { %9135 = vmatmul.mubr.f32.gmra.mrb[22].mxu0 %v12365_v47  ;;  %v2803_v47 = vld [vmem:[#allocation8 + $0x338] sm:$0xff] }
 0x206   : > { %9137 = vmatprep.mubr.f32.mxu0 %v12370_v48  ;;  %v13705_v48 = vld [vmem:[#allocation34_spill] sm:$0xff] }
 0x209   : > { %9138 = vmatmul.mubr.f32.gmra.mrb[24].mxu0 %v12373_v49  ;;  %v13706_v49 = vld [vmem:[#allocation35_spill] sm:$0xff] }
 0x20a   : > { %9140 = vmatprep.mubr.f32.mxu0 %v12376_v50  ;;  %v10473_v50 = vpack.c.bf16 %v2803_v47, %v2802_v46  ;;  %v2739_v46 = vld [vmem:[#allocation2 + $0x90] sm:$0xff] }
 0x20d   : > { %9141 = vmatmul.mubr.f32.gmra.mrb[26].mxu0 %v12382_v52  ;;  %v2804_v52 = vld [vmem:[#allocation8 + $0x340] sm:$0xff] }
 0x20e   : > { %9143 = vmatprep.mubr.f32.mxu0 %v13699_v25  ;;  %v3171_v25 = vld [vmem:[#allocation8 + $0x3a8] sm:$0xff] }
 0x211   : > { %9144 = vmatmul.mubr.f32.gmra.mrb[28].mxu0 %v12390_v56  ;;  %v2805_v56 = vld [vmem:[#allocation8 + $0x348] sm:$0xff] }
 0x212   : > { %9146 = vmatprep.mubr.f32.mxu0 %v13700_v26  ;;  %v10477_v30 = vpack.c.bf16 %v2805_v56, %v2804_v52  ;;  %v2734_v26 = vld [vmem:[#allocation2 + $0x50] sm:$0xff]  ;;  %v2741_v52 = vld [vmem:[#allocation2 + $0xa8] sm:$0xff] }
 0x215   : > { %9147 = vmatmul.mubr.f32.gmra.mrb[30].mxu0 %v13701_v29  ;;  %v3172_v29 = vld [vmem:[#allocation8 + $0x3b0] sm:$0xff] }
 0x216   : > { %9181 = vmatprep.mubr.f32.mxu0 %v13702_v31  ;;  %v3173_v31 = vld [vmem:[#allocation8 + $0x3b8] sm:$0xff] }
 0x217   : > { %v10505_v37 = vpack.c.bf16 %v3173_v31, %v3172_v29  ;;  %v3543_v29 = vld [vmem:[#allocation8 + $0x438] sm:$0xff] }
 0x219   : > { %9182 = vmatmul.mubr.f32.vlgmr.msra.gmra.mrb[0].mxu0 %v13703_v38  ;;  %v3174_v38 = vld [vmem:[#allocation8 + $0x3c0] sm:$0xff] }
 0x21a   : > { %10464 = vmatpush3.bf16.msra.mxu0 %v10461_v24  ;;  %9184 = vmatprep.mubr.f32.mxu0 %v13704_v43  ;;  %v3170_v24 = vld [vmem:[#allocation8 + $0x3a0] sm:$0xff]  ;;  %v3175_v43 = vld [vmem:[#allocation8 + $0x3c8] sm:$0xff] }
 0x21b   : > { %10466 = vmatprep.subr.bf16.mxu0 %v10465_v34  ;;  %v10501_v28 = vpack.c.bf16 %v3171_v25, %v3170_v24  ;;  %v10509_v47 = vpack.c.bf16 %v3175_v43, %v3174_v38  ;;  %v4047_v24 = vld [vmem:[#allocation8 + $0x4a0] sm:$0xff]  ;;  %v4048_v25 = vld [vmem:[#allocation8 + $0x4a8] sm:$0xff] }
 0x21c   : > { %v12729_v31 = vpack.c.bf16 %v4048_v25, %v4047_v24  ;;  %v3107_v38 = vld [vmem:[#allocation2 + $0x79] sm:$0xff]  ;;  %v3475_v25 = vld [vmem:[#allocation2 + $0x62] sm:$0xff] }
 0x21d   : > { %9185 = vmatmul.mubr.f32.gmra.mrb[2].mxu0 %v13705_v48  ;;  %v3176_v48 = vld [vmem:[#allocation8 + $0x3d0] sm:$0xff] }
 0x21e   : > { %9187 = vmatprep.mubr.f32.mxu0 %v13706_v49  ;;  %10468 = vmatpush3.bf16.msra.mxu0 %v10465_v34  ;;  %v2736_v34 = vld [vmem:[#allocation2 + $0x68] sm:$0xff]  ;;  %v3177_v49 = vld [vmem:[#allocation8 + $0x3d8] sm:$0xff] }
 0x21f   : > { %10470 = vmatprep.subr.bf16.mxu0 %v10469_v44  ;;  %v10513_v56 = vpack.c.bf16 %v3177_v49, %v3176_v48  ;;  %v3108_v48 = vld [vmem:[#allocation2 + $0x81] sm:$0xff]  ;;  %v3474_v24 = vld [vmem:[#allocation2 + $0x52] sm:$0xff] }
 0x220   : > { %v4051_v49 = vld [vmem:[#allocation8 + $0x4c0] sm:$0xff] }
 0x221   : > { %9188 = vmatmul.mubr.f32.gmra.mrb[4].mxu0 %v13707_v11  ;;  %v3178_v11 = vld [vmem:[#allocation8 + $0x3e0] sm:$0xff] }
 0x222   : > { %9190 = vmatprep.mubr.f32.mxu0 %v13708_v36  ;;  %10472 = vmatpush3.bf16.msra.mxu0 %v10469_v44  ;;  %v2738_v44 = vld [vmem:[#allocation2 + $0x80] sm:$0xff]  ;;  %v3179_v36 = vld [vmem:[#allocation8 + $0x3e8] sm:$0xff] }
 0x223   : > { %10474 = vmatprep.subr.bf16.mxu0 %v10473_v50  ;;  %v10517_v45 = vpack.c.bf16 %v3179_v36, %v3178_v11  ;;  %v3546_v11 = vld [vmem:[#allocation8 + $0x450] sm:$0xff]  ;;  %v3547_v36 = vld [vmem:[#allocation8 + $0x458] sm:$0xff] }
 0x225   : > { %9191 = vmatmul.mubr.f32.gmra.mrb[6].mxu0 %v13709_v40  ;;  %v3180_v40 = vld [vmem:[#allocation8 + $0x3f0] sm:$0xff] }
 0x226   : > { %9193 = vmatprep.mubr.f32.mxu0 %v13710_v41  ;;  %10476 = vmatpush3.bf16.msra.mxu0 %v10473_v50  ;;  %v2740_v50 = vld [vmem:[#allocation2 + $0x98] sm:$0xff] }
 0x227   : > { %10478 = vmatprep.subr.bf16.mxu0 %v10477_v30  ;;  %v3181_v41 = vld [vmem:[#allocation8 + $0x3f8] sm:$0xff] }
 0x228   : > { %v10521_v61 = vpack.c.bf16 %v3181_v41, %v3180_v40  ;;  %v4054_v40 = vld [vmem:[#allocation8 + $0x4d8] sm:$0xff]  ;;  %v3111_v41 = vld [vmem:[#allocation2 + $0xa9] sm:$0xff] }
 0x229   : > { %9194 = vmatmul.mubr.f32.gmra.mrb[8].mxu0 %v12549_v33  ;;  %v10493_v33 = vpack.c.bf16 %v3167_v51, %v3166_v8  ;;  %v2748_v51 = vld [vmem:[#allocation2 + $0xf8] sm:$0xff] }
 0x22a   : > { %9196 = vmatprep.mubr.f32.mxu0 %v12551_v39  ;;  %10480 = vmatpush3.bf16.msra.mxu0 %v10477_v30  ;;  %v13713_v39 = vld [vmem:[#allocation42_spill] sm:$0xff]  ;;  %v2742_v30 = vld [vmem:[#allocation2 + $0xb0] sm:$0xff] }
 0x22b   : > { %10482 = vmatprep.subr.bf16.mxu0 %v10481_v53 }
 0x22d   : > { %9197 = vmatmul.mubr.f32.gmra.mrb[10].mxu0 %v12555_v42  ;;  %v13715_v42 = vld [vmem:[#allocation44_spill] sm:$0xff] }
 0x22e   : > { %9199 = vmatprep.mubr.f32.mxu0 %v12557_v58  ;;  %10484 = vmatpush3.bf16.msra.mxu0 %v10481_v53  ;;  %v13716_v58 = vld [vmem:[#allocation45_spill] sm:$0xff]  ;;  %v2744_v53 = vld [vmem:[#allocation2 + $0xc8] sm:$0xff] }
 0x22f   : > { %10486 = vmatprep.subr.bf16.mxu0 %v10485_v62 }
 0x231   : > { %9200 = vmatmul.mubr.f32.gmra.mrb[12].mxu0 %v13711_v20  ;;  %v2749_v20 = vld [vmem:[#allocation2 + $0x108] sm:$0xff] }
 0x232   : > { %9202 = vmatprep.mubr.f32.mxu0 %v13712_v55  ;;  %10488 = vmatpush3.bf16.msra.mxu0 %v10485_v62  ;;  %v3536_v62 = vld [vmem:[#allocation8 + $0x400] sm:$0xff]  ;;  %v2750_v55 = vld [vmem:[#allocation2 + $0x110] sm:$0xff] }
 0x233   : > { %10490 = vmatprep.subr.bf16.mxu0 %v10489_v5  ;;  %v10525_v8 = vpack.c.bf16 %v3537_v3, %v3536_v62  ;;  %v3112_v3 = vld [vmem:[#allocation2 + $0xb1] sm:$0xff] }
 0x235   : > { %9203 = vmatmul.mubr.f32.gmra.mrb[14].mxu0 %v13713_v39  ;;  %v2752_v39 = vld [vmem:[#allocation2 + $0x128] sm:$0xff] }
 0x236   : > { %9205 = vmatprep.mubr.f32.mxu0 %v13714_v63  ;;  %10492 = vmatpush3.bf16.msra.mxu0 %v10489_v5  ;;  %v2747_v5 = vld [vmem:[#allocation2 + $0xf0] sm:$0xff]  ;;  %v2753_v63 = vld [vmem:[#allocation2 + $0x138] sm:$0xff] }
 0x237   : > { %10494 = vmatprep.subr.bf16.mxu0 %v10493_v33 }
 0x239   : > { %9206 = vmatmul.mubr.f32.gmra.mrb[16].mxu0 %v13715_v42  ;;  %v2754_v42 = vld [vmem:[#allocation2 + $0x140] sm:$0xff] }
 0x23a   : > { %9208 = vmatprep.mubr.f32.mxu0 %v13716_v58  ;;  %v2755_v58 = vld [vmem:[#allocation2 + $0x150] sm:$0xff] }
 0x23d   : > { %9209 = vmatmul.mubr.f32.gmra.mrb[18].mxu0 %v13717_v57  ;;  %v2756_v57 = vld [vmem:[#allocation2 + $0x158] sm:$0xff] }
 0x23e   : > { %9211 = vmatprep.mubr.f32.mxu0 %v13718_v60  ;;  %v2757_v60 = vld [vmem:[#allocation2 + $0x168] sm:$0xff] }
 0x241   : > { %9212 = vmatmul.mubr.f32.gmra.mrb[20].mxu0 %v13719_v19  ;;  %v2758_v19 = vld [vmem:[#allocation2 + $0x170] sm:$0xff] }
 0x242   : > { %9214 = vmatprep.mubr.f32.mxu0 %v13720_v1  ;;  %v12718_v1 = vld [vmem:[#allocation2] sm:$0xff] }
 0x245   : > { %9215 = vmatmul.mubr.f32.gmra.mrb[22].mxu0 %v13721_v2  ;;  %v3101_v2 = vld [vmem:[#allocation2 + $0x31] sm:$0xff] }
 0x246   : > { %9217 = vmatprep.mubr.f32.mxu0 %v13722_v12  ;;  %v3538_v12 = vld [vmem:[#allocation8 + $0x410] sm:$0xff] }
 0x249   : > { %9218 = vmatmul.mubr.f32.gmra.mrb[24].mxu0 %v13723_v59  ;;  %v3539_v59 = vld [vmem:[#allocation8 + $0x418] sm:$0xff] }
 0x24a   : > { %9220 = vmatprep.mubr.f32.mxu0 %v13724_v13  ;;  %v4043_v13 = vld [vmem:[#allocation8 + $0x480] sm:$0xff]  ;;  %v10529_v21 = vpack.c.bf16 %v3539_v59, %v3538_v12  ;;  %v3125_v59 = vld [vmem:[#allocation2 + $0x151] sm:$0xff] }
 0x24b   : > { %v3124_v12 = vld [vmem:[#allocation2 + $0x141] sm:$0xff] }
 0x24d   : > { %9221 = vmatmul.mubr.f32.gmra.mrb[26].mxu0 %v13725_v14  ;;  %v4044_v14 = vld [vmem:[#allocation8 + $0x488] sm:$0xff] }
 0x24e   : > { %9223 = vmatprep.mubr.f32.mxu0 %v13726_v6  ;;  %v3102_v6 = vld [vmem:[#allocation2 + $0x39] sm:$0xff] }
 0x251   : > { %9224 = vmatmul.mubr.f32.gmra.mrb[28].mxu0 %v13727_v16  ;;  %v12722_v16 = vpack.c.bf16 %v4044_v14, %v4043_v13  ;;  %v3126_v13 = vld [vmem:[#allocation2 + $0x159] sm:$0xff]  ;;  %v3127_v14 = vld [vmem:[#allocation2 + $0x169] sm:$0xff] }
 0x252   : > { %9226 = vmatprep.mubr.f32.mxu0 %v12709_v15 }
 0x253   : > { %10877 = vmatprep.subr.bf16.mxu1 %v12722_v16 }
 0x254   : > { %10885 = vmatpush3.bf16.msra.mxu1 %v12722_v16 }
 0x255   : > { %9227 = vmatmul.mubr.f32.gmra.mrb[30].mxu0 %v12713_v7 }
 0x256   : > { %9261 = vmatprep.mubr.f32.mxu0 %v2731_v17  ;;  %v4045_v17 = vld [vmem:[#allocation8 + $0x490] sm:$0xff] }
 0x259   : > { %9262 = vmatmul.mubr.f32.vlgmr.msra.gmra.mrb[0].mxu0 %v2732_v22  ;;  %v3541_v22 = vld [vmem:[#allocation8 + $0x428] sm:$0xff] }
 0x25a   : > { %10496 = vmatpush3.bf16.msra.mxu0 %v10493_v33  ;;  %9264 = vmatprep.mubr.f32.mxu0 %v2733_v23  ;;  %v2751_v33 = vld [vmem:[#allocation2 + $0x120] sm:$0xff]  ;;  %v12725_v23 = vpack.c.bf16 %v4046_v18, %v4045_v17 }
 0x25b   : > { %10498 = vmatprep.subr.bf16.mxu0 %v10497_v10  ;;  %v11628_v17 = vld [vmem:[#allocation2 + $0x181] sm:$0xff]  ;;  %v3131_v18 = vld [vmem:[#allocation2 + $0x199] sm:$0xff] }
 0x25c   : > { %10878 = vmatprep.subr.bf16.mxu1 %v12725_v23 }
 0x25d   : > { %9265 = vmatmul.mubr.f32.gmra.mrb[2].mxu0 %v2734_v26  ;;  %v3105_v26 = vld [vmem:[#allocation2 + $0x61] sm:$0xff]  ;;  %10886 = vmatpush3.bf16.msra.mxu1 %v12725_v23 }
 0x25e   : > { %9267 = vmatprep.mubr.f32.mxu0 %v2735_v27  ;;  %10500 = vmatpush3.bf16.msra.mxu0 %v10497_v10  ;;  %v3104_v10 = vld [vmem:[#allocation2 + $0x51] sm:$0xff] }
 0x25f   : > { %10502 = vmatprep.subr.bf16.mxu0 %v10501_v28  ;;  %10879 = vmatprep.subr.bf16.mxu1 %v12729_v31 }
 0x261   : > { %9268 = vmatmul.mubr.f32.gmra.mrb[4].mxu0 %v2736_v34  ;;  %v3106_v34 = vld [vmem:[#allocation2 + $0x69] sm:$0xff]  ;;  %10887 = vmatpush3.bf16.msra.mxu1 %v12729_v31 }
 0x262   : > { %9270 = vmatprep.mubr.f32.mxu0 %v2737_v35  ;;  %10504 = vmatpush3.bf16.msra.mxu0 %v10501_v28  ;;  %v3542_v28 = vld [vmem:[#allocation8 + $0x430] sm:$0xff] }
 0x263   : > { %10506 = vmatprep.subr.bf16.mxu0 %v10505_v37  ;;  %v4049_v35 = vld [vmem:[#allocation8 + $0x4b0] sm:$0xff]  ;;  %v10537_v43 = vpack.c.bf16 %v3543_v29, %v3542_v28  ;;  %v3478_v28 = vld [vmem:[#allocation2 + $0x82] sm:$0xff] }
 0x264   : > { %v3479_v29 = vld [vmem:[#allocation2 + $0x92] sm:$0xff] }
 0x265   : > { %9271 = vmatmul.mubr.f32.gmra.mrb[6].mxu0 %v2738_v44  ;;  %v3544_v44 = vld [vmem:[#allocation8 + $0x440] sm:$0xff] }
 0x266   : > { %9273 = vmatprep.mubr.f32.mxu0 %v2739_v46  ;;  %10508 = vmatpush3.bf16.msra.mxu0 %v10505_v37  ;;  %v4050_v37 = vld [vmem:[#allocation8 + $0x4b8] sm:$0xff]  ;;  %v3545_v46 = vld [vmem:[#allocation8 + $0x448] sm:$0xff] }
 0x267   : > { %10510 = vmatprep.subr.bf16.mxu0 %v10509_v47 }
 0x269   : > { %9274 = vmatmul.mubr.f32.gmra.mrb[8].mxu0 %v2740_v50  ;;  %v4052_v50 = vld [vmem:[#allocation8 + $0x4c8] sm:$0xff] }
 0x26a   : > { %9276 = vmatprep.mubr.f32.mxu0 %v2741_v52  ;;  %10512 = vmatpush3.bf16.msra.mxu0 %v10509_v47  ;;  %v12733_v47 = vpack.c.bf16 %v4050_v37, %v4049_v35  ;;  %v3109_v52 = vld [vmem:[#allocation2 + $0x91] sm:$0xff]  ;;  %v3483_v35 = vld [vmem:[#allocation2 + $0xc2] sm:$0xff]  ;;  %v3485_v37 = vld [vmem:[#allocation2 + $0xda] sm:$0xff] }
 0x26b   : > { %10514 = vmatprep.subr.bf16.mxu0 %v10513_v56 }
 0x26c   : > { %10880 = vmatprep.subr.bf16.mxu1 %v12733_v47 }
 0x26d   : > { %9277 = vmatmul.mubr.f32.gmra.mrb[10].mxu0 %v2742_v30  ;;  %v12737_v30 = vpack.c.bf16 %v4052_v50, %v4051_v49  ;;  %10888 = vmatpush3.bf16.msra.mxu1 %v12733_v47  ;;  %v3492_v49 = vld [vmem:[#allocation2 + $0x12a] sm:$0xff]  ;;  %v3493_v50 = vld [vmem:[#allocation2 + $0x13a] sm:$0xff] }
 0x26e   : > { %9279 = vmatprep.mubr.f32.mxu0 %v2743_v32  ;;  %10516 = vmatpush3.bf16.msra.mxu0 %v10513_v56  ;;  %v10541_v56 = vpack.c.bf16 %v3545_v46, %v3544_v44  ;;  %v3110_v32 = vld [vmem:[#allocation2 + $0x99] sm:$0xff]  ;;  %v3489_v46 = vld [vmem:[#allocation2 + $0x10a] sm:$0xff] }
 0x26f   : > { %10518 = vmatprep.subr.bf16.mxu0 %v10517_v45  ;;  %10881 = vmatprep.subr.bf16.mxu1 %v12737_v30  ;;  %v3488_v44 = vld [vmem:[#allocation2 + $0xfa] sm:$0xff] }
 0x271   : > { %9280 = vmatmul.mubr.f32.gmra.mrb[12].mxu0 %v2744_v53  ;;  %v10545_v53 = vpack.c.bf16 %v3547_v36, %v3546_v11  ;;  %10889 = vmatpush3.bf16.msra.mxu1 %v12737_v30  ;;  %v3496_v11 = vld [vmem:[#allocation2 + $0x15a] sm:$0xff]  ;;  %v3497_v36 = vld [vmem:[#allocation2 + $0x16a] sm:$0xff] }
 0x272   : > { %9282 = vmatprep.mubr.f32.mxu0 %v2745_v54  ;;  %10520 = vmatpush3.bf16.msra.mxu0 %v10517_v45  ;;  %v4053_v45 = vld [vmem:[#allocation8 + $0x4d0] sm:$0xff]  ;;  %v3548_v54 = vld [vmem:[#allocation8 + $0x460] sm:$0xff] }
 0x273   : > { %10522 = vmatprep.subr.bf16.mxu0 %v10521_v61  ;;  %v12741_v62 = vpack.c.bf16 %v4054_v40, %v4053_v45  ;;  %v3502_v45 = vld [vmem:[#allocation2 + $0x1a2] sm:$0xff] }
 0x274   : > { %v4055_v40 = vld [vmem:[#allocation8 + $0x4e0] sm:$0xff] }
 0x275   : > { %9283 = vmatmul.mubr.f32.gmra.mrb[14].mxu0 %v2746_v4  ;;  %v3113_v4 = vld [vmem:[#allocation2 + $0xc1] sm:$0xff]  ;;  %10882 = vmatprep.subr.bf16.mxu1 %v12741_v62 }
 0x276   : > { %9285 = vmatprep.mubr.f32.mxu0 %v2747_v5  ;;  %10524 = vmatpush3.bf16.msra.mxu0 %v10521_v61  ;;  %v3549_v61 = vld [vmem:[#allocation8 + $0x468] sm:$0xff] }
 0x277   : > { %10526 = vmatprep.subr.bf16.mxu0 %v10525_v8  ;;  %v10549_v5 = vpack.c.bf16 %v3549_v61, %v3548_v54  ;;  %10890 = vmatpush3.bf16.msra.mxu1 %v12741_v62  ;;  %v4057_v54 = vld [vmem:[#allocation8 + $0x4f0] sm:$0xff]  ;;  %v4058_v61 = vld [vmem:[#allocation8 + $0x4f8] sm:$0xff] }
 0x279   : > { %9286 = vmatmul.mubr.f32.gmra.mrb[16].mxu0 %v2748_v51  ;;  %v3551_v51 = vld [vmem:[#allocation8 + $0x478] sm:$0xff] }
 0x27a   : > { %9288 = vmatprep.mubr.f32.mxu0 %v2749_v20  ;;  %v3114_v20 = vld [vmem:[#allocation2 + $0xc9] sm:$0xff] }
 0x27d   : > { %9289 = vmatmul.mubr.f32.gmra.mrb[18].mxu0 %v2750_v55  ;;  %v3115_v55 = vld [vmem:[#allocation2 + $0xd9] sm:$0xff] }
 0x27e   : > { %9291 = vmatprep.mubr.f32.mxu0 %v2751_v33 }
 0x281   : > { %9292 = vmatmul.mubr.f32.gmra.mrb[20].mxu0 %v2752_v39  ;;  %v3116_v39 = vld [vmem:[#allocation2 + $0xe1] sm:$0xff] }
 0x282   : > { %9294 = vmatprep.mubr.f32.mxu0 %v2753_v63  ;;  %v3117_v63 = vld [vmem:[#allocation2 + $0xf1] sm:$0xff] }
 0x285   : > { %9295 = vmatmul.mubr.f32.gmra.mrb[22].mxu0 %v2754_v42  ;;  %v3118_v42 = vld [vmem:[#allocation2 + $0xf9] sm:$0xff] }
 0x286   : > { %9297 = vmatprep.mubr.f32.mxu0 %v2755_v58  ;;  %v3119_v58 = vld [vmem:[#allocation2 + $0x109] sm:$0xff] }
 0x289   : > { %9298 = vmatmul.mubr.f32.gmra.mrb[24].mxu0 %v2756_v57  ;;  %v3120_v57 = vld [vmem:[#allocation2 + $0x111] sm:$0xff] }
 0x28a   : > { %9300 = vmatprep.mubr.f32.mxu0 %v2757_v60  ;;  %v3121_v60 = vld [vmem:[#allocation2 + $0x121] sm:$0xff] }
 0x28d   : > { %9301 = vmatmul.mubr.f32.gmra.mrb[26].mxu0 %v2758_v19  ;;  %v3122_v19 = vld [vmem:[#allocation2 + $0x129] sm:$0xff] }
 0x28e   : > { %9303 = vmatprep.mubr.f32.mxu0 %v12641_v0  ;;  %v3103_v0 = vld [vmem:[#allocation2 + $0x49] sm:$0xff] }
 0x291   : > { %9304 = vmatmul.mubr.f32.gmra.mrb[28].mxu0 %v12645_v9  ;;  %v3540_v9 = vld [vmem:[#allocation8 + $0x420] sm:$0xff] }
 0x292   : > { %9306 = vmatprep.mubr.f32.mxu0 %v12718_v1  ;;  %v10533_v27 = vpack.c.bf16 %v3541_v22, %v3540_v9  ;;  %v3471_v9 = vld [vmem:[#allocation2 + $0x32] sm:$0xff]  ;;  %v3472_v22 = vld [vmem:[#allocation2 + $0x3a] sm:$0xff] }
 0x295   : > { %9307 = vmatmul.mubr.f32.gmra.mrb[30].mxu0 %v12718_v1 }
 0x296   : > { %9341 = vmatprep.mubr.f32.mxu0 %v3101_v2  ;;  %v3123_v2 = vld [vmem:[#allocation2 + $0x139] sm:$0xff] }
 0x299   : > { %9342 = vmatmul.mubr.f32.vlgmr.msra.gmra.mrb[0].mxu0 %v3102_v6  ;;  %v3128_v6 = vld [vmem:[#allocation2 + $0x171] sm:$0xff] }
 0x29a   : > { %10528 = vmatpush3.bf16.msra.mxu0 %v10525_v8  ;;  %9344 = vmatprep.mubr.f32.mxu0 %v3103_v0  ;;  %v3550_v8 = vld [vmem:[#allocation8 + $0x470] sm:$0xff] }
 0x29b   : > { %10530 = vmatprep.subr.bf16.mxu0 %v10529_v21  ;;  %v10553_v33 = vpack.c.bf16 %v3551_v51, %v3550_v8  ;;  %v11629_v0 = vld [vmem:[#allocation2 + $0x189] sm:$0xff] }
 0x29d   : > { %9345 = vmatmul.mubr.f32.gmra.mrb[2].mxu0 %v3104_v10  ;;  %v3473_v10 = vld [vmem:[#allocation2 + $0x4a] sm:$0xff] }
 0x29e   : > { %9347 = vmatprep.mubr.f32.mxu0 %v3105_v26  ;;  %10532 = vmatpush3.bf16.msra.mxu0 %v10529_v21  ;;  %v3132_v21 = vld [vmem:[#allocation2 + $0x1a1] sm:$0xff]  ;;  %v3476_v26 = vld [vmem:[#allocation2 + $0x6a] sm:$0xff] }
 0x29f   : > { %10534 = vmatprep.subr.bf16.mxu0 %v10533_v27 }
 0x2a1   : > { %9348 = vmatmul.mubr.f32.gmra.mrb[4].mxu0 %v3106_v34  ;;  %v3481_v34 = vld [vmem:[#allocation2 + $0xaa] sm:$0xff] }
 0x2a2   : > { %9350 = vmatprep.mubr.f32.mxu0 %v3107_v38  ;;  %10536 = vmatpush3.bf16.msra.mxu0 %v10533_v27  ;;  %v3477_v27 = vld [vmem:[#allocation2 + $0x7a] sm:$0xff]  ;;  %v3486_v38 = vld [vmem:[#allocation2 + $0xe2] sm:$0xff] }
 0x2a3   : > { %10538 = vmatprep.subr.bf16.mxu0 %v10537_v43 }
 0x2a5   : > { %9351 = vmatmul.mubr.f32.gmra.mrb[6].mxu0 %v3108_v48  ;;  %v3491_v48 = vld [vmem:[#allocation2 + $0x122] sm:$0xff] }
 0x2a6   : > { %9353 = vmatprep.mubr.f32.mxu0 %v3109_v52  ;;  %10540 = vmatpush3.bf16.msra.mxu0 %v10537_v43  ;;  %v3487_v43 = vld [vmem:[#allocation2 + $0xf2] sm:$0xff]  ;;  %v3494_v52 = vld [vmem:[#allocation2 + $0x142] sm:$0xff] }
 0x2a7   : > { %10542 = vmatprep.subr.bf16.mxu0 %v10541_v56 }
 0x2a9   : > { %9354 = vmatmul.mubr.f32.gmra.mrb[8].mxu0 %v3110_v32  ;;  %v3501_v32 = vld [vmem:[#allocation2 + $0x19a] sm:$0xff] }
 0x2aa   : > { %9356 = vmatprep.mubr.f32.mxu0 %v3111_v41  ;;  %10544 = vmatpush3.bf16.msra.mxu0 %v10541_v56  ;;  %v3495_v56 = vld [vmem:[#allocation2 + $0x152] sm:$0xff]  ;;  %v4056_v41 = vld [vmem:[#allocation8 + $0x4e8] sm:$0xff] }
 0x2ab   : > { %10546 = vmatprep.subr.bf16.mxu0 %v10545_v53 }
 0x2ad   : > { %9357 = vmatmul.mubr.f32.gmra.mrb[10].mxu0 %v3112_v3 }
 0x2ae   : > { %9359 = vmatprep.mubr.f32.mxu0 %v3113_v4  ;;  %10548 = vmatpush3.bf16.msra.mxu0 %v10545_v53  ;;  %v10581_v53 = vpack.c.bf16 %v4056_v41, %v4055_v40  ;;  %v12765_v4 = vld [vmem:[#allocation10] ss:$0 sm:$0xff] }
 0x2af   : > { %10550 = vmatprep.subr.bf16.mxu0 %v10549_v5 }
 0x2b0   : > { %10883 = vmatprep.subr.bf16.mxu1 %v10581_v53 }
 0x2b1   : > { %9360 = vmatmul.mubr.f32.gmra.mrb[12].mxu0 %v3114_v20  ;;  %10891 = vmatpush3.bf16.msra.mxu1 %v10581_v53 }
 0x2b2   : > { %9362 = vmatprep.mubr.f32.mxu0 %v3115_v55  ;;  %10552 = vmatpush3.bf16.msra.mxu0 %v10549_v5 }
 0x2b3   : > { %10554 = vmatprep.subr.bf16.mxu0 %v10553_v33 }
 0x2b5   : > { %9363 = vmatmul.mubr.f32.gmra.mrb[14].mxu0 %v3116_v39 }
 0x2b6   : > { %9365 = vmatprep.mubr.f32.mxu0 %v3117_v63  ;;  %10556 = vmatpush3.bf16.msra.mxu0 %v10553_v33 }
 0x2b7   : > { %10558 = vmatprep.subr.bf16.mxu0 %v12722_v16 }
 0x2b9   : > { %9366 = vmatmul.mubr.f32.gmra.mrb[16].mxu0 %v3118_v42 }
 0x2ba   : > { %9368 = vmatprep.mubr.f32.mxu0 %v3119_v58 }
 0x2bd   : > { %9369 = vmatmul.mubr.f32.gmra.mrb[18].mxu0 %v3120_v57 }
 0x2be   : > { %9371 = vmatprep.mubr.f32.mxu0 %v3121_v60 }
 0x2c1   : > { %9372 = vmatmul.mubr.f32.gmra.mrb[20].mxu0 %v3122_v19 }
 0x2c2   : > { %9374 = vmatprep.mubr.f32.mxu0 %v3123_v2 }
 0x2c5   : > { %9375 = vmatmul.mubr.f32.gmra.mrb[22].mxu0 %v3124_v12 }
 0x2c6   : > { %9377 = vmatprep.mubr.f32.mxu0 %v3125_v59 }
 0x2c9   : > { %9378 = vmatmul.mubr.f32.gmra.mrb[24].mxu0 %v3126_v13 }
 0x2ca   : > { %9380 = vmatprep.mubr.f32.mxu0 %v3127_v14 }
 0x2cd   : > { %9381 = vmatmul.mubr.f32.gmra.mrb[26].mxu0 %v3128_v6 }
 0x2ce   : > { %9383 = vmatprep.mubr.f32.mxu0 %v11628_v17 }
 0x2d1   : > { %9384 = vmatmul.mubr.f32.gmra.mrb[28].mxu0 %v11629_v0 }
 0x2d2   : > { %9386 = vmatprep.mubr.f32.mxu0 %v3131_v18 }
 0x2d5   : > { %9387 = vmatmul.mubr.f32.gmra.mrb[30].mxu0 %v3132_v21 }
 0x2d6   : > { %9421 = vmatprep.mubr.f32.mxu0 %v3471_v9 }
 0x2d9   : > { %9422 = vmatmul.mubr.f32.vlgmr.msra.gmra.mrb[0].mxu0 %v3472_v22 }
 0x2da   : > { %9424 = vmatprep.mubr.f32.mxu0 %v3473_v10  ;;  %10560 = vmatpush3.bf16.msra.mxu0 %v12722_v16  ;;  %v3480_v16 = vld [vmem:[#allocation2 + $0x9a] sm:$0xff] }
 0x2db   : > { %10562 = vmatprep.subr.bf16.mxu0 %v12725_v23 }
 0x2dd   : > { %9425 = vmatmul.mubr.f32.gmra.mrb[2].mxu0 %v3474_v24 }
 0x2de   : > { %9427 = vmatprep.mubr.f32.mxu0 %v3475_v25  ;;  %10564 = vmatpush3.bf16.msra.mxu0 %v12725_v23  ;;  %v3482_v23 = vld [vmem:[#allocation2 + $0xb2] sm:$0xff] }
 0x2df   : > { %10566 = vmatprep.subr.bf16.mxu0 %v12729_v31 }
 0x2e1   : > { %9428 = vmatmul.mubr.f32.gmra.mrb[4].mxu0 %v3476_v26 }
 0x2e2   : > { %9430 = vmatprep.mubr.f32.mxu0 %v3477_v27  ;;  %10568 = vmatpush3.bf16.msra.mxu0 %v12729_v31  ;;  %v3484_v31 = vld [vmem:[#allocation2 + $0xca] sm:$0xff] }
 0x2e3   : > { %10570 = vmatprep.subr.bf16.mxu0 %v12733_v47 }
 0x2e5   : > { %9431 = vmatmul.mubr.f32.gmra.mrb[6].mxu0 %v3478_v28 }
 0x2e6   : > { %9433 = vmatprep.mubr.f32.mxu0 %v3479_v29  ;;  %10572 = vmatpush3.bf16.msra.mxu0 %v12733_v47  ;;  %v3490_v47 = vld [vmem:[#allocation2 + $0x112] sm:$0xff] }
 0x2e7   : > { %10574 = vmatprep.subr.bf16.mxu0 %v12737_v30 }
 0x2e9   : > { %9434 = vmatmul.mubr.f32.gmra.mrb[8].mxu0 %v3480_v16 }
 0x2ea   : > { %9436 = vmatprep.mubr.f32.mxu0 %v3481_v34  ;;  %10576 = vmatpush3.bf16.msra.mxu0 %v12737_v30  ;;  %v3498_v30 = vld [vmem:[#allocation2 + $0x172] sm:$0xff] }
 0x2eb   : > { %10578 = vmatprep.subr.bf16.mxu0 %v12741_v62 }
 0x2ed   : > { %9437 = vmatmul.mubr.f32.gmra.mrb[10].mxu0 %v3482_v23 }
 0x2ee   : > { %9439 = vmatprep.mubr.f32.mxu0 %v3483_v35  ;;  %10580 = vmatpush3.bf16.msra.mxu0 %v12741_v62  ;;  %v10585_v62 = vpack.c.bf16 %v4058_v61, %v4057_v54 }
 0x2ef   : > { %10582 = vmatprep.subr.bf16.mxu0 %v10581_v53 }
 0x2f0   : > { %10884 = vmatprep.subr.bf16.mxu1 %v10585_v62 }
 0x2f1   : > { %9440 = vmatmul.mubr.f32.gmra.mrb[12].mxu0 %v3484_v31  ;;  %10892 = vmatpush3.bf16.msra.mxu1 %v10585_v62 }
 0x2f2   : > { %9442 = vmatprep.mubr.f32.mxu0 %v3485_v37  ;;  %10584 = vmatpush3.bf16.msra.mxu0 %v10581_v53 }
 0x2f3   : > { %10586 = vmatprep.subr.bf16.mxu0 %v10585_v62 }
 0x2f5   : > { %9443 = vmatmul.mubr.f32.gmra.mrb[14].mxu0 %v3486_v38 }
 0x2f6   : > { %9445 = vmatprep.mubr.f32.mxu0 %v3487_v43  ;;  %10588 = vmatpush3.bf16.msra.mxu0 %v10585_v62 }
 0x2f9   : > { %9446 = vmatmul.mubr.f32.gmra.mrb[16].mxu0 %v3488_v44 }
 0x2fa   : > { %9448 = vmatprep.mubr.f32.mxu0 %v3489_v46 }
 0x2fd   : > { %9449 = vmatmul.mubr.f32.gmra.mrb[18].mxu0 %v3490_v47 }
 0x2fe   : > { %9451 = vmatprep.mubr.f32.mxu0 %v3491_v48 }
 0x301   : > { %9452 = vmatmul.mubr.f32.gmra.mrb[20].mxu0 %v3492_v49 }
 0x302   : > { %9454 = vmatprep.mubr.f32.mxu0 %v3493_v50 }
 0x305   : > { %9455 = vmatmul.mubr.f32.gmra.mrb[22].mxu0 %v3494_v52 }
 0x306   : > { %9457 = vmatprep.mubr.f32.mxu0 %v3495_v56 }
 0x309   : > { %9458 = vmatmul.mubr.f32.gmra.mrb[24].mxu0 %v3496_v11 }
 0x30a   : > { %9460 = vmatprep.mubr.f32.mxu0 %v3497_v36 }
 0x30d   : > { %9461 = vmatmul.mubr.f32.gmra.mrb[26].mxu0 %v3498_v30 }
 0x30e   : > { %9463 = vmatprep.mubr.f32.mxu0 %v12709_v15  ;;  %v4413_v15 = vld [vmem:[#allocation8 + $0x500] sm:$0xff] }
 0x311   : > { %9464 = vmatmul.mubr.f32.gmra.mrb[28].mxu0 %v12713_v7  ;;  %v4414_v7 = vld [vmem:[#allocation8 + $0x508] sm:$0xff] }
 0x312   : > { %9466 = vmatprep.mubr.f32.mxu0 %v3501_v32  ;;  %v12762_v3 = vpack.c.bf16 %v4414_v7, %v4413_v15 }
 0x314   : > { %10590 = vmatprep.subr.bf16.mxu1 %v12762_v3 }
 0x315   : > { %9467 = vmatmul.mubr.f32.gmra.mrb[30].mxu0 %v3502_v45 }
 0x316   : > { %9501 = vmatprep.mubr.f32.mxu0 %v12718_v1 }
 0x319   : > { %9502 = vmatmul.mubr.f32.vlgmr.msra.gmra.mrb[32].mxu0 %v12718_v1 }
 0x3ac   : > { %v9423_v5 = vpop.f32.mrb[0].mxu0 }
 0x3ad   : > { %v12768_v8 = vadd.f32 %v9423_v5, %v12765_v4  ;;  %v3618_v51 = vpop.f32.mrb[1].mxu0 }
 0x3ae   : > { %v12771_v20 = vadd.f32 %v12765_v4, %v3618_v51 }
 0x3af   : > { %v13617_v55 = vmax.f32 %v12768_v8, 0.0 }
 0x3b0   : > { %v13618_v1 = vmax.f32 %v12771_v20, 0.0  ;;  %v9426_v33 = vpop.f32.mrb[2].mxu0 }
 0x3b1   : > { %3907 = vst [vmem:[#allocation3 + $0x21] sm:$0xff] %v13617_v55  ;;  %v12778_v39 = vadd.f32 %v9426_v33, %v12765_v4  ;;  %v3628_v63 = vpop.f32.mrb[3].mxu0 }
 0x3b2   : > { %3906 = vst [vmem:[#allocation3 + $0x19] sm:$0xff] %v13618_v1  ;;  %v12783_v42 = vadd.f32 %v12765_v4, %v3628_v63  ;;  %v4426_v1 = vld [vmem:[#allocation8 + $0x568] sm:$0xff] }
 0x3b3   : > { %v13615_v58 = vmax.f32 %v12778_v39, 0.0 }
 0x3b4   : > { %v13616_v57 = vmax.f32 %v12783_v42, 0.0  ;;  %v9429_v60 = vpop.f32.mrb[4].mxu0 }
 0x3b5   : > { %3909 = vst [vmem:[#allocation3 + $0x39] sm:$0xff] %v13615_v58  ;;  %v12790_v19 = vadd.f32 %v9429_v60, %v12765_v4  ;;  %v3638_v2 = vpop.f32.mrb[5].mxu0 }
 0x3b6   : > { %3908 = vst [vmem:[#allocation3 + $0x31] sm:$0xff] %v13616_v57  ;;  %v12795_v12 = vadd.f32 %v12765_v4, %v3638_v2 }
 0x3b7   : > { %v13613_v59 = vmax.f32 %v12790_v19, 0.0 }
 0x3b8   : > { %v13614_v13 = vmax.f32 %v12795_v12, 0.0  ;;  %v9432_v14 = vpop.f32.mrb[6].mxu0 }
 0x3b9   : > { %3911 = vst [vmem:[#allocation3 + $0x51] sm:$0xff] %v13613_v59  ;;  %v12802_v6 = vadd.f32 %v9432_v14, %v12765_v4  ;;  %v3648_v17 = vpop.f32.mrb[7].mxu0  ;;  %v12804_v18 = vld [vmem:[#allocation3 + $0x18] sm:$0xff]  ;;  %v12806_v0 = vld [vmem:[#allocation3 + $0x20] sm:$0xff] }
 0x3ba   : > { %3910 = vst [vmem:[#allocation3 + $0x49] sm:$0xff] %v13614_v13  ;;  %v12811_v21 = vadd.f32 %v12765_v4, %v3648_v17  ;;  %9504 = vmatprep.mubr.f32.mxu0 %v12804_v18  ;;  %v4424_v13 = vld [vmem:[#allocation8 + $0x558] sm:$0xff] }
 0x3bb   : > { %v13609_v9 = vmax.f32 %v12802_v6, 0.0  ;;  %9505 = vmatmul.mubr.f32.gmra.mrb[34].mxu0 %v12806_v0 }
 0x3bc   : > { %v13610_v22 = vmax.f32 %v12811_v21, 0.0  ;;  %v9435_v10 = vpop.f32.mrb[8].mxu0 }
 0x3bd   : > { %3913 = vst [vmem:[#allocation3 + $0x69] sm:$0xff] %v13609_v9  ;;  %v12820_v24 = vadd.f32 %v9435_v10, %v12765_v4  ;;  %v3658_v25 = vpop.f32.mrb[9].mxu0  ;;  %v12822_v26 = vld [vmem:[#allocation3 + $0x30] sm:$0xff]  ;;  %v12824_v27 = vld [vmem:[#allocation3 + $0x38] sm:$0xff] }
 0x3be   : > { %3912 = vst [vmem:[#allocation3 + $0x61] sm:$0xff] %v13610_v22  ;;  %v12829_v28 = vadd.f32 %v12765_v4, %v3658_v25  ;;  %9507 = vmatprep.mubr.f32.mxu0 %v12822_v26  ;;  %v4422_v9 = vld [vmem:[#allocation8 + $0x548] sm:$0xff] }
 0x3bf   : > { %v13607_v29 = vmax.f32 %v12820_v24, 0.0  ;;  %9508 = vmatmul.mubr.f32.gmra.mrb[36].mxu0 %v12824_v27 }
 0x3c0   : > { %v13608_v16 = vmax.f32 %v12829_v28, 0.0  ;;  %v9438_v34 = vpop.f32.mrb[10].mxu0 }
 0x3c1   : > { %3915 = vst [vmem:[#allocation3 + $0x81] sm:$0xff] %v13607_v29  ;;  %v12838_v23 = vadd.f32 %v9438_v34, %v12765_v4  ;;  %v3668_v35 = vpop.f32.mrb[11].mxu0  ;;  %v12840_v31 = vld [vmem:[#allocation3 + $0x48] sm:$0xff]  ;;  %v12842_v37 = vld [vmem:[#allocation3 + $0x50] sm:$0xff]  ;;  %v4415_v34 = vld [vmem:[#allocation8 + $0x510] sm:$0xff] }
 0x3c2   : > { %3914 = vst [vmem:[#allocation3 + $0x79] sm:$0xff] %v13608_v16  ;;  %v12847_v38 = vadd.f32 %v12765_v4, %v3668_v35  ;;  %9510 = vmatprep.mubr.f32.mxu0 %v12840_v31  ;;  %v4416_v35 = vld [vmem:[#allocation8 + $0x518] sm:$0xff] }
 0x3c3   : > { %v13604_v43 = vmax.f32 %v12838_v23, 0.0  ;;  %9511 = vmatmul.mubr.f32.gmra.mrb[38].mxu0 %v12842_v37 }
 0x3c4   : > { %v13605_v44 = vmax.f32 %v12847_v38, 0.0  ;;  %v9441_v46 = vpop.f32.mrb[12].mxu0 }
 0x3c5   : > { %3917 = vst [vmem:[#allocation3 + $0x99] sm:$0xff] %v13604_v43  ;;  %v12856_v47 = vadd.f32 %v9441_v46, %v12765_v4  ;;  %v3678_v48 = vpop.f32.mrb[13].mxu0  ;;  %v12858_v49 = vld [vmem:[#allocation3 + $0x60] sm:$0xff]  ;;  %v12860_v50 = vld [vmem:[#allocation3 + $0x68] sm:$0xff] }
 0x3c6   : > { %3916 = vst [vmem:[#allocation3 + $0x91] sm:$0xff] %v13605_v44  ;;  %v12865_v52 = vadd.f32 %v12765_v4, %v3678_v48  ;;  %9513 = vmatprep.mubr.f32.mxu0 %v12858_v49 }
 0x3c7   : > { %v13601_v56 = vmax.f32 %v12856_v47, 0.0  ;;  %9514 = vmatmul.mubr.f32.gmra.mrb[40].mxu0 %v12860_v50 }
 0x3c8   : > { %v13602_v11 = vmax.f32 %v12865_v52, 0.0  ;;  %v9444_v36 = vpop.f32.mrb[14].mxu0 }
 0x3c9   : > { %3919 = vst [vmem:[#allocation3 + $0xb1] sm:$0xff] %v13601_v56  ;;  %v12874_v30 = vadd.f32 %v9444_v36, %v12765_v4  ;;  %v3688_v32 = vpop.f32.mrb[15].mxu0  ;;  %v12876_v45 = vld [vmem:[#allocation3 + $0x78] sm:$0xff]  ;;  %v12878_v40 = vld [vmem:[#allocation3 + $0x80] sm:$0xff] }
 0x3ca   : > { %3918 = vst [vmem:[#allocation3 + $0xa9] sm:$0xff] %v13602_v11  ;;  %v12883_v41 = vadd.f32 %v12765_v4, %v3688_v32  ;;  %9516 = vmatprep.mubr.f32.mxu0 %v12876_v45 }
 0x3cb   : > { %v13597_v53 = vmax.f32 %v12874_v30, 0.0  ;;  %9517 = vmatmul.mubr.f32.gmra.mrb[42].mxu0 %v12878_v40 }
 0x3cc   : > { %v13599_v54 = vmax.f32 %v12883_v41, 0.0  ;;  %v9447_v61 = vpop.f32.mrb[16].mxu0 }
 0x3cd   : > { %3921 = vst [vmem:[#allocation3 + $0xc9] sm:$0xff] %v13597_v53  ;;  %v12892_v62 = vadd.f32 %v9447_v61, %v12765_v4  ;;  %v3698_v15 = vpop.f32.mrb[17].mxu0  ;;  %v12894_v7 = vld [vmem:[#allocation3 + $0x90] sm:$0xff]  ;;  %v12896_v5 = vld [vmem:[#allocation3 + $0x98] sm:$0xff] }
 0x3ce   : > { %3920 = vst [vmem:[#allocation3 + $0xc1] sm:$0xff] %v13599_v54  ;;  %v12901_v51 = vadd.f32 %v12765_v4, %v3698_v15  ;;  %9519 = vmatprep.mubr.f32.mxu0 %v12894_v7  ;;  %v4418_v53 = vld [vmem:[#allocation8 + $0x528] sm:$0xff] }
 0x3cf   : > { %v13595_v33 = vmax.f32 %v12892_v62, 0.0  ;;  %9520 = vmatmul.mubr.f32.gmra.mrb[44].mxu0 %v12896_v5 }
 0x3d0   : > { %v13596_v63 = vmax.f32 %v12901_v51, 0.0  ;;  %v9450_v60 = vpop.f32.mrb[18].mxu0 }
 0x3d1   : > { %3923 = vst [vmem:[#allocation3 + $0xe1] sm:$0xff] %v13595_v33  ;;  %v12910_v2 = vadd.f32 %v9450_v60, %v12765_v4  ;;  %v3708_v14 = vpop.f32.mrb[19].mxu0  ;;  %v12912_v17 = vld [vmem:[#allocation3 + $0xa8] sm:$0xff]  ;;  %v12914_v10 = vld [vmem:[#allocation3 + $0xb0] sm:$0xff] }
 0x3d2   : > { %3922 = vst [vmem:[#allocation3 + $0xd9] sm:$0xff] %v13596_v63  ;;  %v12919_v25 = vadd.f32 %v12765_v4, %v3708_v14  ;;  %9522 = vmatprep.mubr.f32.mxu0 %v12912_v17  ;;  %v10593_v14 = vpack.c.bf16 %v4416_v35, %v4415_v34  ;;  %v4417_v63 = vld [vmem:[#allocation8 + $0x520] sm:$0xff] }
 0x3d3   : > { %v13598_v46 = vmax.f32 %v12910_v2, 0.0  ;;  %9523 = vmatmul.mubr.f32.gmra.mrb[46].mxu0 %v12914_v10  ;;  %v10597_v56 = vpack.c.bf16 %v4418_v53, %v4417_v63 }
 0x3d4   : > { %v13600_v48 = vmax.f32 %v12919_v25, 0.0  ;;  %v9453_v36 = vpop.f32.mrb[20].mxu0 }
 0x3d5   : > { %3925 = vst [vmem:[#allocation3 + $0xf9] sm:$0xff] %v13598_v46  ;;  %v12928_v32 = vadd.f32 %v9453_v36, %v12765_v4  ;;  %v3718_v61 = vpop.f32.mrb[21].mxu0  ;;  %v12930_v15 = vld [vmem:[#allocation3 + $0xc0] sm:$0xff]  ;;  %v12932_v60 = vld [vmem:[#allocation3 + $0xc8] sm:$0xff] }
 0x3d6   : > { %3924 = vst [vmem:[#allocation3 + $0xf1] sm:$0xff] %v13600_v48  ;;  %v12937_v33 = vadd.f32 %v12765_v4, %v3718_v61  ;;  %9525 = vmatprep.mubr.f32.mxu1 %v12930_v15 }
 0x3d7   : > { %v13603_v46 = vmax.f32 %v12928_v32, 0.0  ;;  %9526 = vmatmul.mubr.f32.vlgmr.msra.gmra.mrb[0].mxu1 %v12932_v60 }
 0x3d8   : > { %v13606_v36 = vmax.f32 %v12937_v33, 0.0  ;;  %v9456_v54 = vpop.f32.mrb[22].mxu0  ;;  %10592 = vmatpush3.bf16.msra.mxu1 %v12762_v3  ;;  %v4419_v3 = vld [vmem:[#allocation8 + $0x530] sm:$0xff] }
 0x3d9   : > { %3927 = vst [vmem:[#allocation3 + $0x111] sm:$0xff] %v13603_v46  ;;  %v12947_v34 = vadd.f32 %v9456_v54, %v12765_v4  ;;  %v3728_v35 = vpop.f32.mrb[23].mxu0  ;;  %v12949_v61 = vld [vmem:[#allocation3 + $0xd8] sm:$0xff]  ;;  %v12951_v48 = vld [vmem:[#allocation3 + $0xe0] sm:$0xff]  ;;  %10594 = vmatprep.subr.bf16.mxu1 %v10593_v14  ;;  %v4420_v46 = vld [vmem:[#allocation8 + $0x538] sm:$0xff] }
 0x3da   : > { %3926 = vst [vmem:[#allocation3 + $0x109] sm:$0xff] %v13606_v36  ;;  %v12956_v11 = vadd.f32 %v12765_v4, %v3728_v35  ;;  %9528 = vmatprep.mubr.f32.mxu1 %v12949_v61  ;;  %v10601_v29 = vpack.c.bf16 %v4420_v46, %v4419_v3 }
 0x3db   : > { %v13611_v54 = vmax.f32 %v12947_v34, 0.0  ;;  %9529 = vmatmul.mubr.f32.gmra.mrb[2].mxu1 %v12951_v48 }
 0x3dc   : > { %v13612_v43 = vmax.f32 %v12956_v11, 0.0  ;;  %v9459_v44 = vpop.f32.mrb[24].mxu0  ;;  %10596 = vmatpush3.bf16.msra.mxu1 %v10593_v14  ;;  %v4421_v14 = vld [vmem:[#allocation8 + $0x540] sm:$0xff] }
 0x3dd   : > { %3929 = vst [vmem:[#allocation3 + $0x129] sm:$0xff] %v13611_v54  ;;  %v10917_v53 = vadd.f32 %v9459_v44, %v12765_v4  ;;  %v3738_v63 = vpop.f32.mrb[25].mxu0  ;;  %v12965_v35 = vld [vmem:[#allocation3 + $0xf0] sm:$0xff]  ;;  %v12967_v36 = vld [vmem:[#allocation3 + $0xf8] sm:$0xff]  ;;  %10598 = vmatprep.subr.bf16.mxu1 %v10597_v56  ;;  %v10605_v59 = vpack.c.bf16 %v4422_v9, %v4421_v14 }
 0x3de   : > { %13728 = vst [vmem:[#allocation20_spill] sm:$0xff] %v12967_v36  ;;  %3928 = vst [vmem:[#allocation3 + $0x121] sm:$0xff] %v13612_v43  ;;  %v10918_v16 = vadd.f32 %v12765_v4, %v3738_v63  ;;  %9531 = vmatprep.mubr.f32.mxu1 %v12965_v35 }
 0x3df   : > { %v12973_v22 = vmax.f32 %v10917_v53, 0.0  ;;  %9532 = vmatmul.mubr.f32.gmra.mrb[4].mxu1 %v12967_v36  ;;  %v13741_v36 = vmax.f32 %v12768_v8, 0.0  ;;  %v4794_v8 = vld [vmem:[#allocation8 + $0x5d8] sm:$0xff] }
 0x3e0   : > { %v12976_v44 = vmax.f32 %v10918_v16, 0.0  ;;  %v9462_v54 = vpop.f32.mrb[26].mxu0  ;;  %10600 = vmatpush3.bf16.msra.mxu1 %v10597_v56  ;;  %v4423_v16 = vld [vmem:[#allocation8 + $0x550] sm:$0xff] }
 0x3e1   : > { %3931 = vst [vmem:[#allocation3 + $0x141] sm:$0xff] %v12973_v22  ;;  %v10919_v46 = vadd.f32 %v9462_v54, %v12765_v4  ;;  %v3748_v3 = vpop.f32.mrb[27].mxu0  ;;  %v12980_v43 = vld [vmem:[#allocation3 + $0x108] sm:$0xff]  ;;  %v12982_v63 = vld [vmem:[#allocation3 + $0x110] sm:$0xff]  ;;  %10602 = vmatprep.subr.bf16.mxu1 %v10601_v29  ;;  %v10609_v55 = vpack.c.bf16 %v4424_v13, %v4423_v16 }
 0x3e2   : > { %13729 = vst [vmem:[#allocation21_spill] sm:$0xff] %v12980_v43  ;;  %13730 = vst [vmem:[#allocation22_spill] sm:$0xff] %v12982_v63  ;;  %v10920_v53 = vadd.f32 %v12765_v4, %v3748_v3  ;;  %9534 = vmatprep.mubr.f32.mxu1 %v12980_v43 }
 0x3e3   : > { %3930 = vst [vmem:[#allocation3 + $0x139] sm:$0xff] %v12976_v44  ;;  %v12987_v56 = vmax.f32 %v10919_v46, 0.0  ;;  %9535 = vmatmul.mubr.f32.gmra.mrb[6].mxu1 %v12982_v63 }
 0x3e4   : > { %v12990_v54 = vmax.f32 %v10920_v53, 0.0  ;;  %v9465_v58 = vpop.f32.mrb[28].mxu0  ;;  %10604 = vmatpush3.bf16.msra.mxu1 %v10601_v29  ;;  %v4425_v53 = vld [vmem:[#allocation8 + $0x560] sm:$0xff] }
 0x3e5   : > { %3933 = vst [vmem:[#allocation3 + $0x159] sm:$0xff] %v12987_v56  ;;  %v10921_v9 = vadd.f32 %v9465_v58, %v12765_v4  ;;  %v3758_v14 = vpop.f32.mrb[29].mxu0  ;;  %v12994_v57 = vld [vmem:[#allocation3 + $0x120] sm:$0xff]  ;;  %v12996_v3 = vld [vmem:[#allocation3 + $0x128] sm:$0xff]  ;;  %10606 = vmatprep.subr.bf16.mxu1 %v10605_v59 }
 0x3e6   : > { %13731 = vst [vmem:[#allocation23_spill] sm:$0xff] %v12994_v57  ;;  %13732 = vst [vmem:[#allocation24_spill] sm:$0xff] %v12996_v3  ;;  %v10922_v46 = vadd.f32 %v12765_v4, %v3758_v14  ;;  %9537 = vmatprep.mubr.f32.mxu1 %v12994_v57  ;;  %v10613_v57 = vpack.c.bf16 %v4426_v1, %v4425_v53 }
 0x3e7   : > { %3932 = vst [vmem:[#allocation3 + $0x151] sm:$0xff] %v12990_v54  ;;  %v13001_v29 = vmax.f32 %v10921_v9, 0.0  ;;  %9538 = vmatmul.mubr.f32.gmra.mrb[8].mxu1 %v12996_v3 }
 0x3e8   : > { %v13004_v58 = vmax.f32 %v10922_v46, 0.0  ;;  %v9468_v63 = vpop.f32.mrb[30].mxu0  ;;  %10608 = vmatpush3.bf16.msra.mxu1 %v10605_v59  ;;  %v4427_v59 = vld [vmem:[#allocation8 + $0x570] sm:$0xff]  ;;  %v4428_v46 = vld [vmem:[#allocation8 + $0x578] sm:$0xff] }
 0x3e9   : > { %3935 = vst [vmem:[#allocation3 + $0x171] sm:$0xff] %v13001_v29  ;;  %v13008_v13 = vadd.f32 %v9468_v63, %v12765_v4  ;;  %v3768_v16 = vpop.f32.mrb[31].mxu0  ;;  %10610 = vmatprep.subr.bf16.mxu1 %v10609_v55 }
 0x3ea   : > { %v13010_v43 = vld [vmem:[#allocation3 + $0x138] sm:$0xff]  ;;  %v13012_v14 = vld [vmem:[#allocation3 + $0x140] sm:$0xff]  ;;  %3934 = vst [vmem:[#allocation3 + $0x169] sm:$0xff] %v13004_v58  ;;  %v13016_v9 = vadd.f32 %v12765_v4, %v3768_v16  ;;  %v10617_v4 = vpack.c.bf16 %v4428_v46, %v4427_v59  ;;  %v4783_v16 = vld [vmem:[#allocation8 + $0x580] sm:$0xff] }
 0x3eb   : > { %13733 = vst [vmem:[#allocation25_spill] sm:$0xff] %v13008_v13  ;;  %13734 = vst [vmem:[#allocation26_spill] sm:$0xff] %v13010_v43  ;;  %9540 = vmatprep.mubr.f32.mxu1 %v13010_v43  ;;  %v13625_v3 = vmax.f32 %v13008_v13, 0.0  ;;  %v4784_v43 = vld [vmem:[#allocation8 + $0x588] sm:$0xff]  ;;  %v4785_v59 = vld [vmem:[#allocation8 + $0x590] sm:$0xff] }
 0x3ec   : > { %13735 = vst [vmem:[#allocation27_spill] sm:$0xff] %v13012_v14  ;;  %13736 = vst [vmem:[#allocation28_spill] sm:$0xff] %v13016_v9  ;;  %9541 = vmatmul.mubr.f32.gmra.mrb[10].mxu1 %v13012_v14  ;;  %v13627_v63 = vmax.f32 %v13016_v9, 0.0  ;;  %v10621_v14 = vpack.c.bf16 %v4784_v43, %v4783_v16  ;;  %v4786_v46 = vld [vmem:[#allocation8 + $0x598] sm:$0xff]  ;;  %v4789_v16 = vld [vmem:[#allocation8 + $0x5b0] sm:$0xff] }
 0x3ed   : > { %10612 = vmatpush3.bf16.msra.mxu1 %v10609_v55  ;;  %3937 = vst [vmem:[#allocation3 + $0x189] sm:$0xff] %v13625_v3  ;;  %v4348_v3 = vld [vmem:[#allocation3 + $0x1] sm:$0xff]  ;;  %v10625_v9 = vpack.c.bf16 %v4786_v46, %v4785_v59  ;;  %v4791_v59 = vld [vmem:[#allocation8 + $0x5c0] sm:$0xff]  ;;  %v4792_v46 = vld [vmem:[#allocation8 + $0x5c8] sm:$0xff] }
 0x3ee   : > { %v13024_v1 = vld [vmem:[#allocation3 + $0x150] sm:$0xff]  ;;  %v13026_v53 = vld [vmem:[#allocation3 + $0x158] sm:$0xff]  ;;  %10614 = vmatprep.subr.bf16.mxu1 %v10613_v57  ;;  %3936 = vst [vmem:[#allocation3 + $0x181] sm:$0xff] %v13627_v63 }
 0x3ef   : > { %13737 = vst [vmem:[#allocation19_spill] sm:$0xff] %v13024_v1  ;;  %13738 = vst [vmem:[#allocation29_spill] sm:$0xff] %v13026_v53  ;;  %9543 = vmatprep.mubr.f32.mxu1 %v13024_v1  ;;  %v4349_v63 = vld [vmem:[#allocation3 + $0x9] sm:$0xff]  ;;  %v13740_v1 = vmax.f32 %v12771_v20, 0.0  ;;  %v13744_v20 = vmax.f32 %v12795_v12, 0.0  ;;  %v13748_v12 = vmax.f32 %v12829_v28, 0.0 }
 0x3f0   : > { %9544 = vmatmul.mubr.f32.gmra.mrb[12].mxu1 %v13026_v53  ;;  %v4787_v53 = vld [vmem:[#allocation8 + $0x5a0] sm:$0xff] }
 0x3f1   : > { %10616 = vmatpush3.bf16.msra.mxu1 %v10613_v57  ;;  %v13032_v55 = vld [vmem:[#allocation3 + $0x168] sm:$0xff]  ;;  %v13034_v13 = vld [vmem:[#allocation3 + $0x170] sm:$0xff]  ;;  %v4788_v57 = vld [vmem:[#allocation8 + $0x5a8] sm:$0xff] }
 0x3f2   : > { %13739 = vst [vmem:[#allocation30_spill] sm:$0xff] %v13032_v55  ;;  %10618 = vmatprep.subr.bf16.mxu1 %v10617_v4  ;;  %9546 = vmatprep.mubr.f32.mxu1 %v13032_v55  ;;  %v10629_v43 = vpack.c.bf16 %v4788_v57, %v4787_v53  ;;  %v4790_v55 = vld [vmem:[#allocation8 + $0x5b8] sm:$0xff]  ;;  %v4795_v53 = vld [vmem:[#allocation8 + $0x5e0] sm:$0xff] }
 0x3f3   : > { %v5153_v28 = vld [vmem:[#allocation8 + $0x600] sm:$0xff] }
 0x3f4   : > { %9547 = vmatmul.mubr.f32.gmra.mrb[14].mxu1 %v13034_v13 }
 0x3f5   : > { %10620 = vmatpush3.bf16.msra.mxu1 %v10617_v4  ;;  %9581 = vmatprep.mubr.f32.mxu1 %v4348_v3  ;;  %v13742_v4 = vmax.f32 %v12783_v42, 0.0  ;;  %v10633_v3 = vpack.c.bf16 %v4790_v55, %v4789_v16  ;;  %v13746_v42 = vmax.f32 %v12811_v21, 0.0  ;;  %v13747_v55 = vmax.f32 %v12802_v6, 0.0  ;;  %v13058_v21 = vpop.f32.mrb[32].mxu0 }
 0x3f6   : > { %10622 = vmatprep.subr.bf16.mxu1 %v10621_v14  ;;  %v13749_v16 = vmax.f32 %v12820_v24, 0.0  ;;  %13750 = vst [vmem:[#allocation31_spill] sm:$0xff] %v13058_v21  ;;  %v5529_v21 = vld [vmem:[#allocation8 + $0x6b0] sm:$0xff] }
 0x3f8   : > { %9582 = vmatmul.mubr.f32.vlgmr.msra.gmra.mrb[16].mxu1 %v4349_v63  ;;  %v13743_v63 = vmax.f32 %v12778_v39, 0.0  ;;  %v4796_v39 = vld [vmem:[#allocation8 + $0x5e8] sm:$0xff] }
 0x3f9   : > { %9584 = vmatprep.mubr.f32.mxu1 %v13740_v1  ;;  %10624 = vmatpush3.bf16.msra.mxu1 %v10621_v14  ;;  %v10637_v14 = vpack.c.bf16 %v4792_v46, %v4791_v59  ;;  %v4793_v1 = vld [vmem:[#allocation8 + $0x5d0] sm:$0xff]  ;;  %v10645_v57 = vpack.c.bf16 %v4796_v39, %v4795_v53  ;;  %v5154_v59 = vld [vmem:[#allocation8 + $0x608] sm:$0xff]  ;;  %v13753_v46 = vmax.f32 %v12838_v23, 0.0  ;;  %v13758_v23 = vmax.f32 %v12901_v51, 0.0  ;;  %v5160_v39 = vld [vmem:[#allocation8 + $0x638] sm:$0xff] }
 0x3fa   : > { %10626 = vmatprep.subr.bf16.mxu1 %v10625_v9  ;;  %v10653_v24 = vpack.c.bf16 %v5154_v59, %v5153_v28  ;;  %v13765_v51 = vmax.f32 %v12947_v34, 0.0  ;;  %v5158_v34 = vld [vmem:[#allocation8 + $0x628] sm:$0xff]  ;;  %v5159_v53 = vld [vmem:[#allocation8 + $0x630] sm:$0xff]  ;;  %v5164_v59 = vld [vmem:[#allocation8 + $0x658] sm:$0xff] }
 0x3fb   : > { %v5163_v28 = vld [vmem:[#allocation8 + $0x650] sm:$0xff] }
 0x3fc   : > { %9585 = vmatmul.mubr.f32.gmra.mrb[18].mxu1 %v13741_v36  ;;  %v13745_v36 = vmax.f32 %v12790_v19, 0.0  ;;  %v4798_v19 = vld [vmem:[#allocation8 + $0x5f8] sm:$0xff] }
 0x3fd   : > { %9587 = vmatprep.mubr.f32.mxu1 %v13742_v4  ;;  %10628 = vmatpush3.bf16.msra.mxu1 %v10625_v9  ;;  %v10641_v9 = vpack.c.bf16 %v4794_v8, %v4793_v1  ;;  %v13751_v4 = vmax.f32 %v12847_v38, 0.0  ;;  %v13756_v38 = vmax.f32 %v12883_v41, 0.0  ;;  %v13760_v1 = vmax.f32 %v12919_v25, 0.0 }
 0x3fe   : > { %10630 = vmatprep.subr.bf16.mxu1 %v10629_v43  ;;  %v13762_v41 = vmax.f32 %v12937_v33, 0.0  ;;  %v13763_v8 = vmax.f32 %v12928_v32, 0.0  ;;  %v5155_v33 = vld [vmem:[#allocation8 + $0x610] sm:$0xff]  ;;  %v5157_v32 = vld [vmem:[#allocation8 + $0x620] sm:$0xff] }
 0x400   : > { %9588 = vmatmul.mubr.f32.gmra.mrb[20].mxu1 %v13743_v63  ;;  %v13754_v63 = vmax.f32 %v12865_v52, 0.0  ;;  %v13759_v52 = vmax.f32 %v12892_v62, 0.0  ;;  %v4718_v62 = vld [vmem:[#allocation3 + $0x2] sm:$0xff] }
 0x401   : > { %9590 = vmatprep.mubr.f32.mxu1 %v13744_v20  ;;  %10632 = vmatpush3.bf16.msra.mxu1 %v10629_v43  ;;  %v4797_v43 = vld [vmem:[#allocation8 + $0x5f0] sm:$0xff]  ;;  %v13755_v20 = vmax.f32 %v12856_v47, 0.0  ;;  %v13761_v47 = vmax.f32 %v12910_v2, 0.0  ;;  %v5156_v2 = vld [vmem:[#allocation8 + $0x618] sm:$0xff] }
 0x402   : > { %10634 = vmatprep.subr.bf16.mxu1 %v10633_v3  ;;  %v10649_v6 = vpack.c.bf16 %v4798_v19, %v4797_v43  ;;  %v10657_v25 = vpack.c.bf16 %v5156_v2, %v5155_v33  ;;  %v5161_v43 = vld [vmem:[#allocation8 + $0x640] sm:$0xff]  ;;  %v5162_v19 = vld [vmem:[#allocation8 + $0x648] sm:$0xff] }
 0x403   : > { %v13132_v33 = vld [vmem:[#allocation3 + $0xaa] sm:$0xff] }
 0x404   : > { %9591 = vmatmul.mubr.f32.gmra.mrb[22].mxu1 %v13745_v36  ;;  %v13096_v36 = vld [vmem:[#allocation3 + $0x1a] sm:$0xff] }
 0x405   : > { %9593 = vmatprep.mubr.f32.mxu1 %v13746_v42  ;;  %10636 = vmatpush3.bf16.msra.mxu1 %v10633_v3  ;;  %v13062_v3 = vpop.f32.mrb[33].mxu0  ;;  %v10661_v42 = vpack.c.bf16 %v5158_v34, %v5157_v32  ;;  %v13141_v32 = vld [vmem:[#allocation3 + $0xca] sm:$0xff]  ;;  %v13144_v34 = vld [vmem:[#allocation3 + $0xda] sm:$0xff] }
 0x406   : > { %10638 = vmatprep.subr.bf16.mxu1 %v10637_v14  ;;  %13752 = vst [vmem:[#allocation32_spill] sm:$0xff] %v13062_v3 }
 0x408   : > { %9594 = vmatmul.mubr.f32.gmra.mrb[24].mxu1 %v13747_v55  ;;  %v13102_v55 = vld [vmem:[#allocation3 + $0x32] sm:$0xff] }
 0x409   : > { %9596 = vmatprep.mubr.f32.mxu1 %v13748_v12  ;;  %10640 = vmatpush3.bf16.msra.mxu1 %v10637_v14  ;;  %v13757_v14 = vmax.f32 %v12874_v30, 0.0  ;;  %v13764_v30 = vmax.f32 %v12956_v11, 0.0  ;;  %v4719_v11 = vld [vmem:[#allocation3 + $0xa] sm:$0xff]  ;;  %v10665_v12 = vpack.c.bf16 %v5160_v39, %v5159_v53  ;;  %v13150_v53 = vld [vmem:[#allocation3 + $0xf2] sm:$0xff]  ;;  %v13153_v39 = vld [vmem:[#allocation3 + $0xfa] sm:$0xff] }
 0x40a   : > { %10642 = vmatprep.subr.bf16.mxu1 %v10641_v9 }
 0x40c   : > { %9597 = vmatmul.mubr.f32.gmra.mrb[26].mxu1 %v13749_v16  ;;  %v13108_v16 = vld [vmem:[#allocation3 + $0x4a] sm:$0xff] }
 0x40d   : > { %9599 = vmatprep.mubr.f32.mxu1 %v13751_v4  ;;  %10644 = vmatpush3.bf16.msra.mxu1 %v10641_v9  ;;  %v13099_v9 = vld [vmem:[#allocation3 + $0x22] sm:$0xff]  ;;  %v10669_v4 = vpack.c.bf16 %v5162_v19, %v5161_v43  ;;  %v13159_v43 = vld [vmem:[#allocation3 + $0x112] sm:$0xff] }
 0x40e   : > { %10646 = vmatprep.subr.bf16.mxu1 %v10645_v57  ;;  %v13162_v19 = vld [vmem:[#allocation3 + $0x122] sm:$0xff] }
 0x410   : > { %9600 = vmatmul.mubr.f32.gmra.mrb[28].mxu1 %v13753_v46  ;;  %v13114_v46 = vld [vmem:[#allocation3 + $0x62] sm:$0xff] }
 0x411   : > { %9602 = vmatprep.mubr.f32.mxu1 %v13754_v63  ;;  %10648 = vmatpush3.bf16.msra.mxu1 %v10645_v57  ;;  %v13105_v57 = vld [vmem:[#allocation3 + $0x3a] sm:$0xff]  ;;  %v10673_v63 = vpack.c.bf16 %v5164_v59, %v5163_v28  ;;  %v13171_v59 = vld [vmem:[#allocation3 + $0x142] sm:$0xff] }
 0x412   : > { %10650 = vmatprep.subr.bf16.mxu1 %v10649_v6  ;;  %v13168_v28 = vld [vmem:[#allocation3 + $0x13a] sm:$0xff] }
 0x414   : > { %9603 = vmatmul.mubr.f32.gmra.mrb[30].mxu1 %v13755_v20  ;;  %v5165_v20 = vld [vmem:[#allocation8 + $0x660] sm:$0xff] }
 0x415   : > { %9605 = vmatprep.mubr.f32.mxu1 %v13756_v38  ;;  %10652 = vmatpush3.bf16.msra.mxu1 %v10649_v6  ;;  %v13111_v6 = vld [vmem:[#allocation3 + $0x52] sm:$0xff] }
 0x416   : > { %10654 = vmatprep.subr.bf16.mxu1 %v10653_v24  ;;  %v5166_v38 = vld [vmem:[#allocation8 + $0x668] sm:$0xff] }
 0x418   : > { %9606 = vmatmul.mubr.f32.gmra.mrb[0].mxu1 %v13757_v14  ;;  %v13120_v14 = vld [vmem:[#allocation3 + $0x7a] sm:$0xff] }
 0x419   : > { %9608 = vmatprep.mubr.f32.mxu1 %v13758_v23  ;;  %v10677_v23 = vpack.c.bf16 %v5166_v38, %v5165_v20  ;;  %v13177_v20 = vld [vmem:[#allocation3 + $0x15a] sm:$0xff]  ;;  %v13180_v38 = vld [vmem:[#allocation3 + $0x16a] sm:$0xff] }
 0x41a   : > { %13766 = vst [vmem:[#allocation33_spill] sm:$0xff] %v13180_v38 }
 0x41c   : > { %9609 = vmatmul.mubr.f32.gmra.mrb[2].mxu1 %v13759_v52  ;;  %v13123_v52 = vld [vmem:[#allocation3 + $0x82] sm:$0xff] }
 0x41d   : > { %9611 = vmatprep.mubr.f32.mxu1 %v13760_v1  ;;  %v5167_v1 = vld [vmem:[#allocation8 + $0x670] sm:$0xff] }
 0x420   : > { %9612 = vmatmul.mubr.f32.gmra.mrb[4].mxu1 %v13761_v47  ;;  %v5168_v47 = vld [vmem:[#allocation8 + $0x678] sm:$0xff] }
 0x421   : > { %9614 = vmatprep.mubr.f32.mxu1 %v13762_v41  ;;  %v13126_v41 = vld [vmem:[#allocation3 + $0x92] sm:$0xff] }
 0x424   : > { %9615 = vmatmul.mubr.f32.gmra.mrb[6].mxu1 %v13763_v8  ;;  %v10681_v8 = vpack.c.bf16 %v5168_v47, %v5167_v1  ;;  %v5525_v1 = vld [vmem:[#allocation8 + $0x690] sm:$0xff]  ;;  %v5526_v47 = vld [vmem:[#allocation8 + $0x698] sm:$0xff] }
 0x425   : > { %9617 = vmatprep.mubr.f32.mxu1 %v13764_v30  ;;  %v13129_v30 = vld [vmem:[#allocation3 + $0x9a] sm:$0xff] }
 0x428   : > { %9618 = vmatmul.mubr.f32.gmra.mrb[8].mxu1 %v13765_v51  ;;  %v5523_v51 = vld [vmem:[#allocation8 + $0x680] sm:$0xff] }
 0x429   : > { %9620 = vmatprep.mubr.f32.mxu1 %v12976_v44 }
 0x42c   : > { %9621 = vmatmul.mubr.f32.gmra.mrb[10].mxu1 %v12973_v22 }
 0x42d   : > { %9623 = vmatprep.mubr.f32.mxu1 %v12990_v54 }
 0x430   : > { %9624 = vmatmul.mubr.f32.gmra.mrb[12].mxu1 %v12987_v56 }
 0x431   : > { %9626 = vmatprep.mubr.f32.mxu1 %v13004_v58 }
 0x434   : > { %9627 = vmatmul.mubr.f32.gmra.mrb[14].mxu1 %v13001_v29 }
 0x435   : > { %9661 = vmatprep.mubr.f32.mxu1 %v4718_v62  ;;  %v5524_v62 = vld [vmem:[#allocation8 + $0x688] sm:$0xff] }
 0x436   : > { %v10685_v2 = vpack.c.bf16 %v5524_v62, %v5523_v51  ;;  %v5527_v51 = vld [vmem:[#allocation8 + $0x6a0] sm:$0xff]  ;;  %v5528_v62 = vld [vmem:[#allocation8 + $0x6a8] sm:$0xff] }
 0x437   : > { %v10693_v3 = vpack.c.bf16 %v5528_v62, %v5527_v51  ;;  %v13776_v51 = vld [vmem:[#allocation20_spill] sm:$0xff]  ;;  %v13777_v62 = vld [vmem:[#allocation21_spill] sm:$0xff] }
 0x438   : > { %9662 = vmatmul.mubr.f32.vlgmr.msra.gmra.mrb[16].mxu1 %v4719_v11  ;;  %v13135_v11 = vld [vmem:[#allocation3 + $0xb2] sm:$0xff] }
 0x439   : > { %9664 = vmatprep.mubr.f32.mxu1 %v13096_v36  ;;  %10656 = vmatpush3.bf16.msra.mxu1 %v10653_v24  ;;  %v13117_v24 = vld [vmem:[#allocation3 + $0x6a] sm:$0xff] }
 0x43a   : > { %10658 = vmatprep.subr.bf16.mxu1 %v10657_v25 }
 0x43c   : > { %9665 = vmatmul.mubr.f32.gmra.mrb[18].mxu1 %v13099_v9 }
 0x43d   : > { %9667 = vmatprep.mubr.f32.mxu1 %v13102_v55  ;;  %10660 = vmatpush3.bf16.msra.mxu1 %v10657_v25  ;;  %v13138_v25 = vld [vmem:[#allocation3 + $0xc2] sm:$0xff] }
 0x43e   : > { %10662 = vmatprep.subr.bf16.mxu1 %v10661_v42 }
 0x440   : > { %9668 = vmatmul.mubr.f32.gmra.mrb[20].mxu1 %v13105_v57 }
 0x441   : > { %9670 = vmatprep.mubr.f32.mxu1 %v13108_v16  ;;  %10664 = vmatpush3.bf16.msra.mxu1 %v10661_v42  ;;  %v13147_v42 = vld [vmem:[#allocation3 + $0xe2] sm:$0xff] }
 0x442   : > { %10666 = vmatprep.subr.bf16.mxu1 %v10665_v12 }
 0x444   : > { %9671 = vmatmul.mubr.f32.gmra.mrb[22].mxu1 %v13111_v6 }
 0x445   : > { %9673 = vmatprep.mubr.f32.mxu1 %v13114_v46  ;;  %10668 = vmatpush3.bf16.msra.mxu1 %v10665_v12  ;;  %v13156_v12 = vld [vmem:[#allocation3 + $0x10a] sm:$0xff] }
 0x446   : > { %10670 = vmatprep.subr.bf16.mxu1 %v10669_v4 }
 0x448   : > { %9674 = vmatmul.mubr.f32.gmra.mrb[24].mxu1 %v13117_v24 }
 0x449   : > { %9676 = vmatprep.mubr.f32.mxu1 %v13120_v14  ;;  %10672 = vmatpush3.bf16.msra.mxu1 %v10669_v4  ;;  %v13165_v4 = vld [vmem:[#allocation3 + $0x12a] sm:$0xff] }
 0x44a   : > { %10674 = vmatprep.subr.bf16.mxu1 %v10673_v63 }
 0x44c   : > { %9677 = vmatmul.mubr.f32.gmra.mrb[26].mxu1 %v13123_v52 }
 0x44d   : > { %9679 = vmatprep.mubr.f32.mxu1 %v13126_v41  ;;  %10676 = vmatpush3.bf16.msra.mxu1 %v10673_v63  ;;  %v13174_v63 = vld [vmem:[#allocation3 + $0x152] sm:$0xff] }
 0x44e   : > { %10678 = vmatprep.subr.bf16.mxu1 %v10677_v23 }
 0x450   : > { %9680 = vmatmul.mubr.f32.gmra.mrb[28].mxu1 %v13129_v30 }
 0x451   : > { %9682 = vmatprep.mubr.f32.mxu1 %v13132_v33  ;;  %10680 = vmatpush3.bf16.msra.mxu1 %v10677_v23  ;;  %v13183_v23 = vld [vmem:[#allocation3 + $0x172] sm:$0xff] }
 0x452   : > { %10682 = vmatprep.subr.bf16.mxu1 %v10681_v8  ;;  %13767 = vst [vmem:[#allocation34_spill] sm:$0xff] %v13183_v23 }
 0x454   : > { %9683 = vmatmul.mubr.f32.gmra.mrb[30].mxu1 %v13135_v11 }
 0x455   : > { %9685 = vmatprep.mubr.f32.mxu1 %v13138_v25  ;;  %10684 = vmatpush3.bf16.msra.mxu1 %v10681_v8  ;;  %v10689_v8 = vpack.c.bf16 %v5526_v47, %v5525_v1  ;;  %v5532_v1 = vld [vmem:[#allocation8 + $0x6c8] sm:$0xff] }
 0x456   : > { %10686 = vmatprep.subr.bf16.mxu1 %v10685_v2 }
 0x458   : > { %9686 = vmatmul.mubr.f32.gmra.mrb[0].mxu1 %v13141_v32 }
 0x459   : > { %9688 = vmatprep.mubr.f32.mxu1 %v13144_v34 }
 0x45c   : > { %9689 = vmatmul.mubr.f32.gmra.mrb[2].mxu1 %v13147_v42 }
 0x45d   : > { %9691 = vmatprep.mubr.f32.mxu1 %v13150_v53 }
 0x460   : > { %9692 = vmatmul.mubr.f32.gmra.mrb[4].mxu1 %v13153_v39 }
 0x461   : > { %9694 = vmatprep.mubr.f32.mxu1 %v13156_v12 }
 0x464   : > { %9695 = vmatmul.mubr.f32.gmra.mrb[6].mxu1 %v13159_v43 }
 0x465   : > { %9697 = vmatprep.mubr.f32.mxu1 %v13162_v19 }
 0x468   : > { %9698 = vmatmul.mubr.f32.gmra.mrb[8].mxu1 %v13165_v4 }
 0x469   : > { %9700 = vmatprep.mubr.f32.mxu1 %v13168_v28 }
 0x46c   : > { %9701 = vmatmul.mubr.f32.gmra.mrb[10].mxu1 %v13171_v59 }
 0x46d   : > { %9703 = vmatprep.mubr.f32.mxu1 %v13174_v63 }
 0x470   : > { %9704 = vmatmul.mubr.f32.gmra.mrb[12].mxu1 %v13177_v20 }
 0x471   : > { %9706 = vmatprep.mubr.f32.mxu1 %v13180_v38  ;;  %v5530_v38 = vld [vmem:[#allocation8 + $0x6b8] sm:$0xff] }
 0x474   : > { %9707 = vmatmul.mubr.f32.gmra.mrb[14].mxu1 %v13183_v23  ;;  %v10697_v23 = vpack.c.bf16 %v5530_v38, %v5529_v21  ;;  %v5536_v21 = vld [vmem:[#allocation8 + $0x6e8] sm:$0xff]  ;;  %v5893_v38 = vld [vmem:[#allocation8 + $0x700] sm:$0xff] }
 0x475   : > { %9741 = vmatprep.mubr.f32.mxu1 %v12804_v18  ;;  %v5531_v18 = vld [vmem:[#allocation8 + $0x6c0] sm:$0xff] }
 0x478   : > { %9742 = vmatmul.mubr.f32.vlgmr.msra.gmra.mrb[16].mxu1 %v12806_v0  ;;  %v10701_v0 = vpack.c.bf16 %v5532_v1, %v5531_v18  ;;  %v13780_v18 = vld [vmem:[#allocation22_spill] sm:$0xff]  ;;  %v13781_v1 = vld [vmem:[#allocation23_spill] sm:$0xff] }
 0x479   : > { %9744 = vmatprep.mubr.f32.mxu1 %v12822_v26  ;;  %10688 = vmatpush3.bf16.msra.mxu1 %v10685_v2  ;;  %v5533_v26 = vld [vmem:[#allocation8 + $0x6d0] sm:$0xff]  ;;  %v5534_v2 = vld [vmem:[#allocation8 + $0x6d8] sm:$0xff] }
 0x47a   : > { %10690 = vmatprep.subr.bf16.mxu1 %v10689_v8 }
 0x47c   : > { %9745 = vmatmul.mubr.f32.gmra.mrb[18].mxu1 %v12824_v27  ;;  %v10705_v27 = vpack.c.bf16 %v5534_v2, %v5533_v26  ;;  %v13785_v26 = vld [vmem:[#allocation26_spill] sm:$0xff] }
 0x47d   : > { %9747 = vmatprep.mubr.f32.mxu1 %v12840_v31  ;;  %10692 = vmatpush3.bf16.msra.mxu1 %v10689_v8  ;;  %v5535_v31 = vld [vmem:[#allocation8 + $0x6e0] sm:$0xff] }
 0x47e   : > { %10694 = vmatprep.subr.bf16.mxu1 %v10693_v3 }
 0x480   : > { %9748 = vmatmul.mubr.f32.gmra.mrb[20].mxu1 %v12842_v37  ;;  %v10709_v37 = vpack.c.bf16 %v5536_v21, %v5535_v31  ;;  %v13788_v31 = vld [vmem:[#allocation27_spill] sm:$0xff] }
 0x481   : > { %9750 = vmatprep.mubr.f32.mxu1 %v12858_v49  ;;  %10696 = vmatpush3.bf16.msra.mxu1 %v10693_v3  ;;  %v5537_v49 = vld [vmem:[#allocation8 + $0x6f0] sm:$0xff]  ;;  %v5538_v3 = vld [vmem:[#allocation8 + $0x6f8] sm:$0xff]  ;;  %v13789_v21 = vld [vmem:[#allocation19_spill] sm:$0xff] }
 0x482   : > { %10698 = vmatprep.subr.bf16.mxu1 %v10697_v23 }
 0x484   : > { %9751 = vmatmul.mubr.f32.gmra.mrb[22].mxu1 %v12860_v50  ;;  %v10713_v50 = vpack.c.bf16 %v5538_v3, %v5537_v49  ;;  %v13791_v49 = vld [vmem:[#allocation30_spill] sm:$0xff]  ;;  %v13244_v3 = vld [vmem:[#allocation3 + $0x180] sm:$0xff] }
 0x485   : > { %9753 = vmatprep.mubr.f32.mxu1 %v12876_v45  ;;  %10700 = vmatpush3.bf16.msra.mxu1 %v10697_v23  ;;  %v5894_v23 = vld [vmem:[#allocation8 + $0x708] sm:$0xff] }
 0x486   : > { %10702 = vmatprep.subr.bf16.mxu1 %v10701_v0 }
 0x488   : > { %9754 = vmatmul.mubr.f32.gmra.mrb[24].mxu1 %v12878_v40  ;;  %v10717_v40 = vpack.c.bf16 %v5894_v23, %v5893_v38  ;;  %v5895_v38 = vld [vmem:[#allocation8 + $0x710] sm:$0xff]  ;;  %v5896_v23 = vld [vmem:[#allocation8 + $0x718] sm:$0xff] }
 0x489   : > { %9756 = vmatprep.mubr.f32.mxu1 %v12894_v7  ;;  %10704 = vmatpush3.bf16.msra.mxu1 %v10701_v0 }
 0x48a   : > { %10706 = vmatprep.subr.bf16.mxu1 %v10705_v27 }
 0x48c   : > { %9757 = vmatmul.mubr.f32.gmra.mrb[26].mxu1 %v12896_v5 }
 0x48d   : > { %9759 = vmatprep.mubr.f32.mxu1 %v12912_v17  ;;  %10708 = vmatpush3.bf16.msra.mxu1 %v10705_v27 }
 0x48e   : > { %10710 = vmatprep.subr.bf16.mxu1 %v10709_v37  ;;  %v13199_v45 = vpop.f32.mrb[34].mxu0 }
 0x48f   : > { %13768 = vst [vmem:[#allocation35_spill] sm:$0xff] %v13199_v45  ;;  %v13201_v47 = vpop.f32.mrb[35].mxu0  ;;  %v13796_v45 = vld [vmem:[#allocation25_spill] sm:$0xff] }
 0x490   : > { %13769 = vst [vmem:[#allocation36_spill] sm:$0xff] %v13201_v47  ;;  %9760 = vmatmul.mubr.f32.gmra.mrb[28].mxu1 %v12914_v10  ;;  %v6267_v47 = vld [vmem:[#allocation8 + $0x798] sm:$0xff] }
 0x491   : > { %9762 = vmatprep.mubr.f32.mxu1 %v12930_v15  ;;  %10712 = vmatpush3.bf16.msra.mxu1 %v10709_v37  ;;  %v13790_v37 = vld [vmem:[#allocation29_spill] sm:$0xff] }
 0x492   : > { %10714 = vmatprep.subr.bf16.mxu1 %v10713_v50  ;;  %v13205_v7 = vpop.f32.mrb[36].mxu0 }
 0x493   : > { %13770 = vst [vmem:[#allocation37_spill] sm:$0xff] %v13205_v7  ;;  %v13207_v5 = vpop.f32.mrb[37].mxu0  ;;  %v6266_v7 = vld [vmem:[#allocation8 + $0x790] sm:$0xff] }
 0x494   : > { %13771 = vst [vmem:[#allocation38_spill] sm:$0xff] %v13207_v5  ;;  %9763 = vmatmul.mubr.f32.gmra.mrb[30].mxu1 %v12932_v60 }
 0x495   : > { %9765 = vmatprep.mubr.f32.mxu1 %v12949_v61  ;;  %10716 = vmatpush3.bf16.msra.mxu1 %v10713_v50  ;;  %v13247_v50 = vld [vmem:[#allocation3 + $0x188] sm:$0xff] }
 0x496   : > { %10718 = vmatprep.subr.bf16.mxu1 %v10717_v40  ;;  %v13211_v17 = vpop.f32.mrb[38].mxu0 }
 0x497   : > { %13772 = vst [vmem:[#allocation39_spill] sm:$0xff] %v13211_v17  ;;  %v13213_v8 = vpop.f32.mrb[39].mxu0  ;;  %v13794_v17 = vld [vmem:[#allocation28_spill] sm:$0xff] }
 0x498   : > { %13773 = vst [vmem:[#allocation40_spill] sm:$0xff] %v13213_v8  ;;  %9766 = vmatmul.mubr.f32.gmra.mrb[0].mxu1 %v12951_v48  ;;  %v13313_v8 = vld [vmem:[#allocation3 + $0x129] sm:$0xff]  ;;  %v13795_v5 = vmax.f32 %v13794_v17, 0.0  ;;  %v6635_v17 = vld [vmem:[#allocation8 + $0x808] sm:$0xff] }
 0x499   : > { %9768 = vmatprep.mubr.f32.mxu1 %v12965_v35  ;;  %v13784_v35 = vld [vmem:[#allocation24_spill] sm:$0xff]  ;;  %13793 = vst [vmem:[#allocation50_spill] sm:$0xff] %v13313_v8 }
 0x49a   : > { %v13217_v10 = vpop.f32.mrb[40].mxu0 }
 0x49b   : > { %13774 = vst [vmem:[#allocation41_spill] sm:$0xff] %v13217_v10  ;;  %v13219_v15 = vpop.f32.mrb[41].mxu0  ;;  %v6265_v10 = vld [vmem:[#allocation8 + $0x788] sm:$0xff] }
 0x49c   : > { %13775 = vst [vmem:[#allocation42_spill] sm:$0xff] %v13219_v15  ;;  %9769 = vmatmul.mubr.f32.gmra.mrb[2].mxu1 %v13776_v51  ;;  %v5458_v51 = vld [vmem:[#allocation3 + $0x19] sm:$0xff]  ;;  %v6264_v15 = vld [vmem:[#allocation8 + $0x780] sm:$0xff] }
 0x49d   : > { %9771 = vmatprep.mubr.f32.mxu1 %v13777_v62  ;;  %v10721_v62 = vpack.c.bf16 %v5896_v23, %v5895_v38  ;;  %v13259_v23 = vld [vmem:[#allocation3 + $0x51] sm:$0xff] }
 0x49e   : > { %v13223_v60 = vpop.f32.mrb[42].mxu0 }
 0x49f   : > { %13778 = vst [vmem:[#allocation43_spill] sm:$0xff] %v13223_v60  ;;  %v13225_v61 = vpop.f32.mrb[43].mxu0  ;;  %v5908_v60 = vld [vmem:[#allocation8 + $0x778] sm:$0xff] }
 0x4a0   : > { %13779 = vst [vmem:[#allocation44_spill] sm:$0xff] %v13225_v61  ;;  %9772 = vmatmul.mubr.f32.gmra.mrb[4].mxu1 %v13780_v18  ;;  %v5459_v18 = vld [vmem:[#allocation3 + $0x21] sm:$0xff] }
 0x4a1   : > { %9774 = vmatprep.mubr.f32.mxu1 %v13781_v1  ;;  %v5897_v1 = vld [vmem:[#allocation8 + $0x720] sm:$0xff]  ;;  %v5907_v61 = vld [vmem:[#allocation8 + $0x770] sm:$0xff] }
 0x4a2   : > { %v13229_v0 = vpop.f32.mrb[44].mxu0 }
 0x4a3   : > { %13782 = vst [vmem:[#allocation45_spill] sm:$0xff] %v13229_v0  ;;  %v13231_v48 = vpop.f32.mrb[45].mxu0  ;;  %v5906_v0 = vld [vmem:[#allocation8 + $0x768] sm:$0xff] }
 0x4a4   : > { %13783 = vst [vmem:[#allocation46_spill] sm:$0xff] %v13231_v48  ;;  %9775 = vmatmul.mubr.f32.gmra.mrb[6].mxu1 %v13784_v35  ;;  %v5898_v35 = vld [vmem:[#allocation8 + $0x728] sm:$0xff]  ;;  %v5905_v48 = vld [vmem:[#allocation8 + $0x760] sm:$0xff] }
 0x4a5   : > { %9777 = vmatprep.mubr.f32.mxu1 %v13785_v26  ;;  %v13250_v26 = vld [vmem:[#allocation3 + $0x31] sm:$0xff] }
 0x4a6   : > { %v13235_v2 = vpop.f32.mrb[46].mxu0 }
 0x4a7   : > { %13786 = vst [vmem:[#allocation47_spill] sm:$0xff] %v13235_v2  ;;  %v13237_v27 = vpop.f32.mrb[47].mxu0  ;;  %v5904_v2 = vld [vmem:[#allocation8 + $0x758] sm:$0xff] }
 0x4a8   : > { %13787 = vst [vmem:[#allocation48_spill] sm:$0xff] %v13237_v27  ;;  %9778 = vmatmul.mubr.f32.gmra.mrb[8].mxu1 %v13788_v31  ;;  %v13253_v31 = vld [vmem:[#allocation3 + $0x39] sm:$0xff] }
 0x4a9   : > { %9780 = vmatprep.mubr.f32.mxu1 %v13789_v21  ;;  %v5899_v21 = vld [vmem:[#allocation8 + $0x730] sm:$0xff] }
 0x4aa   : > { %v5903_v27 = vld [vmem:[#allocation8 + $0x750] sm:$0xff] }
 0x4ac   : > { %9781 = vmatmul.mubr.f32.gmra.mrb[10].mxu1 %v13790_v37  ;;  %v5900_v37 = vld [vmem:[#allocation8 + $0x738] sm:$0xff] }
 0x4ad   : > { %9783 = vmatprep.mubr.f32.mxu1 %v13791_v49  ;;  %v13256_v49 = vld [vmem:[#allocation3 + $0x49] sm:$0xff]  ;;  %v10729_v38 = vpack.c.bf16 %v5900_v37, %v5899_v21  ;;  %v10737_v21 = vpack.c.bf16 %v5904_v2, %v5903_v27  ;;  %v13271_v37 = vld [vmem:[#allocation3 + $0x81] sm:$0xff]  ;;  %v10745_v27 = vpack.c.bf16 %v5908_v60, %v5907_v61  ;;  %v13298_v61 = vld [vmem:[#allocation3 + $0xf1] sm:$0xff] }
 0x4ae   : > { %v13280_v2 = vld [vmem:[#allocation3 + $0xa9] sm:$0xff]  ;;  %v13295_v60 = vld [vmem:[#allocation3 + $0xe1] sm:$0xff] }
 0x4b0   : > { %9784 = vmatmul.mubr.f32.gmra.mrb[12].mxu1 %v13034_v13  ;;  %v10725_v13 = vpack.c.bf16 %v5898_v35, %v5897_v1  ;;  %v13265_v35 = vld [vmem:[#allocation3 + $0x69] sm:$0xff] }
 0x4b1   : > { %9786 = vmatprep.mubr.f32.mxu1 %v13244_v3 }
 0x4b4   : > { %9787 = vmatmul.mubr.f32.gmra.mrb[14].mxu1 %v13247_v50 }
 0x4b5   : > { %9821 = vmatprep.mubr.f32.mxu1 %v5458_v51  ;;  %v5901_v51 = vld [vmem:[#allocation8 + $0x740] sm:$0xff] }
 0x4b8   : > { %9822 = vmatmul.mubr.f32.vlgmr.msra.gmra.mrb[16].mxu1 %v5459_v18  ;;  %v5902_v18 = vld [vmem:[#allocation8 + $0x748] sm:$0xff] }
 0x4b9   : > { %9824 = vmatprep.mubr.f32.mxu1 %v13250_v26  ;;  %10720 = vmatpush3.bf16.msra.mxu1 %v10717_v40  ;;  %v13262_v40 = vld [vmem:[#allocation3 + $0x61] sm:$0xff]  ;;  %v10733_v1 = vpack.c.bf16 %v5902_v18, %v5901_v51  ;;  %v10741_v51 = vpack.c.bf16 %v5906_v0, %v5905_v48  ;;  %v13277_v18 = vld [vmem:[#allocation3 + $0x99] sm:$0xff]  ;;  %v10749_v48 = vpack.c.bf16 %v6265_v10, %v6264_v15  ;;  %v13304_v10 = vld [vmem:[#allocation3 + $0x109] sm:$0xff] }
 0x4ba   : > { %10722 = vmatprep.subr.bf16.mxu1 %v10721_v62  ;;  %v13286_v0 = vld [vmem:[#allocation3 + $0xc1] sm:$0xff]  ;;  %v13307_v15 = vld [vmem:[#allocation3 + $0x111] sm:$0xff] }
 0x4bc   : > { %9825 = vmatmul.mubr.f32.gmra.mrb[18].mxu1 %v13253_v31 }
 0x4bd   : > { %9827 = vmatprep.mubr.f32.mxu1 %v13256_v49  ;;  %10724 = vmatpush3.bf16.msra.mxu1 %v10721_v62  ;;  %v13268_v62 = vld [vmem:[#allocation3 + $0x79] sm:$0xff] }
 0x4be   : > { %10726 = vmatprep.subr.bf16.mxu1 %v10725_v13 }
 0x4c0   : > { %9828 = vmatmul.mubr.f32.gmra.mrb[20].mxu1 %v13259_v23 }
 0x4c1   : > { %9830 = vmatprep.mubr.f32.mxu1 %v13262_v40  ;;  %10728 = vmatpush3.bf16.msra.mxu1 %v10725_v13  ;;  %v13274_v13 = vld [vmem:[#allocation3 + $0x91] sm:$0xff] }
 0x4c2   : > { %10730 = vmatprep.subr.bf16.mxu1 %v10729_v38 }
 0x4c4   : > { %9831 = vmatmul.mubr.f32.gmra.mrb[22].mxu1 %v13265_v35 }
 0x4c5   : > { %9833 = vmatprep.mubr.f32.mxu1 %v13268_v62  ;;  %10732 = vmatpush3.bf16.msra.mxu1 %v10729_v38  ;;  %v13283_v38 = vld [vmem:[#allocation3 + $0xb1] sm:$0xff] }
 0x4c6   : > { %10734 = vmatprep.subr.bf16.mxu1 %v10733_v1 }
 0x4c8   : > { %9834 = vmatmul.mubr.f32.gmra.mrb[24].mxu1 %v13271_v37 }
 0x4c9   : > { %9836 = vmatprep.mubr.f32.mxu1 %v13274_v13  ;;  %10736 = vmatpush3.bf16.msra.mxu1 %v10733_v1  ;;  %v13289_v1 = vld [vmem:[#allocation3 + $0xc9] sm:$0xff] }
 0x4ca   : > { %10738 = vmatprep.subr.bf16.mxu1 %v10737_v21 }
 0x4cc   : > { %9837 = vmatmul.mubr.f32.gmra.mrb[26].mxu1 %v13277_v18 }
 0x4cd   : > { %9839 = vmatprep.mubr.f32.mxu1 %v13280_v2  ;;  %10740 = vmatpush3.bf16.msra.mxu1 %v10737_v21  ;;  %v13292_v21 = vld [vmem:[#allocation3 + $0xd9] sm:$0xff] }
 0x4ce   : > { %10742 = vmatprep.subr.bf16.mxu1 %v10741_v51 }
 0x4d0   : > { %9840 = vmatmul.mubr.f32.gmra.mrb[28].mxu1 %v13283_v38 }
 0x4d1   : > { %9842 = vmatprep.mubr.f32.mxu1 %v13286_v0  ;;  %10744 = vmatpush3.bf16.msra.mxu1 %v10741_v51  ;;  %v13301_v51 = vld [vmem:[#allocation3 + $0xf9] sm:$0xff] }
 0x4d2   : > { %10746 = vmatprep.subr.bf16.mxu1 %v10745_v27 }
 0x4d4   : > { %9843 = vmatmul.mubr.f32.gmra.mrb[30].mxu1 %v13289_v1 }
 0x4d5   : > { %9845 = vmatprep.mubr.f32.mxu1 %v13292_v21  ;;  %10748 = vmatpush3.bf16.msra.mxu1 %v10745_v27  ;;  %v13310_v27 = vld [vmem:[#allocation3 + $0x121] sm:$0xff] }
 0x4d6   : > { %10750 = vmatprep.subr.bf16.mxu1 %v10749_v48  ;;  %13792 = vst [vmem:[#allocation49_spill] sm:$0xff] %v13310_v27 }
 0x4d8   : > { %9846 = vmatmul.mubr.f32.gmra.mrb[0].mxu1 %v13295_v60 }
 0x4d9   : > { %9848 = vmatprep.mubr.f32.mxu1 %v13298_v61 }
 0x4dc   : > { %9849 = vmatmul.mubr.f32.gmra.mrb[2].mxu1 %v13301_v51 }
 0x4dd   : > { %9851 = vmatprep.mubr.f32.mxu1 %v13304_v10 }
 0x4e0   : > { %9852 = vmatmul.mubr.f32.gmra.mrb[4].mxu1 %v13307_v15 }
 0x4e1   : > { %9854 = vmatprep.mubr.f32.mxu1 %v13310_v27  ;;  %v13797_v27 = vmax.f32 %v13796_v45, 0.0  ;;  %v6273_v45 = vld [vmem:[#allocation8 + $0x7c8] sm:$0xff] }
 0x4e4   : > { %9855 = vmatmul.mubr.f32.gmra.mrb[6].mxu1 %v13313_v8  ;;  %v6269_v8 = vld [vmem:[#allocation8 + $0x7a8] sm:$0xff] }
 0x4e5   : > { %9857 = vmatprep.mubr.f32.mxu1 %v12976_v44  ;;  %v10753_v44 = vpack.c.bf16 %v6267_v47, %v6266_v7  ;;  %v6275_v47 = vld [vmem:[#allocation8 + $0x7d8] sm:$0xff]  ;;  %v6277_v7 = vld [vmem:[#allocation8 + $0x7e8] sm:$0xff] }
 0x4e8   : > { %9858 = vmatmul.mubr.f32.gmra.mrb[8].mxu1 %v12973_v22  ;;  %v6268_v22 = vld [vmem:[#allocation8 + $0x7a0] sm:$0xff] }
 0x4e9   : > { %9860 = vmatprep.mubr.f32.mxu1 %v12990_v54  ;;  %v6270_v54 = vld [vmem:[#allocation8 + $0x7b0] sm:$0xff] }
 0x4ec   : > { %9861 = vmatmul.mubr.f32.gmra.mrb[10].mxu1 %v12987_v56  ;;  %v10757_v56 = vpack.c.bf16 %v6269_v8, %v6268_v22  ;;  %v6204_v8 = vld [vmem:[#allocation3 + $0x68] sm:$0xff] }
 0x4ed   : > { %9863 = vmatprep.mubr.f32.mxu1 %v13004_v58 }
 0x4f0   : > { %9864 = vmatmul.mubr.f32.gmra.mrb[12].mxu1 %v13001_v29  ;;  %v6271_v29 = vld [vmem:[#allocation8 + $0x7b8] sm:$0xff] }
 0x4f1   : > { %9866 = vmatprep.mubr.f32.mxu1 %v13795_v5  ;;  %v10761_v58 = vpack.c.bf16 %v6271_v29, %v6270_v54  ;;  %v6279_v5 = vld [vmem:[#allocation8 + $0x7f8] sm:$0xff]  ;;  %v6644_v54 = vld [vmem:[#allocation8 + $0x850] sm:$0xff] }
 0x4f2   : > { %v6645_v29 = vld [vmem:[#allocation8 + $0x858] sm:$0xff] }
 0x4f4   : > { %9867 = vmatmul.mubr.f32.gmra.mrb[14].mxu1 %v13797_v27  ;;  %v6643_v27 = vld [vmem:[#allocation8 + $0x848] sm:$0xff] }
 0x4f5   : > { %9901 = vmatprep.mubr.f32.mxu1 %v13096_v36  ;;  %v6272_v36 = vld [vmem:[#allocation8 + $0x7c0] sm:$0xff] }
 0x4f8   : > { %9902 = vmatmul.mubr.f32.vlgmr.msra.gmra.mrb[16].mxu1 %v13099_v9  ;;  %v10765_v9 = vpack.c.bf16 %v6273_v45, %v6272_v36  ;;  %v10801_v36 = vpack.c.bf16 %v6645_v29, %v6644_v54  ;;  %v6208_v45 = vld [vmem:[#allocation3 + $0x98] sm:$0xff]  ;;  %v7015_v29 = vld [vmem:[#allocation8 + $0x8d8] sm:$0xff] }
 0x4f9   : > { %9904 = vmatprep.mubr.f32.mxu1 %v13102_v55  ;;  %10752 = vmatpush3.bf16.msra.mxu1 %v10749_v48  ;;  %v6274_v55 = vld [vmem:[#allocation8 + $0x7d0] sm:$0xff]  ;;  %v6642_v48 = vld [vmem:[#allocation8 + $0x840] sm:$0xff]  ;;  %v7013_v54 = vld [vmem:[#allocation8 + $0x8c8] sm:$0xff] }
 0x4fa   : > { %10754 = vmatprep.subr.bf16.mxu1 %v10753_v44  ;;  %v10797_v22 = vpack.c.bf16 %v6643_v27, %v6642_v48  ;;  %v7008_v27 = vld [vmem:[#allocation8 + $0x8a0] sm:$0xff] }
 0x4fc   : > { %9905 = vmatmul.mubr.f32.gmra.mrb[18].mxu1 %v13105_v57  ;;  %v10769_v57 = vpack.c.bf16 %v6275_v47, %v6274_v55  ;;  %v6647_v55 = vld [vmem:[#allocation8 + $0x868] sm:$0xff]  ;;  %v6209_v47 = vld [vmem:[#allocation3 + $0xa8] sm:$0xff] }
 0x4fd   : > { %9907 = vmatprep.mubr.f32.mxu1 %v13108_v16  ;;  %10756 = vmatpush3.bf16.msra.mxu1 %v10753_v44  ;;  %v6276_v16 = vld [vmem:[#allocation8 + $0x7e0] sm:$0xff]  ;;  %v6205_v44 = vld [vmem:[#allocation3 + $0x78] sm:$0xff] }
 0x4fe   : > { %10758 = vmatprep.subr.bf16.mxu1 %v10757_v56 }
 0x500   : > { %9908 = vmatmul.mubr.f32.gmra.mrb[20].mxu1 %v13111_v6  ;;  %v10773_v6 = vpack.c.bf16 %v6277_v7, %v6276_v16  ;;  %v6210_v16 = vld [vmem:[#allocation3 + $0xb0] sm:$0xff]  ;;  %v6648_v7 = vld [vmem:[#allocation8 + $0x870] sm:$0xff] }
 0x501   : > { %9910 = vmatprep.mubr.f32.mxu1 %v13114_v46  ;;  %10760 = vmatpush3.bf16.msra.mxu1 %v10757_v56  ;;  %v6278_v46 = vld [vmem:[#allocation8 + $0x7f0] sm:$0xff] }
 0x502   : > { %10762 = vmatprep.subr.bf16.mxu1 %v10761_v58  ;;  %v6206_v56 = vld [vmem:[#allocation3 + $0x80] sm:$0xff] }
 0x504   : > { %9911 = vmatmul.mubr.f32.gmra.mrb[22].mxu1 %v13117_v24  ;;  %v10777_v24 = vpack.c.bf16 %v6279_v5, %v6278_v46  ;;  %v6211_v46 = vld [vmem:[#allocation3 + $0xc0] sm:$0xff] }
 0x505   : > { %9913 = vmatprep.mubr.f32.mxu1 %v13120_v14  ;;  %10764 = vmatpush3.bf16.msra.mxu1 %v10761_v58  ;;  %v6634_v14 = vld [vmem:[#allocation8 + $0x800] sm:$0xff] }
 0x506   : > { %10766 = vmatprep.subr.bf16.mxu1 %v10765_v9  ;;  %v6207_v58 = vld [vmem:[#allocation3 + $0x90] sm:$0xff] }
 0x508   : > { %9914 = vmatmul.mubr.f32.gmra.mrb[24].mxu1 %v13123_v52  ;;  %v10781_v52 = vpack.c.bf16 %v6635_v17, %v6634_v14  ;;  %v7004_v14 = vld [vmem:[#allocation8 + $0x880] sm:$0xff]  ;;  %v7005_v17 = vld [vmem:[#allocation8 + $0x888] sm:$0xff] }
 0x509   : > { %9916 = vmatprep.mubr.f32.mxu1 %v13126_v41  ;;  %10768 = vmatpush3.bf16.msra.mxu1 %v10765_v9  ;;  %v13798_v41 = vld [vmem:[#allocation33_spill] sm:$0xff]  ;;  %v6646_v9 = vld [vmem:[#allocation8 + $0x860] sm:$0xff] }
 0x50a   : > { %10770 = vmatprep.subr.bf16.mxu1 %v10769_v57 }
 0x50c   : > { %9917 = vmatmul.mubr.f32.gmra.mrb[26].mxu1 %v13129_v30  ;;  %v13799_v30 = vld [vmem:[#allocation34_spill] sm:$0xff] }
 0x50d   : > { %9919 = vmatprep.mubr.f32.mxu1 %v13132_v33  ;;  %10772 = vmatpush3.bf16.msra.mxu1 %v10769_v57  ;;  %v13356_v33 = vld [vmem:[#allocation3 + $0x182] sm:$0xff]  ;;  %v10805_v57 = vpack.c.bf16 %v6647_v55, %v6646_v9  ;;  %v6596_v9 = vld [vmem:[#allocation3 + $0x171] sm:$0xff] }
 0x50e   : > { %10774 = vmatprep.subr.bf16.mxu1 %v10773_v6  ;;  %v6600_v55 = vld [vmem:[#allocation3 + $0x1a1] sm:$0xff] }
 0x510   : > { %9920 = vmatmul.mubr.f32.gmra.mrb[28].mxu1 %v13135_v11  ;;  %v13359_v11 = vld [vmem:[#allocation3 + $0x18a] sm:$0xff] }
 0x511   : > { %9922 = vmatprep.mubr.f32.mxu1 %v13138_v25  ;;  %10776 = vmatpush3.bf16.msra.mxu1 %v10773_v6  ;;  %v6636_v25 = vld [vmem:[#allocation8 + $0x810] sm:$0xff]  ;;  %v6649_v6 = vld [vmem:[#allocation8 + $0x878] sm:$0xff] }
 0x512   : > { %10778 = vmatprep.subr.bf16.mxu1 %v10777_v24  ;;  %v10809_v5 = vpack.c.bf16 %v6649_v6, %v6648_v7  ;;  %v6940_v6 = vld [vmem:[#allocation3 + $0x3a] sm:$0xff] }
 0x514   : > { %9923 = vmatmul.mubr.f32.gmra.mrb[30].mxu1 %v13141_v32  ;;  %v6637_v32 = vld [vmem:[#allocation8 + $0x818] sm:$0xff] }
 0x515   : > { %9925 = vmatprep.mubr.f32.mxu1 %v13144_v34  ;;  %10780 = vmatpush3.bf16.msra.mxu1 %v10777_v24  ;;  %v6199_v34 = vld [vmem:[#allocation3 + $0x30] sm:$0xff]  ;;  %v6212_v24 = vld [vmem:[#allocation3 + $0xc8] sm:$0xff] }
 0x516   : > { %10782 = vmatprep.subr.bf16.mxu1 %v10781_v52 }
 0x518   : > { %9926 = vmatmul.mubr.f32.gmra.mrb[0].mxu1 %v13147_v42  ;;  %v10785_v42 = vpack.c.bf16 %v6637_v32, %v6636_v25  ;;  %v6215_v25 = vld [vmem:[#allocation3 + $0xf0] sm:$0xff]  ;;  %v6216_v32 = vld [vmem:[#allocation3 + $0xf8] sm:$0xff] }
 0x519   : > { %9928 = vmatprep.mubr.f32.mxu1 %v13150_v53  ;;  %v6200_v53 = vld [vmem:[#allocation3 + $0x38] sm:$0xff] }
 0x51c   : > { %9929 = vmatmul.mubr.f32.gmra.mrb[2].mxu1 %v13153_v39  ;;  %v6638_v39 = vld [vmem:[#allocation8 + $0x820] sm:$0xff] }
 0x51d   : > { %9931 = vmatprep.mubr.f32.mxu1 %v13156_v12  ;;  %v6639_v12 = vld [vmem:[#allocation8 + $0x828] sm:$0xff] }
 0x520   : > { %9932 = vmatmul.mubr.f32.gmra.mrb[4].mxu1 %v13159_v43  ;;  %v6201_v43 = vld [vmem:[#allocation3 + $0x48] sm:$0xff] }
 0x521   : > { %9934 = vmatprep.mubr.f32.mxu1 %v13162_v19  ;;  %v10789_v19 = vpack.c.bf16 %v6639_v12, %v6638_v39  ;;  %v6220_v39 = vld [vmem:[#allocation3 + $0x128] sm:$0xff]  ;;  %v6221_v12 = vld [vmem:[#allocation3 + $0x138] sm:$0xff] }
 0x524   : > { %9935 = vmatmul.mubr.f32.gmra.mrb[6].mxu1 %v13165_v4  ;;  %v6202_v4 = vld [vmem:[#allocation3 + $0x50] sm:$0xff] }
 0x525   : > { %9937 = vmatprep.mubr.f32.mxu1 %v13168_v28  ;;  %v6640_v28 = vld [vmem:[#allocation8 + $0x830] sm:$0xff] }
 0x528   : > { %9938 = vmatmul.mubr.f32.gmra.mrb[8].mxu1 %v13171_v59  ;;  %v6641_v59 = vld [vmem:[#allocation8 + $0x838] sm:$0xff] }
 0x529   : > { %9940 = vmatprep.mubr.f32.mxu1 %v13174_v63  ;;  %v6203_v63 = vld [vmem:[#allocation3 + $0x60] sm:$0xff] }
 0x52c   : > { %9941 = vmatmul.mubr.f32.gmra.mrb[10].mxu1 %v13177_v20  ;;  %v10793_v20 = vpack.c.bf16 %v6641_v59, %v6640_v28  ;;  %v6225_v28 = vld [vmem:[#allocation3 + $0x168] sm:$0xff]  ;;  %v6226_v59 = vld [vmem:[#allocation3 + $0x170] sm:$0xff] }
 0x52d   : > { %9943 = vmatprep.mubr.f32.mxu1 %v13798_v41  ;;  %v10813_v41 = vpack.c.bf16 %v7005_v17, %v7004_v14  ;;  %v6942_v17 = vld [vmem:[#allocation3 + $0x52] sm:$0xff] }
 0x530   : > { %9944 = vmatmul.mubr.f32.gmra.mrb[12].mxu1 %v13799_v30  ;;  %v6214_v30 = vld [vmem:[#allocation3 + $0xe0] sm:$0xff] }
 0x531   : > { %9946 = vmatprep.mubr.f32.mxu1 %v13356_v33 }
 0x534   : > { %9947 = vmatmul.mubr.f32.gmra.mrb[14].mxu1 %v13359_v11 }
 0x535   : > { %9981 = vmatprep.mubr.f32.mxu1 %v6199_v34  ;;  %v6217_v34 = vld [vmem:[#allocation3 + $0x108] sm:$0xff] }
 0x538   : > { %9982 = vmatmul.mubr.f32.vlgmr.msra.gmra.mrb[16].mxu1 %v6200_v53  ;;  %v6219_v53 = vld [vmem:[#allocation3 + $0x120] sm:$0xff] }
 0x539   : > { %9984 = vmatprep.mubr.f32.mxu1 %v6201_v43  ;;  %10784 = vmatpush3.bf16.msra.mxu1 %v10781_v52  ;;  %v6213_v52 = vld [vmem:[#allocation3 + $0xd8] sm:$0xff]  ;;  %v6222_v43 = vld [vmem:[#allocation3 + $0x140] sm:$0xff] }
 0x53a   : > { %10786 = vmatprep.subr.bf16.mxu1 %v10785_v42 }
 0x53c   : > { %9985 = vmatmul.mubr.f32.gmra.mrb[18].mxu1 %v6202_v4  ;;  %v6224_v4 = vld [vmem:[#allocation3 + $0x158] sm:$0xff] }
 0x53d   : > { %9987 = vmatprep.mubr.f32.mxu1 %v6203_v63  ;;  %10788 = vmatpush3.bf16.msra.mxu1 %v10785_v42  ;;  %v6218_v42 = vld [vmem:[#allocation3 + $0x110] sm:$0xff] }
 0x53e   : > { %10790 = vmatprep.subr.bf16.mxu1 %v10789_v19  ;;  %v11630_v63 = vld [vmem:[#allocation2] sm:$0xff] }
 0x540   : > { %9988 = vmatmul.mubr.f32.gmra.mrb[20].mxu1 %v6204_v8  ;;  %v7007_v8 = vld [vmem:[#allocation8 + $0x898] sm:$0xff] }
 0x541   : > { %9990 = vmatprep.mubr.f32.mxu1 %v6205_v44  ;;  %10792 = vmatpush3.bf16.msra.mxu1 %v10789_v19  ;;  %v6223_v19 = vld [vmem:[#allocation3 + $0x150] sm:$0xff]  ;;  %v7009_v44 = vld [vmem:[#allocation8 + $0x8a8] sm:$0xff] }
 0x542   : > { %10794 = vmatprep.subr.bf16.mxu1 %v10793_v20 }
 0x544   : > { %9991 = vmatmul.mubr.f32.gmra.mrb[22].mxu1 %v6206_v56  ;;  %v7011_v56 = vld [vmem:[#allocation8 + $0x8b8] sm:$0xff] }
 0x545   : > { %9993 = vmatprep.mubr.f32.mxu1 %v6207_v58  ;;  %10796 = vmatpush3.bf16.msra.mxu1 %v10793_v20  ;;  %v7006_v20 = vld [vmem:[#allocation8 + $0x890] sm:$0xff]  ;;  %v7017_v58 = vld [vmem:[#allocation8 + $0x8e8] sm:$0xff] }
 0x546   : > { %10798 = vmatprep.subr.bf16.mxu1 %v10797_v22  ;;  %v10817_v48 = vpack.c.bf16 %v7007_v8, %v7006_v20  ;;  %v7354_v20 = vld [vmem:[#allocation11 + $0x68] sm:$0xff]  ;;  %v6949_v8 = vld [vmem:[#allocation3 + $0xaa] sm:$0xff] }
 0x548   : > { %9994 = vmatmul.mubr.f32.gmra.mrb[24].mxu1 %v6208_v45  ;;  %v7342_v45 = vld [vmem:[#allocation11 + $0x8] sm:$0xff] }
 0x549   : > { %9996 = vmatprep.mubr.f32.mxu1 %v6209_v47  ;;  %10800 = vmatpush3.bf16.msra.mxu1 %v10797_v22  ;;  %v10821_v22 = vpack.c.bf16 %v7009_v44, %v7008_v27  ;;  %v7343_v47 = vld [vmem:[#allocation11 + $0x10] sm:$0xff]  ;;  %v6950_v27 = vld [vmem:[#allocation3 + $0xb2] sm:$0xff] }
 0x54a   : > { %10802 = vmatprep.subr.bf16.mxu1 %v10801_v36  ;;  %v7355_v44 = vld [vmem:[#allocation11 + $0x70] sm:$0xff] }
 0x54c   : > { %9997 = vmatmul.mubr.f32.gmra.mrb[26].mxu1 %v6210_v16  ;;  %v6939_v16 = vld [vmem:[#allocation3 + $0x32] sm:$0xff] }
 0x54d   : > { %9999 = vmatprep.mubr.f32.mxu1 %v6211_v46  ;;  %10804 = vmatpush3.bf16.msra.mxu1 %v10801_v36  ;;  %v7019_v36 = vld [vmem:[#allocation8 + $0x8f8] sm:$0xff]  ;;  %v7345_v46 = vld [vmem:[#allocation11 + $0x20] sm:$0xff] }
 0x54e   : > { %10806 = vmatprep.subr.bf16.mxu1 %v10805_v57 }
 0x550   : > { %10000 = vmatmul.mubr.f32.gmra.mrb[28].mxu1 %v6212_v24  ;;  %v6941_v24 = vld [vmem:[#allocation3 + $0x4a] sm:$0xff] }
 0x551   : > { %10002 = vmatprep.mubr.f32.mxu1 %v6213_v52  ;;  %10808 = vmatpush3.bf16.msra.mxu1 %v10805_v57  ;;  %v7344_v57 = vld [vmem:[#allocation11 + $0x18] sm:$0xff]  ;;  %v7347_v52 = vld [vmem:[#allocation11 + $0x30] sm:$0xff] }
 0x552   : > { %10810 = vmatprep.subr.bf16.mxu1 %v10809_v5  ;;  %v10849_v7 = vpack.c.bf16 %v7344_v57, %v7343_v47  ;;  %v11644_v47 = vld [vmem:[#allocation2 + $0xb1] sm:$0xff]  ;;  %v11645_v57 = vld [vmem:[#allocation2 + $0xc1] sm:$0xff] }
 0x554   : > { %10003 = vmatmul.mubr.f32.gmra.mrb[30].mxu1 %v6214_v30  ;;  %v6943_v30 = vld [vmem:[#allocation3 + $0x62] sm:$0xff] }
 0x555   : > { %10005 = vmatprep.mubr.f32.mxu1 %v6215_v25  ;;  %10812 = vmatpush3.bf16.msra.mxu1 %v10809_v5  ;;  %v7346_v5 = vld [vmem:[#allocation11 + $0x28] sm:$0xff] }
 0x556   : > { %10814 = vmatprep.subr.bf16.mxu1 %v10813_v41  ;;  %v10853_v14 = vpack.c.bf16 %v7346_v5, %v7345_v46  ;;  %v11649_v46 = vld [vmem:[#allocation2 + $0xf1] sm:$0xff]  ;;  %v11650_v5 = vld [vmem:[#allocation2 + $0xf9] sm:$0xff] }
 0x558   : > { %10006 = vmatmul.mubr.f32.gmra.mrb[0].mxu1 %v6216_v32  ;;  %v6944_v32 = vld [vmem:[#allocation3 + $0x6a] sm:$0xff] }
 0x559   : > { %10008 = vmatprep.mubr.f32.mxu1 %v6217_v34  ;;  %v7349_v34 = vld [vmem:[#allocation11 + $0x40] sm:$0xff] }
 0x55c   : > { %10009 = vmatmul.mubr.f32.gmra.mrb[2].mxu1 %v6218_v42  ;;  %v7350_v42 = vld [vmem:[#allocation11 + $0x48] sm:$0xff] }
 0x55d   : > { %10011 = vmatprep.mubr.f32.mxu1 %v6219_v53  ;;  %v6945_v53 = vld [vmem:[#allocation3 + $0x7a] sm:$0xff] }
 0x560   : > { %10012 = vmatmul.mubr.f32.gmra.mrb[4].mxu1 %v6220_v39  ;;  %v10861_v39 = vpack.c.bf16 %v7350_v42, %v7349_v34  ;;  %v11659_v34 = vld [vmem:[#allocation2 + $0x169] sm:$0xff]  ;;  %v11660_v42 = vld [vmem:[#allocation2 + $0x171] sm:$0xff] }
 0x561   : > { %10014 = vmatprep.mubr.f32.mxu1 %v6221_v12  ;;  %v6946_v12 = vld [vmem:[#allocation3 + $0x82] sm:$0xff] }
 0x564   : > { %10015 = vmatmul.mubr.f32.gmra.mrb[6].mxu1 %v6222_v43  ;;  %v7351_v43 = vld [vmem:[#allocation11 + $0x50] sm:$0xff] }
 0x565   : > { %10017 = vmatprep.mubr.f32.mxu1 %v6223_v19  ;;  %v7352_v19 = vld [vmem:[#allocation11 + $0x58] sm:$0xff] }
 0x568   : > { %10018 = vmatmul.mubr.f32.gmra.mrb[8].mxu1 %v6224_v4  ;;  %v6947_v4 = vld [vmem:[#allocation3 + $0x92] sm:$0xff] }
 0x569   : > { %10020 = vmatprep.mubr.f32.mxu1 %v6225_v28  ;;  %v10865_v28 = vpack.c.bf16 %v7352_v19, %v7351_v43  ;;  %v13802_v43 = vld [vmem:[#allocation31_spill] sm:$0xff] }
 0x56c   : > { %10021 = vmatmul.mubr.f32.gmra.mrb[10].mxu1 %v6226_v59  ;;  %v6948_v59 = vld [vmem:[#allocation3 + $0x9a] sm:$0xff] }
 0x56d   : > { %10023 = vmatprep.mubr.f32.mxu1 %v13244_v3  ;;  %v7010_v3 = vld [vmem:[#allocation8 + $0x8b0] sm:$0xff] }
 0x570   : > { %10024 = vmatmul.mubr.f32.gmra.mrb[12].mxu1 %v13247_v50  ;;  %v10825_v50 = vpack.c.bf16 %v7011_v56, %v7010_v3  ;;  %v6951_v3 = vld [vmem:[#allocation3 + $0xc2] sm:$0xff] }
 0x571   : > { %10026 = vmatprep.mubr.f32.mxu1 %v11630_v63 }
 0x574   : > { %10027 = vmatmul.mubr.f32.gmra.mrb[14].mxu1 %v11630_v63  ;;  %v7353_v63 = vld [vmem:[#allocation11 + $0x60] sm:$0xff] }
 0x575   : > { %10061 = vmatprep.mubr.f32.mxu1 %v13250_v26  ;;  %v7012_v26 = vld [vmem:[#allocation8 + $0x8c0] sm:$0xff] }
 0x578   : > { %10062 = vmatmul.mubr.f32.vlgmr.msra.gmra.mrb[16].mxu1 %v13253_v31  ;;  %v10829_v31 = vpack.c.bf16 %v7013_v54, %v7012_v26  ;;  %v6953_v26 = vld [vmem:[#allocation3 + $0xda] sm:$0xff]  ;;  %v6954_v54 = vld [vmem:[#allocation3 + $0xe2] sm:$0xff] }
 0x579   : > { %10064 = vmatprep.mubr.f32.mxu1 %v13256_v49  ;;  %10816 = vmatpush3.bf16.msra.mxu1 %v10813_v41  ;;  %v7014_v49 = vld [vmem:[#allocation8 + $0x8d0] sm:$0xff]  ;;  %v7348_v41 = vld [vmem:[#allocation11 + $0x38] sm:$0xff] }
 0x57a   : > { %10818 = vmatprep.subr.bf16.mxu1 %v10817_v48  ;;  %v10857_v25 = vpack.c.bf16 %v7348_v41, %v7347_v52  ;;  %v11654_v52 = vld [vmem:[#allocation2 + $0x129] sm:$0xff]  ;;  %v11655_v41 = vld [vmem:[#allocation2 + $0x139] sm:$0xff] }
 0x57c   : > { %10065 = vmatmul.mubr.f32.gmra.mrb[18].mxu1 %v13259_v23  ;;  %v10833_v23 = vpack.c.bf16 %v7015_v29, %v7014_v49  ;;  %v6956_v49 = vld [vmem:[#allocation3 + $0xfa] sm:$0xff]  ;;  %v6957_v29 = vld [vmem:[#allocation3 + $0x10a] sm:$0xff] }
 0x57d   : > { %10067 = vmatprep.mubr.f32.mxu1 %v13262_v40  ;;  %10820 = vmatpush3.bf16.msra.mxu1 %v10817_v48  ;;  %v7016_v40 = vld [vmem:[#allocation8 + $0x8e0] sm:$0xff]  ;;  %v10869_v48 = vpack.c.bf16 %v7354_v20, %v7353_v63  ;;  %v13805_v20 = vld [vmem:[#allocation36_spill] sm:$0xff] }
 0x57e   : > { %10822 = vmatprep.subr.bf16.mxu1 %v10821_v22 }
 0x580   : > { %10068 = vmatmul.mubr.f32.gmra.mrb[20].mxu1 %v13265_v35  ;;  %v10837_v35 = vpack.c.bf16 %v7017_v58, %v7016_v40  ;;  %v6959_v40 = vld [vmem:[#allocation3 + $0x122] sm:$0xff]  ;;  %v6960_v58 = vld [vmem:[#allocation3 + $0x12a] sm:$0xff] }
 0x581   : > { %10070 = vmatprep.mubr.f32.mxu1 %v13268_v62  ;;  %10824 = vmatpush3.bf16.msra.mxu1 %v10821_v22  ;;  %v7018_v62 = vld [vmem:[#allocation8 + $0x8f0] sm:$0xff]  ;;  %v7356_v22 = vld [vmem:[#allocation11 + $0x78] sm:$0xff] }
 0x582   : > { %10826 = vmatprep.subr.bf16.mxu1 %v10825_v50  ;;  %v10873_v56 = vpack.c.bf16 %v7356_v22, %v7355_v44 }
 0x584   : > { %10071 = vmatmul.mubr.f32.gmra.mrb[22].mxu1 %v13271_v37  ;;  %v10841_v37 = vpack.c.bf16 %v7019_v36, %v7018_v62  ;;  %v6962_v62 = vld [vmem:[#allocation3 + $0x142] sm:$0xff]  ;;  %v6963_v36 = vld [vmem:[#allocation3 + $0x152] sm:$0xff] }
 0x585   : > { %10073 = vmatprep.mubr.f32.mxu1 %v13274_v13  ;;  %10828 = vmatpush3.bf16.msra.mxu1 %v10825_v50  ;;  %v7341_v13 = vld [vmem:[#allocation11] sm:$0xff]  ;;  %v6952_v50 = vld [vmem:[#allocation3 + $0xca] sm:$0xff] }
 0x586   : > { %10830 = vmatprep.subr.bf16.mxu1 %v10829_v31 }
 0x588   : > { %10074 = vmatmul.mubr.f32.gmra.mrb[24].mxu1 %v13277_v18  ;;  %v10845_v18 = vpack.c.bf16 %v7342_v45, %v7341_v13  ;;  %v6965_v13 = vld [vmem:[#allocation3 + $0x16a] sm:$0xff]  ;;  %v6966_v45 = vld [vmem:[#allocation3 + $0x172] sm:$0xff] }
 0x589   : > { %10076 = vmatprep.mubr.f32.mxu1 %v13280_v2  ;;  %10832 = vmatpush3.bf16.msra.mxu1 %v10829_v31  ;;  %v13800_v2 = vld [vmem:[#allocation49_spill] sm:$0xff]  ;;  %v6955_v31 = vld [vmem:[#allocation3 + $0xf2] sm:$0xff] }
 0x58a   : > { %10834 = vmatprep.subr.bf16.mxu1 %v10833_v23 }
 0x58c   : > { %10077 = vmatmul.mubr.f32.gmra.mrb[26].mxu1 %v13283_v38  ;;  %v13801_v38 = vld [vmem:[#allocation50_spill] sm:$0xff] }
 0x58d   : > { %10079 = vmatprep.mubr.f32.mxu1 %v13286_v0  ;;  %10836 = vmatpush3.bf16.msra.mxu1 %v10833_v23  ;;  %v6591_v0 = vld [vmem:[#allocation3 + $0x139] sm:$0xff] }
 0x58e   : > { %10838 = vmatprep.subr.bf16.mxu1 %v10837_v35  ;;  %v6958_v23 = vld [vmem:[#allocation3 + $0x112] sm:$0xff] }
 0x590   : > { %10080 = vmatmul.mubr.f32.gmra.mrb[28].mxu1 %v13289_v1  ;;  %v6592_v1 = vld [vmem:[#allocation3 + $0x141] sm:$0xff] }
 0x591   : > { %10082 = vmatprep.mubr.f32.mxu1 %v13292_v21  ;;  %10840 = vmatpush3.bf16.msra.mxu1 %v10837_v35  ;;  %v6593_v21 = vld [vmem:[#allocation3 + $0x151] sm:$0xff]  ;;  %v6961_v35 = vld [vmem:[#allocation3 + $0x13a] sm:$0xff] }
 0x592   : > { %10842 = vmatprep.subr.bf16.mxu1 %v10841_v37 }
 0x594   : > { %10083 = vmatmul.mubr.f32.gmra.mrb[30].mxu1 %v13295_v60  ;;  %v6594_v60 = vld [vmem:[#allocation3 + $0x159] sm:$0xff] }
 0x595   : > { %10085 = vmatprep.mubr.f32.mxu1 %v13298_v61  ;;  %10844 = vmatpush3.bf16.msra.mxu1 %v10841_v37  ;;  %v6595_v61 = vld [vmem:[#allocation3 + $0x169] sm:$0xff]  ;;  %v6964_v37 = vld [vmem:[#allocation3 + $0x15a] sm:$0xff] }
 0x596   : > { %10846 = vmatprep.subr.bf16.mxu1 %v10845_v18 }
 0x598   : > { %10086 = vmatmul.mubr.f32.gmra.mrb[0].mxu1 %v13301_v51  ;;  %v6597_v51 = vld [vmem:[#allocation3 + $0x181] sm:$0xff] }
 0x599   : > { %10088 = vmatprep.mubr.f32.mxu1 %v13304_v10  ;;  %v6599_v10 = vld [vmem:[#allocation3 + $0x199] sm:$0xff] }
 0x59c   : > { %10089 = vmatmul.mubr.f32.gmra.mrb[2].mxu1 %v13307_v15  ;;  %v6598_v15 = vld [vmem:[#allocation3 + $0x189] sm:$0xff] }
 0x59d   : > { %10091 = vmatprep.mubr.f32.mxu1 %v13800_v2  ;;  %v6970_v2 = vld [vmem:[#allocation3 + $0x1a2] sm:$0xff] }
 0x5a0   : > { %10092 = vmatmul.mubr.f32.gmra.mrb[4].mxu1 %v13801_v38  ;;  %v11631_v38 = vld [vmem:[#allocation2 + $0x19] sm:$0xff] }
 0x5a1   : > { %10094 = vmatprep.mubr.f32.mxu1 %v6591_v0  ;;  %v11632_v0 = vld [vmem:[#allocation2 + $0x21] sm:$0xff] }
 0x5a4   : > { %10095 = vmatmul.mubr.f32.gmra.mrb[6].mxu1 %v6592_v1  ;;  %v11633_v1 = vld [vmem:[#allocation2 + $0x31] sm:$0xff] }
 0x5a5   : > { %10097 = vmatprep.mubr.f32.mxu1 %v6593_v21  ;;  %v11634_v21 = vld [vmem:[#allocation2 + $0x39] sm:$0xff] }
 0x5a8   : > { %10098 = vmatmul.mubr.f32.gmra.mrb[8].mxu1 %v6594_v60  ;;  %v11635_v60 = vld [vmem:[#allocation2 + $0x49] sm:$0xff] }
 0x5a9   : > { %10100 = vmatprep.mubr.f32.mxu1 %v6595_v61  ;;  %v11636_v61 = vld [vmem:[#allocation2 + $0x51] sm:$0xff] }
 0x5ac   : > { %10101 = vmatmul.mubr.f32.gmra.mrb[10].mxu1 %v6596_v9  ;;  %v11637_v9 = vld [vmem:[#allocation2 + $0x61] sm:$0xff] }
 0x5ad   : > { %10103 = vmatprep.mubr.f32.mxu1 %v6597_v51  ;;  %v11640_v51 = vld [vmem:[#allocation2 + $0x81] sm:$0xff] }
 0x5b0   : > { %10104 = vmatmul.mubr.f32.gmra.mrb[12].mxu1 %v6598_v15  ;;  %v11642_v15 = vld [vmem:[#allocation2 + $0x99] sm:$0xff] }
 0x5b1   : > { %10106 = vmatprep.mubr.f32.mxu1 %v6599_v10  ;;  %v11641_v10 = vld [vmem:[#allocation2 + $0x91] sm:$0xff] }
 0x5b4   : > { %10107 = vmatmul.mubr.f32.gmra.mrb[14].mxu1 %v6600_v55  ;;  %v11643_v55 = vld [vmem:[#allocation2 + $0xa9] sm:$0xff] }
 0x5b5   : > { %10141 = vmatprep.mubr.f32.mxu1 %v6939_v16  ;;  %v11646_v16 = vld [vmem:[#allocation2 + $0xc9] sm:$0xff] }
 0x5b8   : > { %10142 = vmatmul.mubr.f32.vlgmr.msra.gmra.mrb[16].mxu1 %v6940_v6  ;;  %v11648_v6 = vld [vmem:[#allocation2 + $0xe1] sm:$0xff] }
 0x5b9   : > { %10144 = vmatprep.mubr.f32.mxu1 %v6941_v24  ;;  %10848 = vmatpush3.bf16.msra.mxu1 %v10845_v18  ;;  %v6969_v18 = vld [vmem:[#allocation3 + $0x19a] sm:$0xff] }
 0x5ba   : > { %10850 = vmatprep.subr.bf16.mxu1 %v10849_v7  ;;  %v11651_v24 = vld [vmem:[#allocation2 + $0x109] sm:$0xff] }
 0x5bc   : > { %10145 = vmatmul.mubr.f32.gmra.mrb[18].mxu1 %v6942_v17  ;;  %v11653_v17 = vld [vmem:[#allocation2 + $0x121] sm:$0xff] }
 0x5bd   : > { %10147 = vmatprep.mubr.f32.mxu1 %v6943_v30  ;;  %10852 = vmatpush3.bf16.msra.mxu1 %v10849_v7  ;;  %v11647_v7 = vld [vmem:[#allocation2 + $0xd9] sm:$0xff]  ;;  %v11656_v30 = vld [vmem:[#allocation2 + $0x141] sm:$0xff] }
 0x5be   : > { %10854 = vmatprep.subr.bf16.mxu1 %v10853_v14 }
 0x5c0   : > { %10148 = vmatmul.mubr.f32.gmra.mrb[20].mxu1 %v6944_v32  ;;  %v11658_v32 = vld [vmem:[#allocation2 + $0x159] sm:$0xff] }
 0x5c1   : > { %10150 = vmatprep.mubr.f32.mxu1 %v6945_v53  ;;  %10856 = vmatpush3.bf16.msra.mxu1 %v10853_v14  ;;  %v11652_v14 = vld [vmem:[#allocation2 + $0x111] sm:$0xff]  ;;  %v11661_v53 = vld [vmem:[#allocation2 + $0x181] sm:$0xff] }
 0x5c2   : > { %10858 = vmatprep.subr.bf16.mxu1 %v10857_v25 }
 0x5c4   : > { %10151 = vmatmul.mubr.f32.gmra.mrb[22].mxu1 %v6946_v12  ;;  %v13388_v12 = vld [vmem:[#allocation10 + $0x1] ss:$0 sm:$0xff] }
 0x5c5   : > { %10153 = vmatprep.mubr.f32.mxu1 %v6947_v4  ;;  %10860 = vmatpush3.bf16.msra.mxu1 %v10857_v25  ;;  %v11657_v25 = vld [vmem:[#allocation2 + $0x151] sm:$0xff]  ;;  %v4285_v19 = vadd.f32 %v13802_v43, %v13388_v12 }
 0x5c6   : > { %10862 = vmatprep.subr.bf16.mxu1 %v10861_v39  ;;  %v13803_v4 = vld [vmem:[#allocation32_spill] sm:$0xff]  ;;  %v13814_v43 = vld [vmem:[#allocation45_spill] sm:$0xff] }
 0x5c8   : > { %10154 = vmatmul.mubr.f32.gmra.mrb[24].mxu1 %v6948_v59  ;;  %v13804_v59 = vld [vmem:[#allocation35_spill] sm:$0xff] }
 0x5c9   : > { %10156 = vmatprep.mubr.f32.mxu1 %v6949_v8  ;;  %10864 = vmatpush3.bf16.msra.mxu1 %v10861_v39  ;;  %v11662_v39 = vld [vmem:[#allocation2 + $0x189] sm:$0xff]  ;;  %v4287_v63 = vadd.f32 %v13804_v59, %v13388_v12  ;;  %v4286_v8 = vadd.f32 %v13388_v12, %v13805_v20  ;;  %v13815_v59 = vld [vmem:[#allocation46_spill] sm:$0xff] }
 0x5ca   : > { %10866 = vmatprep.subr.bf16.mxu1 %v10865_v28 }
 0x5cc   : > { %10157 = vmatmul.mubr.f32.gmra.mrb[26].mxu1 %v6950_v27  ;;  %v13398_v27 = vld [vmem:[#allocation13] ss:$0 sm:$0xff] }
 0x5cd   : > { %10159 = vmatprep.mubr.f32.mxu1 %v6951_v3  ;;  %10868 = vmatpush3.bf16.msra.mxu1 %v10865_v28  ;;  %v4284_v28 = vadd.f32 %v13388_v12, %v13803_v4 }
 0x5ce   : > { %10870 = vmatprep.subr.bf16.mxu1 %v10869_v48 }
 0x5d0   : > { %10160 = vmatmul.mubr.f32.gmra.mrb[28].mxu1 %v6952_v50 }
 0x5d1   : > { %10162 = vmatprep.mubr.f32.mxu1 %v6953_v26  ;;  %10872 = vmatpush3.bf16.msra.mxu1 %v10869_v48 }
 0x5d2   : > { %10874 = vmatprep.subr.bf16.mxu1 %v10873_v56 }
 0x5d4   : > { %10163 = vmatmul.mubr.f32.gmra.mrb[30].mxu1 %v6954_v54  ;;  %v10932_v54 = vadd.f32 %v13398_v27, %v4287_v63  ;;  %v4296_v63 = vadd.f32 %v13388_v12, %v13815_v59 }
 0x5d5   : > { %10165 = vmatprep.mubr.f32.mxu1 %v6955_v31  ;;  %10876 = vmatpush3.bf16.msra.mxu1 %v10873_v56  ;;  %v13806_v56 = vld [vmem:[#allocation37_spill] sm:$0xff]  ;;  %v13807_v31 = vld [vmem:[#allocation38_spill] sm:$0xff] }
 0x5d6   : > { %v4289_v50 = vadd.f32 %v13806_v56, %v13388_v12  ;;  %v13816_v56 = vld [vmem:[#allocation47_spill] sm:$0xff] }
 0x5d8   : > { %10166 = vmatmul.mubr.f32.gmra.mrb[0].mxu1 %v6956_v49  ;;  %v4288_v49 = vadd.f32 %v13388_v12, %v13807_v31  ;;  %v13817_v31 = vld [vmem:[#allocation48_spill] sm:$0xff] }
 0x5d9   : > { %10168 = vmatprep.mubr.f32.mxu1 %v6957_v29 }
 0x5dc   : > { %10169 = vmatmul.mubr.f32.gmra.mrb[2].mxu1 %v6958_v23 }
 0x5dd   : > { %10171 = vmatprep.mubr.f32.mxu1 %v6959_v40  ;;  %v10935_v40 = vadd.f32 %v13398_v27, %v4286_v8 }
 0x5e0   : > { %10172 = vmatmul.mubr.f32.gmra.mrb[4].mxu1 %v6960_v58 }
 0x5e1   : > { %10174 = vmatprep.mubr.f32.mxu1 %v6961_v35 }
 0x5e4   : > { %10175 = vmatmul.mubr.f32.gmra.mrb[6].mxu1 %v6962_v62 }
 0x5e5   : > { %10177 = vmatprep.mubr.f32.mxu1 %v6963_v36 }
 0x5e8   : > { %10178 = vmatmul.mubr.f32.gmra.mrb[8].mxu1 %v6964_v37 }
 0x5e9   : > { %10180 = vmatprep.mubr.f32.mxu1 %v6965_v13  ;;  %v13808_v13 = vld [vmem:[#allocation39_spill] sm:$0xff] }
 0x5ec   : > { %10181 = vmatmul.mubr.f32.gmra.mrb[10].mxu1 %v6966_v45  ;;  %v4291_v45 = vadd.f32 %v13808_v13, %v13388_v12 }
 0x5ed   : > { %10183 = vmatprep.mubr.f32.mxu1 %v13356_v33  ;;  %v11638_v33 = vld [vmem:[#allocation2 + $0x69] sm:$0xff] }
 0x5f0   : > { %10184 = vmatmul.mubr.f32.gmra.mrb[12].mxu1 %v13359_v11  ;;  %v11639_v11 = vld [vmem:[#allocation2 + $0x79] sm:$0xff] }
 0x5f1   : > { %10186 = vmatprep.mubr.f32.mxu1 %v6969_v18 }
 0x5f4   : > { %10187 = vmatmul.mubr.f32.gmra.mrb[14].mxu1 %v6970_v2  ;;  %v10938_v2 = vadd.f32 %v13398_v27, %v4289_v50  ;;  %v4299_v50 = vadd.f32 %v13816_v56, %v13388_v12 }
 0x5f5   : > { %10221 = vmatprep.mubr.f32.mxu1 %v11631_v38  ;;  %v13809_v38 = vld [vmem:[#allocation40_spill] sm:$0xff] }
 0x5f8   : > { %10222 = vmatmul.mubr.f32.vlgmr.msra.gmra.mrb[16].mxu1 %v11632_v0  ;;  %v4290_v0 = vadd.f32 %v13388_v12, %v13809_v38 }
 0x5f9   : > { %10224 = vmatprep.mubr.f32.mxu1 %v11633_v1 }
 0x5fc   : > { %10225 = vmatmul.mubr.f32.gmra.mrb[18].mxu1 %v11634_v21 }
 0x5fd   : > { %10227 = vmatprep.mubr.f32.mxu1 %v11635_v60  ;;  %v10941_v60 = vadd.f32 %v13398_v27, %v4288_v49  ;;  %v4298_v49 = vadd.f32 %v13388_v12, %v13817_v31 }
 0x600   : > { %10228 = vmatmul.mubr.f32.gmra.mrb[20].mxu1 %v11636_v61 }
 0x601   : > { %10230 = vmatprep.mubr.f32.mxu1 %v11637_v9 }
 0x604   : > { %10231 = vmatmul.mubr.f32.gmra.mrb[22].mxu1 %v11638_v33 }
 0x605   : > { %10233 = vmatprep.mubr.f32.mxu1 %v11639_v11  ;;  %v13810_v11 = vld [vmem:[#allocation41_spill] sm:$0xff] }
 0x608   : > { %10234 = vmatmul.mubr.f32.gmra.mrb[24].mxu1 %v11640_v51  ;;  %v4293_v51 = vadd.f32 %v13810_v11, %v13388_v12 }
 0x609   : > { %10236 = vmatprep.mubr.f32.mxu1 %v11641_v10 }
 0x60c   : > { %10237 = vmatmul.mubr.f32.gmra.mrb[26].mxu1 %v11642_v15  ;;  %v10944_v15 = vadd.f32 %v13398_v27, %v4291_v45 }
 0x60d   : > { %10239 = vmatprep.mubr.f32.mxu1 %v11643_v55  ;;  %v13811_v55 = vld [vmem:[#allocation42_spill] sm:$0xff] }
 0x610   : > { %10240 = vmatmul.mubr.f32.gmra.mrb[28].mxu1 %v11644_v47  ;;  %v4292_v47 = vadd.f32 %v13388_v12, %v13811_v55 }
 0x611   : > { %10242 = vmatprep.mubr.f32.mxu1 %v11645_v57 }
 0x614   : > { %10243 = vmatmul.mubr.f32.gmra.mrb[30].mxu1 %v11646_v16 }
 0x615   : > { %10245 = vmatprep.mubr.f32.mxu1 %v11647_v7  ;;  %v10947_v7 = vadd.f32 %v13398_v27, %v4290_v0  ;;  %v13459_v0 = vadd.f32 %v13398_v27, %v13388_v12 }
 0x618   : > { %10246 = vmatmul.mubr.f32.gmra.mrb[0].mxu1 %v11648_v6 }
 0x619   : > { %10248 = vmatprep.mubr.f32.mxu1 %v11649_v46 }
 0x61c   : > { %10249 = vmatmul.mubr.f32.gmra.mrb[2].mxu1 %v11650_v5 }
 0x61d   : > { %10251 = vmatprep.mubr.f32.mxu1 %v11651_v24  ;;  %v13812_v24 = vld [vmem:[#allocation43_spill] sm:$0xff] }
 0x620   : > { %10252 = vmatmul.mubr.f32.gmra.mrb[4].mxu1 %v11652_v14  ;;  %v4295_v14 = vadd.f32 %v13812_v24, %v13388_v12 }
 0x621   : > { %10254 = vmatprep.mubr.f32.mxu1 %v11653_v17 }
 0x624   : > { %10255 = vmatmul.mubr.f32.gmra.mrb[6].mxu1 %v11654_v52  ;;  %v10950_v52 = vadd.f32 %v13398_v27, %v4293_v51 }
 0x625   : > { %10257 = vmatprep.mubr.f32.mxu1 %v11655_v41  ;;  %v13813_v41 = vld [vmem:[#allocation44_spill] sm:$0xff] }
 0x628   : > { %10258 = vmatmul.mubr.f32.gmra.mrb[8].mxu1 %v11656_v30  ;;  %v4294_v30 = vadd.f32 %v13388_v12, %v13813_v41 }
 0x629   : > { %10260 = vmatprep.mubr.f32.mxu1 %v11657_v25 }
 0x62c   : > { %10261 = vmatmul.mubr.f32.gmra.mrb[10].mxu1 %v11658_v32 }
 0x62d   : > { %10263 = vmatprep.mubr.f32.mxu1 %v11659_v34  ;;  %v10953_v34 = vadd.f32 %v13398_v27, %v4292_v47 }
 0x630   : > { %10264 = vmatmul.mubr.f32.gmra.mrb[12].mxu1 %v11660_v42 }
 0x631   : > { %10266 = vmatprep.mubr.f32.mxu1 %v11661_v53 }
 0x634   : > { %10267 = vmatmul.mubr.f32.gmra.mrb[14].mxu1 %v11662_v39 }
 0x6cb   : > { %v10223_v48 = vpop.f32.mrb[16].mxu1 }
 0x6cc   : > { %v10926_v44 = vadd.f32 %v10223_v48, %v4285_v19  ;;  %v7430_v22 = vpop.f32.mrb[17].mxu1  ;;  %v4297_v19 = vadd.f32 %v13814_v43, %v13388_v12  ;;  %v10959_v48 = vadd.f32 %v13398_v27, %v4294_v30 }
 0x6cd   : > { %v10929_v3 = vadd.f32 %v7430_v22, %v4284_v28  ;;  %v10956_v28 = vadd.f32 %v13398_v27, %v4295_v14 }
 0x6ce   : > { %v10927_v26 = vadd.f32 %v10926_v44, %v13398_v27 }
 0x6cf   : > { %v10930_v29 = vadd.f32 %v10929_v3, %v13398_v27  ;;  %v10226_v23 = vpop.f32.mrb[18].mxu1 }
 0x6d0   : > { %v7622_v58 = vmax.f32 %v10927_v26, 0.0  ;;  %v10933_v35 = vadd.f32 %v10932_v54, %v10226_v23  ;;  %v7440_v62 = vpop.f32.mrb[19].mxu1  ;;  %v10962_v54 = vadd.f32 %v13398_v27, %v4297_v19 }
 0x6d1   : > { %v7621_v36 = vmax.f32 %v10930_v29, 0.0  ;;  %v10936_v37 = vadd.f32 %v10935_v40, %v7440_v62  ;;  %v10965_v40 = vadd.f32 %v13398_v27, %v4296_v63 }
 0x6d2   : > { %7654 = vst [vmem:[%s13412_s24 + $0x8] sm:$0xff] %v7622_v58  ;;  %v7624_v18 = vmax.f32 %v10933_v35, 0.0 }
 0x6d3   : > { %7653 = vst [vmem:[%s13412_s24] sm:$0xff] %v7621_v36  ;;  %v7623_v1 = vmax.f32 %v10936_v37, 0.0  ;;  %v10229_v21 = vpop.f32.mrb[20].mxu1  ;;  %v10968_v37 = vadd.f32 %v13398_v27, %v4299_v50 }
 0x6d4   : > { %7656 = vst [vmem:[%s13412_s24 + $0x18] sm:$0xff] %v7624_v18  ;;  %v10939_v61 = vadd.f32 %v10938_v2, %v10229_v21  ;;  %v7450_v9 = vpop.f32.mrb[21].mxu1  ;;  %v10971_v18 = vadd.f32 %v13398_v27, %v4298_v49 }
 0x6d5   : > { %7655 = vst [vmem:[%s13412_s24 + $0x10] sm:$0xff] %v7623_v1  ;;  %v10942_v33 = vadd.f32 %v10941_v60, %v7450_v9 }
 0x6d6   : > { %v7626_v10 = vmax.f32 %v10939_v61, 0.0 }
 0x6d7   : > { %v7625_v57 = vmax.f32 %v10942_v33, 0.0  ;;  %v10232_v16 = vpop.f32.mrb[22].mxu1 }
 0x6d8   : > { %7658 = vst [vmem:[%s13412_s24 + $0x28] sm:$0xff] %v7626_v10  ;;  %v10945_v6 = vadd.f32 %v10944_v15, %v10232_v16  ;;  %v7460_v46 = vpop.f32.mrb[23].mxu1 }
 0x6d9   : > { %7657 = vst [vmem:[%s13412_s24 + $0x20] sm:$0xff] %v7625_v57  ;;  %v10948_v5 = vadd.f32 %v10947_v7, %v7460_v46 }
 0x6da   : > { %v7628_v17 = vmax.f32 %v10945_v6, 0.0 }
 0x6db   : > { %v7627_v25 = vmax.f32 %v10948_v5, 0.0  ;;  %v10235_v32 = vpop.f32.mrb[24].mxu1 }
 0x6dc   : > { %7660 = vst [vmem:[%s13412_s24 + $0x38] sm:$0xff] %v7628_v17  ;;  %v10951_v42 = vadd.f32 %v10950_v52, %v10235_v32  ;;  %v7470_v53 = vpop.f32.mrb[25].mxu1 }
 0x6dd   : > { %7659 = vst [vmem:[%s13412_s24 + $0x30] sm:$0xff] %v7627_v25  ;;  %v10954_v39 = vadd.f32 %v10953_v34, %v7470_v53 }
 0x6de   : > { %v7630_v4 = vmax.f32 %v10951_v42, 0.0 }
 0x6df   : > { %v7629_v20 = vmax.f32 %v10954_v39, 0.0  ;;  %v10238_v8 = vpop.f32.mrb[26].mxu1 }
 0x6e0   : > { %7662 = vst [vmem:[%s13412_s24 + $0x48] sm:$0xff] %v7630_v4  ;;  %v10957_v44 = vadd.f32 %v10956_v28, %v10238_v8  ;;  %v7480_v22 = vpop.f32.mrb[27].mxu1 }
 0x6e1   : > { %7661 = vst [vmem:[%s13412_s24 + $0x40] sm:$0xff] %v7629_v20  ;;  %v10960_v3 = vadd.f32 %v10959_v48, %v7480_v22 }
 0x6e2   : > { %v7632_v26 = vmax.f32 %v10957_v44, 0.0 }
 0x6e3   : > { %v7631_v29 = vmax.f32 %v10960_v3, 0.0  ;;  %v10241_v23 = vpop.f32.mrb[28].mxu1 }
 0x6e4   : > { %7664 = vst [vmem:[%s13412_s24 + $0x58] sm:$0xff] %v7632_v26  ;;  %v10963_v58 = vadd.f32 %v10962_v54, %v10241_v23  ;;  %v7490_v35 = vpop.f32.mrb[29].mxu1 }
 0x6e5   : > { %7663 = vst [vmem:[%s13412_s24 + $0x50] sm:$0xff] %v7631_v29  ;;  %v10966_v62 = vadd.f32 %v10965_v40, %v7490_v35 }
 0x6e6   : > { %v7634_v36 = vmax.f32 %v10963_v58, 0.0 }
 0x6e7   : > { %v7633_v13 = vmax.f32 %v10966_v62, 0.0  ;;  %v10244_v45 = vpop.f32.mrb[30].mxu1 }
 0x6e8   : > { %7666 = vst [vmem:[%s13412_s24 + $0x68] sm:$0xff] %v7634_v36  ;;  %v10969_v2 = vadd.f32 %v10968_v37, %v10244_v45  ;;  %v7500_v38 = vpop.f32.mrb[31].mxu1 }
 0x6e9   : > { %7665 = vst [vmem:[%s13412_s24 + $0x60] sm:$0xff] %v7633_v13  ;;  %v10972_v1 = vadd.f32 %v10971_v18, %v7500_v38 }
 0x6ea   : > { %v7636_v21 = vmax.f32 %v10969_v2, 0.0 }
 0x6eb   : > { %v7635_v60 = vmax.f32 %v10972_v1, 0.0  ;;  %v10247_v61 = vpop.f32.mrb[0].mxu1 }
 0x6ec   : > { %7668 = vst [vmem:[%s13412_s24 + $0x78] sm:$0xff] %v7636_v21  ;;  %v10974_v9 = vadd.f32 %v13459_v0, %v10247_v61  ;;  %v7510_v33 = vpop.f32.mrb[1].mxu1 }
 0x6ed   : > { %7667 = vst [vmem:[%s13412_s24 + $0x70] sm:$0xff] %v7635_v60  ;;  %v10976_v11 = vadd.f32 %v13459_v0, %v7510_v33 }
 0x6ee   : > { %v7638_v51 = vmax.f32 %v10974_v9, 0.0 }
 0x6ef   : > { %v7637_v10 = vmax.f32 %v10976_v11, 0.0  ;;  %v10250_v15 = vpop.f32.mrb[2].mxu1 }
 0x6f0   : > { %7670 = vst [vmem:[%s13412_s24 + $0x88] sm:$0xff] %v7638_v51  ;;  %v10978_v12 = vadd.f32 %v13459_v0, %v10250_v15  ;;  %v7520_v27 = vpop.f32.mrb[3].mxu1 }
 0x6f1   : > { %7669 = vst [vmem:[%s13412_s24 + $0x80] sm:$0xff] %v7637_v10  ;;  %v10980_v55 = vadd.f32 %v13459_v0, %v7520_v27 }
 0x6f2   : > { %v7640_v47 = vmax.f32 %v10978_v12, 0.0 }
 0x6f3   : > { %v7639_v57 = vmax.f32 %v10980_v55, 0.0  ;;  %v10253_v16 = vpop.f32.mrb[4].mxu1 }
 0x6f4   : > { %7672 = vst [vmem:[%s13412_s24 + $0x98] sm:$0xff] %v7640_v47  ;;  %v10982_v7 = vadd.f32 %v13459_v0, %v10253_v16  ;;  %v7530_v6 = vpop.f32.mrb[5].mxu1 }
 0x6f5   : > { %7671 = vst [vmem:[%s13412_s24 + $0x90] sm:$0xff] %v7639_v57  ;;  %v10984_v46 = vadd.f32 %v13459_v0, %v7530_v6 }
 0x6f6   : > { %v7642_v5 = vmax.f32 %v10982_v7, 0.0 }
 0x6f7   : > { %v7641_v24 = vmax.f32 %v10984_v46, 0.0  ;;  %v10256_v14 = vpop.f32.mrb[6].mxu1 }
 0x6f8   : > { %7674 = vst [vmem:[%s13412_s24 + $0xa8] sm:$0xff] %v7642_v5  ;;  %v10986_v17 = vadd.f32 %v13459_v0, %v10256_v14  ;;  %v7540_v52 = vpop.f32.mrb[7].mxu1 }
 0x6f9   : > { %7673 = vst [vmem:[%s13412_s24 + $0xa0] sm:$0xff] %v7641_v24  ;;  %v10988_v41 = vadd.f32 %v13459_v0, %v7540_v52 }
 0x6fa   : > { %v7644_v30 = vmax.f32 %v10986_v17, 0.0 }
 0x6fb   : > { %v7643_v25 = vmax.f32 %v10988_v41, 0.0  ;;  %v10259_v32 = vpop.f32.mrb[8].mxu1 }
 0x6fc   : > { %7676 = vst [vmem:[%s13412_s24 + $0xb8] sm:$0xff] %v7644_v30  ;;  %v10990_v34 = vadd.f32 %v13459_v0, %v10259_v32  ;;  %v7550_v42 = vpop.f32.mrb[9].mxu1 }
 0x6fd   : > { %7675 = vst [vmem:[%s13412_s24 + $0xb0] sm:$0xff] %v7643_v25  ;;  %v10992_v53 = vadd.f32 %v13459_v0, %v7550_v42 }
 0x6fe   : > { %v7646_v39 = vmax.f32 %v10990_v34, 0.0 }
 0x6ff   : > { %v7645_v43 = vmax.f32 %v10992_v53, 0.0  ;;  %v10262_v19 = vpop.f32.mrb[10].mxu1 }
 0x700   : > { %7678 = vst [vmem:[%s13412_s24 + $0xc8] sm:$0xff] %v7646_v39  ;;  %v10994_v4 = vadd.f32 %v13459_v0, %v10262_v19  ;;  %v7560_v28 = vpop.f32.mrb[11].mxu1 }
 0x701   : > { %7677 = vst [vmem:[%s13412_s24 + $0xc0] sm:$0xff] %v7645_v43  ;;  %v10996_v59 = vadd.f32 %v13459_v0, %v7560_v28 }
 0x702   : > { %v7648_v63 = vmax.f32 %v10994_v4, 0.0 }
 0x703   : > { %v7647_v20 = vmax.f32 %v10996_v59, 0.0  ;;  %v10265_v8 = vpop.f32.mrb[12].mxu1 }
 0x704   : > { %7680 = vst [vmem:[%s13412_s24 + $0xd8] sm:$0xff] %v7648_v63  ;;  %v10998_v48 = vadd.f32 %v13459_v0, %v10265_v8  ;;  %v7570_v44 = vpop.f32.mrb[13].mxu1 }
 0x705   : > { %7679 = vst [vmem:[%s13412_s24 + $0xd0] sm:$0xff] %v7647_v20  ;;  %v11000_v22 = vadd.f32 %v13459_v0, %v7570_v44 }
 0x706   : > { %v7650_v3 = vmax.f32 %v10998_v48, 0.0 }
 0x707   : > { %v7649_v56 = vmax.f32 %v11000_v22, 0.0  ;;  %v10268_v50 = vpop.f32.mrb[14].mxu1 }
 0x708   : > { %7682 = vst [vmem:[%s13412_s24 + $0xe8] sm:$0xff] %v7650_v3  ;;  %v11002_v26 = vadd.f32 %v13459_v0, %v10268_v50  ;;  %v7580_v54 = vpop.f32.mrb[15].mxu1 }
 0x709   : > { %7681 = vst [vmem:[%s13412_s24 + $0xe0] sm:$0xff] %v7649_v56  ;;  %v11004_v31 = vadd.f32 %v13459_v0, %v7580_v54 }
 0x70a   : > { %v7652_v49 = vmax.f32 %v11002_v26, 0.0 }
 0x70b   : > { %v7651_v29 = vmax.f32 %v11004_v31, 0.0 }
 0x70c   : > { %7684 = vst [vmem:[%s13412_s24 + $0xf8] sm:$0xff] %v7652_v49 }
 0x70d   : > { %7683 = vst [vmem:[%s13412_s24 + $0xf0] sm:$0xff] %v7651_v29 }
 0x70e   : > { %11818 = shalt.err (!%p11815_p13)
}
 0x70f   : > { %s11819_s23 = scalar_lea.hbm %s13499_s28, 4096  ;;  %s11823_s9 = scalar_lea.hbm %s13552_s5, 8192 }
 0x710   : > { %p11820_p9 = scmp.ne.s32.totalorder %s13499_s28, %s11819_s23  ;;  %p11824_p4 = scmp.lt.u32.totalorder %s13499_s28, %s13552_s5 }
 0x711   : > { %p11825_p8 = scmp.lt.u32.totalorder %s11823_s9, %s11819_s23  ;;  %p11827_p3 = scmp.lt.u32.totalorder %s11819_s23, %s13499_s28 }
 0x712   : > { %p11821_p0 = pnand %p11820_p9, %p12089_p10 }
 0x713   : > { %p11826_p6 = por %p11825_p8, %p11824_p4 }
 0x714   : > { %p11822_p11 = pneg %p11821_p0 }
 0x715   : > { %p11828_p5 = por %p11827_p3, %p11826_p6 }
 0x717   : > { %p11829_p7 = pnand %p11828_p5, %p11822_p11 }
 0x719   : > { %11832 = shalt.err (!%p11829_p7)
}
 0x71a   : > { %s11892_s26 = smov 128   ;;  %s11893_s15 = smov 8  }
 0x71b   : > { %11551 = dma.vmem_to_hbm [thread:$0]  (%p12089_p10), %s13501_s27, 4096, %s13499_s28, %s7686_s22, %s11892_s26, %s11892_s26, %s11893_s15  }
 0x71c PF: > { %s7714_s8 = sand.u32 1, %s11867_s18   ;;  %p13818_p12 = scmp.ne.s32.totalorder %s13638_s25, 0 }
 0x71d   : > { %p13819_p1 = scmp.ge.s32.totalorder %s11879_s21, 2  ;;  %s7715_s12 = scalar_lea.sflag [#allocation7], %s7714_s8 }
 0x71f   : > { %p11571_p2 = pnand %p13819_p1, %p13818_p12 }
 0x721   : > { %11862 = dma.done.wait (!%p11571_p2), %s7715_s12, 4096  }
 0x722   : > { %11864 = vsyncadd (!%p11571_p2), %s7715_s12, 4294963200  ;;  %p20_p13 = scmp.ge.s32.totalorder %s12079_s14, 4   ;;  %s13820_s18 = smov %s11871_s19 }
 0x723   : > { %s13821_s19 = smov %s11875_s20  ;;  %s13822_s20 = smov %s12095_s7 }
 0x724   : > { %s13823_s21 = smov %s12079_s14  ;;  %22 = sbr.rel (!%p20_p13) target bundleno = 7 (0x7), region = 123 }
 0x72b   :  { %7720 = vsyncpa [#allocation6], 1 }
 0x72c   :  { %7722 = vsyncpa [#allocation6 + $0x1], 1 }
 0x72d   :  { %7723 = vsyncpa [#allocation9], 1 }
 0x72e   :  { %7724 = vsyncpa [#allocation12], 1 }
 0x72f   :  { %7725 = vsyncpa [#allocation7], 1 }
 0x730   :  { %7727 = vsyncpa [#allocation7 + $0x1], 1 }

</bundles_post_ra>
